<compile_context>
chip_gen: v5e
topology: v5e:2x2
jax: 0.10.0
libtpu: 0.0.40
codegen_flags: <defaults>
</compile_context>

<pallas_src>
import jax
import jax.numpy as jnp
from jax.experimental import pallas as pl
from jax.experimental.pallas import tpu as pltpu


D_IN = 784      # 28*28
D_HID = 400
D_LAT = 20
D_MULV = 128    # fc21||fc22 output padded to a full 128-lane vreg


def _vae_kernel(x_ref, eps_ref,
                w1_ref, b1_ref,
                w2c_ref, b2c_ref,
                w3_ref, b3_ref,
                w4_ref, b4_ref,
                recon_ref, mulv_ref):
    # ---- encode: h1 = relu(fc1(x)) ------------------------------------
    x = x_ref[...].astype(jnp.bfloat16)                                   # (TB, 784)
    h1 = jnp.dot(x, w1_ref[...], preferred_element_type=jnp.float32) + b1_ref[...]
    h1 = jnp.maximum(h1, 0.0).astype(jnp.bfloat16)                        # (TB, 400)

    # ---- fused fc21 || fc22 -> lane-dense (TB, 128) result (lanes 40..127 = 0)
    mulv = jnp.dot(h1, w2c_ref[...], preferred_element_type=jnp.float32) + b2c_ref[...]
    mu = mulv[:, :D_LAT]                                                  # (TB, 20) f32
    logvar = mulv[:, D_LAT:2 * D_LAT]                                     # (TB, 20) f32

    # ---- reparameterize (training semantics), kept in f32 --------------
    std = jnp.exp(0.5 * logvar)
    z = eps_ref[...] * std + mu                                           # (TB, 20) f32

    # ---- decode: sigmoid(fc4(relu(fc3(z)))) -----------------------------
    h3 = jnp.dot(z.astype(jnp.bfloat16), w3_ref[...],
                 preferred_element_type=jnp.float32) + b3_ref[...]
    h3 = jnp.maximum(h3, 0.0).astype(jnp.bfloat16)                        # (TB, 400)
    logits = jnp.dot(h3, w4_ref[...], preferred_element_type=jnp.float32) + b4_ref[...]

    # Sigmoid in f32 (safe on v5e's non-bf16 EUP); store narrowed to bf16 to
    # halve the dominant 784-wide HBM writeback.
    recon_ref[...] = jax.nn.sigmoid(logits).astype(jnp.bfloat16)          # (TB, 784) bf16
    mulv_ref[...] = mulv                                                  # (TB, 128) f32


def _pick_batch_tile(B):
    # Largest MXU/sublane-friendly tile (<= 512 rows, v7x-safe VMEM budget)
    # that still yields >= 2 grid steps so megacore sharding has work for both
    # TensorCores.  Minimum tile is 16 (bf16 sublane pack); tiny batches use a
    # single padded 16-row tile.
    for tb in (512, 256, 128, 64, 32, 16):
        if B >= 2 * tb:
            return tb
    return 16


def vae_baseline_view_forward(x_nchw, params, eps):
    """x_nchw: (B, 1, 28, 28); eps: (B, 20) f32 (reparam noise).

    Fast path: pass x in bf16 (halves input DMA); f32 is also accepted and
    cast in-kernel.
    """
    B = x_nchw.shape[0]
    x_flat = x_nchw.reshape(-1, D_IN)                                     # x.view(-1, 784)

    TB = _pick_batch_tile(B)
    n_tiles = pl.cdiv(B, TB)
    B_pad = n_tiles * TB
    if B_pad != B:
        x_flat = jnp.pad(x_flat, ((0, B_pad - B), (0, 0)))
        eps = jnp.pad(eps, ((0, B_pad - B), (0, 0)))

    def batch_spec(block):
        return pl.BlockSpec(block, lambda i: (i, 0))

    def resident_spec(shape):
        # Constant index_map -> weight/bias stays VMEM-resident across steps.
        return pl.BlockSpec(shape, lambda i: (0, 0))

    operands = (
        x_flat, eps,
        params["w1"], params["b1"],
        params["w2c"], params["b2c"],
        params["w3"], params["b3"],
        params["w4"], params["b4"],
    )
    in_specs = [
        batch_spec((TB, D_IN)),
        batch_spec((TB, D_LAT)),
        resident_spec((D_IN, D_HID)),  resident_spec((1, D_HID)),
        resident_spec((D_HID, D_MULV)), resident_spec((1, D_MULV)),
        resident_spec((D_LAT, D_HID)), resident_spec((1, D_HID)),
        resident_spec((D_HID, D_IN)),  resident_spec((1, D_IN)),
    ]
    out_specs = (batch_spec((TB, D_IN)), batch_spec((TB, D_MULV)))

    flops = 2 * B_pad * (D_IN * D_HID + D_HID * D_MULV + D_LAT * D_HID + D_HID * D_IN)
    weight_bytes = (D_IN * D_HID + D_HID * D_MULV + D_LAT * D_HID + D_HID * D_IN) * 2 \
                   + (D_HID + D_MULV + D_HID + D_IN) * 4
    bytes_accessed = (B_pad * D_IN * x_flat.dtype.itemsize      # x in
                      + B_pad * D_LAT * 4                       # eps in
                      + B_pad * D_IN * 2                        # recon out (bf16)
                      + B_pad * D_MULV * 4                      # mulv out
                      + weight_bytes)
    cost = pl.CostEstimate(flops=flops,
                           transcendentals=B_pad * (D_LAT + 2 * D_IN),
                           bytes_accessed=bytes_accessed)

    recon, mulv = pl.pallas_call(
        _vae_kernel,
        out_shape=(
            jax.ShapeDtypeStruct((B_pad, D_IN), jnp.bfloat16),
            jax.ShapeDtypeStruct((B_pad, D_MULV), jnp.float32),
        ),
        grid=(n_tiles,),
        in_specs=in_specs,
        out_specs=out_specs,
        compiler_params=pltpu.CompilerParams(
            dimension_semantics=("parallel",),
            vmem_limit_bytes=48 * 1024 * 1024,
        ),
        cost_estimate=cost,
    )(*operands)

    recon = recon[:B]
    mulv = mulv[:B]
    mu = mulv[:, :D_LAT]
    logvar = mulv[:, D_LAT:2 * D_LAT]

    # Glue reshapes matching the PyTorch .view calls, including the quirky
    # 20 -> (-1, 10, 1, 1) that doubles the leading dim.
    return (recon.reshape(-1, 1, 28, 28),
            mu.reshape(-1, 10, 1, 1),
            logvar.reshape(-1, 10, 1, 1))


def _init_linear(key, fan_in, fan_out):
    # PyTorch-style uniform(-1/sqrt(fan_in), 1/sqrt(fan_in)); weights stored bf16
    # (MXU-native), biases f32 (added after f32 accumulation).
    kw, kb = jax.random.split(key)
    bound = 1.0 / jnp.sqrt(jnp.float32(fan_in))
    w = jax.random.uniform(kw, (fan_in, fan_out), jnp.float32, -bound, bound)
    b = jax.random.uniform(kb, (1, fan_out), jnp.float32, -bound, bound)
    return w.astype(jnp.bfloat16), b


def init_params(key):
    k1, k21, k22, k3, k4 = jax.random.split(key, 5)
    w1, b1 = _init_linear(k1, D_IN, D_HID)
    w21, b21 = _init_linear(k21, D_HID, D_LAT)
    w22, b22 = _init_linear(k22, D_HID, D_LAT)
    w3, b3 = _init_linear(k3, D_LAT, D_HID)
    w4, b4 = _init_linear(k4, D_HID, D_IN)
    # Fuse fc21 / fc22 into one weight, then zero-pad to 128 output lanes so
    # the mu||logvar kernel output is a full lane-dense vreg block.
    w2c = jnp.concatenate([w21, w22], axis=1)                       # (400, 40)
    b2c = jnp.concatenate([b21, b22], axis=1)                       # (1, 40)
    w2c = jnp.pad(w2c, ((0, 0), (0, D_MULV - 2 * D_LAT)))           # (400, 128)
    b2c = jnp.pad(b2c, ((0, 0), (0, D_MULV - 2 * D_LAT)))           # (1, 128)
    return dict(w1=w1, b1=b1, w2c=w2c, b2c=b2c, w3=w3, b3=b3, w4=w4, b4=b4)


def _reference_forward(x_nchw, params, eps):
    """Pure-JAX reference (f32 math on the bf16-stored weights)."""
    x = x_nchw.reshape(-1, D_IN)
    h1 = jnp.maximum(x @ params["w1"].astype(jnp.float32) + params["b1"], 0.0)
    mulv = h1 @ params["w2c"].astype(jnp.float32) + params["b2c"]
    mu, logvar = mulv[:, :D_LAT], mulv[:, D_LAT:2 * D_LAT]
    z = eps * jnp.exp(0.5 * logvar) + mu
    h3 = jnp.maximum(z @ params["w3"].astype(jnp.float32) + params["b3"], 0.0)
    recon = jax.nn.sigmoid(h3 @ params["w4"].astype(jnp.float32) + params["b4"])
    return recon, mu, logvar


if __name__ == "__main__":
    key = jax.random.PRNGKey(0)
    k_params, k_x, k_eps = jax.random.split(key, 3)

    B = 2
    params = init_params(k_params)
    x = jax.random.uniform(k_x, (B, 1, 28, 28), jnp.float32)              # NCHW, like MNIST
    eps = jax.random.normal(k_eps, (B, D_LAT), jnp.float32)               # reparam noise

    recon, mu, logvar = vae_baseline_view_forward(x, params, eps)
    jax.block_until_ready((recon, mu, logvar))

    assert recon.shape == (B, 1, 28, 28)
    assert mu.shape == (2 * B, 10, 1, 1)        # .view(-1, 10, 1, 1) on a (B, 20) tensor
    assert logvar.shape == (2 * B, 10, 1, 1)

    # Loose-tolerance check vs. a plain-JAX f32 reference (kernel matmuls use
    # bf16 inputs with f32 accumulation; recon is emitted in bf16).
    recon_r, mu_r, logvar_r = _reference_forward(x, params, eps)
    recon_f32 = recon.astype(jnp.float32)
    assert jnp.all(jnp.isfinite(recon_f32))
    assert jnp.allclose(recon_f32.reshape(B, D_IN), recon_r, atol=0.1, rtol=0.1)
    assert jnp.allclose(mu.reshape(B, D_LAT), mu_r, atol=0.1, rtol=0.1)
    assert jnp.allclose(logvar.reshape(B, D_LAT), logvar_r, atol=0.1, rtol=0.1)

    print("KERNEL_OK")
</pallas_src>

<mosaic_0001>
module attributes {stable_mosaic.version = 11 : i64} {
  func.func @_vae_kernel(%arg0: i32, %arg1: memref<16x784xf32, #tpu.memory_space<vmem>>, %arg2: memref<16x20xf32, #tpu.memory_space<vmem>>, %arg3: memref<784x400xbf16, #tpu.memory_space<vmem>>, %arg4: memref<1x400xf32, #tpu.memory_space<vmem>>, %arg5: memref<400x128xbf16, #tpu.memory_space<vmem>>, %arg6: memref<1x128xf32, #tpu.memory_space<vmem>>, %arg7: memref<20x400xbf16, #tpu.memory_space<vmem>>, %arg8: memref<1x400xf32, #tpu.memory_space<vmem>>, %arg9: memref<400x784xbf16, #tpu.memory_space<vmem>>, %arg10: memref<1x784xf32, #tpu.memory_space<vmem>>, %arg11: memref<16x784xbf16, #tpu.memory_space<vmem>>, %arg12: memref<16x128xf32, #tpu.memory_space<vmem>>) attributes {dimension_semantics = [#tpu.dimension_semantics<parallel>], iteration_bounds = array<i64: 1>, scalar_prefetch = 0 : i64, scratch_operands = 0 : i64, tpu.core_type = #tpu.core_type<tc>, window_params = [{transform_indices = @transform_0, window_bounds = array<i64: 16, 784>}, {transform_indices = @transform_1, window_bounds = array<i64: 16, 20>}, {pipeline_mode = #tpu.pipeline_mode<synchronous>, transform_indices = @transform_2, window_bounds = array<i64: 784, 400>}, {pipeline_mode = #tpu.pipeline_mode<synchronous>, transform_indices = @transform_3, window_bounds = array<i64: 1, 400>}, {pipeline_mode = #tpu.pipeline_mode<synchronous>, transform_indices = @transform_4, window_bounds = array<i64: 400, 128>}, {pipeline_mode = #tpu.pipeline_mode<synchronous>, transform_indices = @transform_5, window_bounds = array<i64: 1, 128>}, {pipeline_mode = #tpu.pipeline_mode<synchronous>, transform_indices = @transform_6, window_bounds = array<i64: 20, 400>}, {pipeline_mode = #tpu.pipeline_mode<synchronous>, transform_indices = @transform_7, window_bounds = array<i64: 1, 400>}, {pipeline_mode = #tpu.pipeline_mode<synchronous>, transform_indices = @transform_8, window_bounds = array<i64: 400, 784>}, {pipeline_mode = #tpu.pipeline_mode<synchronous>, transform_indices = @transform_9, window_bounds = array<i64: 1, 784>}, {transform_indices = @transform_10, window_bounds = array<i64: 16, 784>}, {transform_indices = @transform_11, window_bounds = array<i64: 16, 128>}]} {
    %c0 = arith.constant 0 : index
    %c0_0 = arith.constant 0 : index
    %0 = vector.load %arg1[%c0, %c0_0] : memref<16x784xf32, #tpu.memory_space<vmem>>, vector<16x784xf32>
    %1 = arith.truncf %0 : vector<16x784xf32> to vector<16x784xbf16>
    %c0_1 = arith.constant 0 : index
    %c0_2 = arith.constant 0 : index
    %2 = vector.load %arg3[%c0_1, %c0_2] : memref<784x400xbf16, #tpu.memory_space<vmem>>, vector<784x400xbf16>
    %cst = arith.constant dense<0.000000e+00> : vector<16x400xf32>
    %3 = tpu.matmul %1, %2, %cst {dimension_numbers = #tpu.dot_dimension_numbers<[1], [0], [0], [1], [0, 0, 1, 1], [], []>} : vector<16x784xbf16>, vector<784x400xbf16>, vector<16x400xf32> -> vector<16x400xf32>
    %c0_3 = arith.constant 0 : index
    %c0_4 = arith.constant 0 : index
    %4 = vector.load %arg4[%c0_3, %c0_4] : memref<1x400xf32, #tpu.memory_space<vmem>>, vector<1x400xf32>
    %5 = vector.broadcast %4 : vector<1x400xf32> to vector<16x400xf32>
    %6 = arith.addf %3, %5 : vector<16x400xf32>
    %cst_5 = arith.constant 0.000000e+00 : f32
    %7 = vector.broadcast %cst_5 : f32 to vector<16x400xf32>
    %8 = arith.maximumf %6, %7 : vector<16x400xf32>
    %9 = arith.truncf %8 : vector<16x400xf32> to vector<16x400xbf16>
    %c0_6 = arith.constant 0 : index
    %c0_7 = arith.constant 0 : index
    %10 = vector.load %arg5[%c0_6, %c0_7] : memref<400x128xbf16, #tpu.memory_space<vmem>>, vector<400x128xbf16>
    %cst_8 = arith.constant dense<0.000000e+00> : vector<16x128xf32>
    %11 = tpu.matmul %9, %10, %cst_8 {dimension_numbers = #tpu.dot_dimension_numbers<[1], [0], [0], [1], [0, 0, 1, 1], [], []>} : vector<16x400xbf16>, vector<400x128xbf16>, vector<16x128xf32> -> vector<16x128xf32>
    %c0_9 = arith.constant 0 : index
    %c0_10 = arith.constant 0 : index
    %12 = vector.load %arg6[%c0_9, %c0_10] : memref<1x128xf32, #tpu.memory_space<vmem>>, vector<1x128xf32>
    %13 = vector.broadcast %12 : vector<1x128xf32> to vector<16x128xf32>
    %14 = arith.addf %11, %13 : vector<16x128xf32>
    %15 = vector.extract_strided_slice %14 {offsets = [0, 0], sizes = [16, 20], strides = [1, 1]} : vector<16x128xf32> to vector<16x20xf32>
    %16 = vector.extract_strided_slice %14 {offsets = [0, 20], sizes = [16, 20], strides = [1, 1]} : vector<16x128xf32> to vector<16x20xf32>
    %cst_11 = arith.constant 5.000000e-01 : f32
    %17 = vector.broadcast %cst_11 : f32 to vector<16x20xf32>
    %18 = arith.mulf %17, %16 : vector<16x20xf32>
    %19 = math.exp %18 : vector<16x20xf32>
    %c0_12 = arith.constant 0 : index
    %c0_13 = arith.constant 0 : index
    %20 = vector.load %arg2[%c0_12, %c0_13] : memref<16x20xf32, #tpu.memory_space<vmem>>, vector<16x20xf32>
    %21 = arith.mulf %20, %19 : vector<16x20xf32>
    %22 = arith.addf %21, %15 : vector<16x20xf32>
    %23 = arith.truncf %22 : vector<16x20xf32> to vector<16x20xbf16>
    %c0_14 = arith.constant 0 : index
    %c0_15 = arith.constant 0 : index
    %24 = vector.load %arg7[%c0_14, %c0_15] : memref<20x400xbf16, #tpu.memory_space<vmem>>, vector<20x400xbf16>
    %cst_16 = arith.constant dense<0.000000e+00> : vector<16x400xf32>
    %25 = tpu.matmul %23, %24, %cst_16 {dimension_numbers = #tpu.dot_dimension_numbers<[1], [0], [0], [1], [0, 0, 1, 1], [], []>} : vector<16x20xbf16>, vector<20x400xbf16>, vector<16x400xf32> -> vector<16x400xf32>
    %c0_17 = arith.constant 0 : index
    %c0_18 = arith.constant 0 : index
    %26 = vector.load %arg8[%c0_17, %c0_18] : memref<1x400xf32, #tpu.memory_space<vmem>>, vector<1x400xf32>
    %27 = vector.broadcast %26 : vector<1x400xf32> to vector<16x400xf32>
    %28 = arith.addf %25, %27 : vector<16x400xf32>
    %cst_19 = arith.constant 0.000000e+00 : f32
    %29 = vector.broadcast %cst_19 : f32 to vector<16x400xf32>
    %30 = arith.maximumf %28, %29 : vector<16x400xf32>
    %31 = arith.truncf %30 : vector<16x400xf32> to vector<16x400xbf16>
    %c0_20 = arith.constant 0 : index
    %c0_21 = arith.constant 0 : index
    %32 = vector.load %arg9[%c0_20, %c0_21] : memref<400x784xbf16, #tpu.memory_space<vmem>>, vector<400x784xbf16>
    %cst_22 = arith.constant dense<0.000000e+00> : vector<16x784xf32>
    %33 = tpu.matmul %31, %32, %cst_22 {dimension_numbers = #tpu.dot_dimension_numbers<[1], [0], [0], [1], [0, 0, 1, 1], [], []>} : vector<16x400xbf16>, vector<400x784xbf16>, vector<16x784xf32> -> vector<16x784xf32>
    %c0_23 = arith.constant 0 : index
    %c0_24 = arith.constant 0 : index
    %34 = vector.load %arg10[%c0_23, %c0_24] : memref<1x784xf32, #tpu.memory_space<vmem>>, vector<1x784xf32>
    %35 = vector.broadcast %34 : vector<1x784xf32> to vector<16x784xf32>
    %36 = arith.addf %33, %35 : vector<16x784xf32>
    %37 = arith.negf %36 : vector<16x784xf32>
    %38 = math.exp %37 : vector<16x784xf32>
    %cst_25 = arith.constant 1.000000e+00 : f32
    %39 = vector.broadcast %cst_25 : f32 to vector<16x784xf32>
    %40 = arith.addf %39, %38 : vector<16x784xf32>
    %41 = arith.divf %39, %40 : vector<16x784xf32>
    %42 = arith.truncf %41 : vector<16x784xf32> to vector<16x784xbf16>
    %c0_26 = arith.constant 0 : index
    %c0_27 = arith.constant 0 : index
    %43 = vector.load %arg11[%c0_26, %c0_27] : memref<16x784xbf16, #tpu.memory_space<vmem>>, vector<16x784xbf16>
    tpu.vector_store %arg11[%c0_26, %c0_27], %42 {strides = array<i32>} : memref<16x784xbf16, #tpu.memory_space<vmem>>, vector<16x784xbf16>,
    %c0_28 = arith.constant 0 : index
    %c0_29 = arith.constant 0 : index
    %44 = vector.load %arg12[%c0_28, %c0_29] : memref<16x128xf32, #tpu.memory_space<vmem>>, vector<16x128xf32>
    tpu.vector_store %arg12[%c0_28, %c0_29], %14 {strides = array<i32>} : memref<16x128xf32, #tpu.memory_space<vmem>>, vector<16x128xf32>,
    return
  }
  func.func @transform_0(%arg0: i32) -> (i32, i32) {
    %c0_i32 = arith.constant 0 : i32
    %c0_i32_0 = arith.constant 0 : i32
    return %arg0, %c0_i32 : i32, i32
  }
  func.func @transform_1(%arg0: i32) -> (i32, i32) {
    %c0_i32 = arith.constant 0 : i32
    %c0_i32_0 = arith.constant 0 : i32
    return %arg0, %c0_i32 : i32, i32
  }
  func.func @transform_2(%arg0: i32) -> (i32, i32) {
    %c0_i32 = arith.constant 0 : i32
    %c0_i32_0 = arith.constant 0 : i32
    %c0_i32_1 = arith.constant 0 : i32
    return %c0_i32, %c0_i32_0 : i32, i32
  }
  func.func @transform_3(%arg0: i32) -> (i32, i32) {
    %c0_i32 = arith.constant 0 : i32
    %c0_i32_0 = arith.constant 0 : i32
    %c0_i32_1 = arith.constant 0 : i32
    return %c0_i32, %c0_i32_0 : i32, i32
  }
  func.func @transform_4(%arg0: i32) -> (i32, i32) {
    %c0_i32 = arith.constant 0 : i32
    %c0_i32_0 = arith.constant 0 : i32
    %c0_i32_1 = arith.constant 0 : i32
    return %c0_i32, %c0_i32_0 : i32, i32
  }
  func.func @transform_5(%arg0: i32) -> (i32, i32) {
    %c0_i32 = arith.constant 0 : i32
    %c0_i32_0 = arith.constant 0 : i32
    %c0_i32_1 = arith.constant 0 : i32
    return %c0_i32, %c0_i32_0 : i32, i32
  }
  func.func @transform_6(%arg0: i32) -> (i32, i32) {
    %c0_i32 = arith.constant 0 : i32
    %c0_i32_0 = arith.constant 0 : i32
    %c0_i32_1 = arith.constant 0 : i32
    return %c0_i32, %c0_i32_0 : i32, i32
  }
  func.func @transform_7(%arg0: i32) -> (i32, i32) {
    %c0_i32 = arith.constant 0 : i32
    %c0_i32_0 = arith.constant 0 : i32
    %c0_i32_1 = arith.constant 0 : i32
    return %c0_i32, %c0_i32_0 : i32, i32
  }
  func.func @transform_8(%arg0: i32) -> (i32, i32) {
    %c0_i32 = arith.constant 0 : i32
    %c0_i32_0 = arith.constant 0 : i32
    %c0_i32_1 = arith.constant 0 : i32
    return %c0_i32, %c0_i32_0 : i32, i32
  }
  func.func @transform_9(%arg0: i32) -> (i32, i32) {
    %c0_i32 = arith.constant 0 : i32
    %c0_i32_0 = arith.constant 0 : i32
    %c0_i32_1 = arith.constant 0 : i32
    return %c0_i32, %c0_i32_0 : i32, i32
  }
  func.func @transform_10(%arg0: i32) -> (i32, i32) {
    %c0_i32 = arith.constant 0 : i32
    %c0_i32_0 = arith.constant 0 : i32
    return %arg0, %c0_i32 : i32, i32
  }
  func.func @transform_11(%arg0: i32) -> (i32, i32) {
    %c0_i32 = arith.constant 0 : i32
    %c0_i32_0 = arith.constant 0 : i32
    return %arg0, %c0_i32 : i32, i32
  }
}

</mosaic_0001>

<bundles_post_ra>
// kernel: tpu_custom_call.1
= control target key start
LH: loop header
LB: loop body
LE: loop exit
PB: predicated region body
PF: predicated region fallthrough
CT: control target
= control target key end

     0   :  { %17 = vsyncpa [#allocation3], 0  ;;  %vm1247_vm0 = vcmask 130048   ;;  %s8771_s0 = inlined_call_operand.vmem [shape: f32[16,784], index: 0, kind: input, shape index: {}]   ;;  %s8772_s1 = inlined_call_operand.vmem [shape: f32[16,20], index: 1, kind: input, shape index: {}]   ;;  %s8773_s2 = inlined_call_operand.vmem [shape: bf16[784,400], index: 2, kind: input, shape index: {}]   ;;  %s8774_s3 = inlined_call_operand.vmem [shape: f32[1,400], index: 3, kind: input, shape index: {}]   ;;  %s8775_s4 = inlined_call_operand.vmem [shape: bf16[400,128], index: 4, kind: input, shape index: {}]   ;;  %s8776_s5 = inlined_call_operand.vmem [shape: f32[1,128], index: 5, kind: input, shape index: {}]   ;;  %s8777_s6 = inlined_call_operand.vmem [shape: bf16[20,400], index: 6, kind: input, shape index: {}]   ;;  %s8778_s7 = inlined_call_operand.vmem [shape: f32[1,400], index: 7, kind: input, shape index: {}]   ;;  %s8779_s8 = inlined_call_operand.vmem [shape: bf16[400,784], index: 8, kind: input, shape index: {}]   ;;  %s8780_s9 = inlined_call_operand.vmem [shape: f32[1,784], index: 9, kind: input, shape index: {}]   ;;  %s8781_s10 = inlined_call_operand.hbm [shape: bf16[16,784], index: 10, kind: output, shape index: {0}]   ;;  %s8782_s11 = inlined_call_operand.hbm [shape: f32[16,128], index: 11, kind: output, shape index: {1}]  }
   0x1   :  { %v4016_v0 = vld [vmem:[%s8773_s2 + $0xe0] sm:$0xf]  ;;  %v5562_v1 = vld [vmem:[%s8773_s2 + $0xec] sm:$0xf0] }
   0x2   :  { %v4144_v2 = vld [vmem:[%s8773_s2 + $0x1e0] sm:$0xf]  ;;  %v4017_v3 = vor.u32 %v5562_v1, %v4016_v0  ;;  %v5594_v4 = vld [vmem:[%s8773_s2 + $0x1ec] sm:$0xf0] }
   0x3   :  { %v4272_v5 = vld [vmem:[%s8773_s2 + $0x2e0] sm:$0xf]  ;;  %v5626_v6 = vld [vmem:[%s8773_s2 + $0x2ec] sm:$0xf0]  ;;  %v4145_v7 = vor.u32 %v5594_v4, %v4144_v2 }
   0x4   :  { %v4273_v8 = vor.u32 %v5626_v6, %v4272_v5  ;;  %v4400_v9 = vld [vmem:[%s8773_s2 + $0x3e0] sm:$0xf]  ;;  %v5658_v10 = vld [vmem:[%s8773_s2 + $0x3ec] sm:$0xf0]  ;;  %1251 = vmatpush.bf16.msra.mxu0 %v4017_v3 }
   0x5   :  { %v4000_v11 = vld [vmem:[%s8773_s2 + $0xc0] sm:$0xf]  ;;  %v4401_v12 = vor.u32 %v5658_v10, %v4400_v9  ;;  %v5558_v13 = vld [vmem:[%s8773_s2 + $0xcc] sm:$0xf0]  ;;  %1265 = vmatpush.bf16.msra.mxu1 %v4145_v7 }
   0x6   :  { %v4128_v14 = vld [vmem:[%s8773_s2 + $0x1c0] sm:$0xf]  ;;  %v5590_v15 = vld [vmem:[%s8773_s2 + $0x1cc] sm:$0xf0]  ;;  %1279 = vmatpush.bf16.msra.mxu2 %v4273_v8  ;;  %v4001_v16 = vor.u32 %v5558_v13, %v4000_v11 }
   0x7   :  { %v4129_v17 = vor.u32 %v5590_v15, %v4128_v14  ;;  %v4256_v18 = vld [vmem:[%s8773_s2 + $0x2c0] sm:$0xf]  ;;  %v5622_v19 = vld [vmem:[%s8773_s2 + $0x2cc] sm:$0xf0]  ;;  %1293 = vmatpush.bf16.msra.mxu3 %v4401_v12 }
   0x8   :  { %v4384_v20 = vld [vmem:[%s8773_s2 + $0x3c0] sm:$0xf]  ;;  %v4257_v21 = vor.u32 %v5622_v19, %v4256_v18  ;;  %v5654_v22 = vld [vmem:[%s8773_s2 + $0x3cc] sm:$0xf0]  ;;  %1252 = vmatpush.bf16.msra.mxu0 %v4001_v16 }
   0x9   :  { %v3984_v23 = vld [vmem:[%s8773_s2 + $0xa0] sm:$0xf]  ;;  %v5554_v24 = vld [vmem:[%s8773_s2 + $0xac] sm:$0xf0]  ;;  %v4385_v25 = vor.u32 %v5654_v22, %v4384_v20  ;;  %1266 = vmatpush.bf16.msra.mxu1 %v4129_v17 }
   0xa   :  { %v4112_v26 = vld [vmem:[%s8773_s2 + $0x1a0] sm:$0xf]  ;;  %v5586_v27 = vld [vmem:[%s8773_s2 + $0x1ac] sm:$0xf0]  ;;  %v3985_v29 = vor.u32 %v5554_v24, %v3984_v23  ;;  %1280 = vmatpush.bf16.msra.mxu2 %v4257_v21 }
   0xb   :  { %v4240_v28 = vld [vmem:[%s8773_s2 + $0x2a0] sm:$0xf]  ;;  %v5618_v30 = vld [vmem:[%s8773_s2 + $0x2ac] sm:$0xf0]  ;;  %v4113_v33 = vor.u32 %v5586_v27, %v4112_v26  ;;  %1294 = vmatpush.bf16.msra.mxu3 %v4385_v25 }
   0xc   :  { %v4368_v31 = vld [vmem:[%s8773_s2 + $0x3a0] sm:$0xf]  ;;  %v5650_v32 = vld [vmem:[%s8773_s2 + $0x3ac] sm:$0xf0]  ;;  %v4241_v34 = vor.u32 %v5618_v30, %v4240_v28  ;;  %1253 = vmatpush.bf16.msra.mxu0 %v3985_v29 }
   0xd   :  { %v3968_v35 = vld [vmem:[%s8773_s2 + $0x80] sm:$0xf]  ;;  %v5550_v36 = vld [vmem:[%s8773_s2 + $0x8c] sm:$0xf0]  ;;  %v4369_v38 = vor.u32 %v5650_v32, %v4368_v31  ;;  %1267 = vmatpush.bf16.msra.mxu1 %v4113_v33  ;;  %v5560_v32 = vld [vmem:[%s8773_s2 + $0xe4] sm:$0xf] }
   0xe   :  { %v4096_v37 = vld [vmem:[%s8773_s2 + $0x180] sm:$0xf]  ;;  %v5582_v39 = vld [vmem:[%s8773_s2 + $0x18c] sm:$0xf0]  ;;  %v3969_v44 = vor.u32 %v5550_v36, %v3968_v35  ;;  %1281 = vmatpush.bf16.msra.mxu2 %v4241_v34  ;;  %v4018_v33 = vld [vmem:[%s8773_s2 + $0xf0] sm:$0xf0] }
   0xf   :  { %v4224_v40 = vld [vmem:[%s8773_s2 + $0x280] sm:$0xf]  ;;  %v5614_v41 = vld [vmem:[%s8773_s2 + $0x28c] sm:$0xf0]  ;;  %v4097_v45 = vor.u32 %v5582_v39, %v4096_v37  ;;  %1295 = vmatpush.bf16.msra.mxu3 %v4369_v38  ;;  %v49_v36 = vld [vmem:[%s8771_s0 + $0x48] sm:$0xff] }
  0x10   :  { %v4352_v42 = vld [vmem:[%s8773_s2 + $0x380] sm:$0xf]  ;;  %v5646_v43 = vld [vmem:[%s8773_s2 + $0x38c] sm:$0xf0]  ;;  %v4225_v46 = vor.u32 %v5614_v41, %v4224_v40  ;;  %1254 = vmatpush.bf16.msra.mxu0 %v3969_v44  ;;  %v5592_v41 = vld [vmem:[%s8773_s2 + $0x1e4] sm:$0xf] }
  0x11   :  { %v3952_v47 = vld [vmem:[%s8773_s2 + $0x60] sm:$0xf]  ;;  %v5546_v48 = vld [vmem:[%s8773_s2 + $0x6c] sm:$0xf0]  ;;  %v4353_v50 = vor.u32 %v5646_v43, %v4352_v42  ;;  %1268 = vmatpush.bf16.msra.mxu1 %v4097_v45  ;;  %v47_v43 = vld [vmem:[%s8771_s0 + $0x38] sm:$0xff] }
  0x12   :  { %v4080_v49 = vld [vmem:[%s8773_s2 + $0x160] sm:$0xf]  ;;  %v5578_v51 = vld [vmem:[%s8773_s2 + $0x16c] sm:$0xf0]  ;;  %v3953_v56 = vor.u32 %v5546_v48, %v3952_v47  ;;  %1282 = vmatpush.bf16.msra.mxu2 %v4225_v46  ;;  %v4146_v46 = vld [vmem:[%s8773_s2 + $0x1f0] sm:$0xf0] }
  0x13   :  { %v4208_v52 = vld [vmem:[%s8773_s2 + $0x260] sm:$0xf]  ;;  %v5610_v53 = vld [vmem:[%s8773_s2 + $0x26c] sm:$0xf0]  ;;  %v4081_v57 = vor.u32 %v5578_v51, %v4080_v49  ;;  %1296 = vmatpush.bf16.msra.mxu3 %v4353_v50  ;;  %v43_v47 = vld [vmem:[%s8771_s0 + $0x18] sm:$0xff]  ;;  %v4021_v50 = vor.u32 %v5560_v32, %v4018_v33 }
  0x14   :  { %v4336_v54 = vld [vmem:[%s8773_s2 + $0x360] sm:$0xf]  ;;  %v5642_v55 = vld [vmem:[%s8773_s2 + $0x36c] sm:$0xf0]  ;;  %v4209_v58 = vor.u32 %v5610_v53, %v4208_v52  ;;  %1255 = vmatpush.bf16.msra.mxu0 %v3953_v56 }
  0x15   :  { %v3936_v59 = vld [vmem:[%s8773_s2 + $0x40] sm:$0xf]  ;;  %v5542_v60 = vld [vmem:[%s8773_s2 + $0x4c] sm:$0xf0]  ;;  %v4337_v62 = vor.u32 %v5642_v55, %v4336_v54  ;;  %1269 = vmatpush.bf16.msra.mxu1 %v4081_v57  ;;  %v5556_v57 = vld [vmem:[%s8773_s2 + $0xc4] sm:$0xf] }
  0x16   :  { %v4064_v61 = vld [vmem:[%s8773_s2 + $0x140] sm:$0xf]  ;;  %v5574_v63 = vld [vmem:[%s8773_s2 + $0x14c] sm:$0xf0]  ;;  %v3937_v4 = vor.u32 %v5542_v60, %v3936_v59  ;;  %1283 = vmatpush.bf16.msra.mxu2 %v4209_v58  ;;  %v4002_v58 = vld [vmem:[%s8773_s2 + $0xd0] sm:$0xf0] }
  0x17   :  { %v4192_v0 = vld [vmem:[%s8773_s2 + $0x240] sm:$0xf]  ;;  %v5606_v1 = vld [vmem:[%s8773_s2 + $0x24c] sm:$0xf0]  ;;  %v4065_v6 = vor.u32 %v5574_v63, %v4064_v61  ;;  %1297 = vmatpush.bf16.msra.mxu3 %v4337_v62  ;;  %v41_v61 = vld [vmem:[%s8771_s0 + $0x8] sm:$0xff]  ;;  %v4149_v63 = vor.u32 %v5592_v41, %v4146_v46 }
  0x18   :  { %v4320_v2 = vld [vmem:[%s8773_s2 + $0x340] sm:$0xf]  ;;  %v5638_v3 = vld [vmem:[%s8773_s2 + $0x34c] sm:$0xf0]  ;;  %v4193_v7 = vor.u32 %v5606_v1, %v4192_v0  ;;  %1256 = vmatpush.bf16.msra.mxu0 %v3937_v4  ;;  %v5588_v1 = vld [vmem:[%s8773_s2 + $0x1c4] sm:$0xf]  ;;  %v4005_v4 = vor.u32 %v5556_v57, %v4002_v58 }
  0x19   :  { %v3920_v5 = vld [vmem:[%s8773_s2 + $0x20] sm:$0xf]  ;;  %v5538_v8 = vld [vmem:[%s8773_s2 + $0x2c] sm:$0xf0]  ;;  %v4321_v11 = vor.u32 %v5638_v3, %v4320_v2  ;;  %1270 = vmatpush.bf16.msra.mxu1 %v4065_v6  ;;  %v4130_v2 = vld [vmem:[%s8773_s2 + $0x1d0] sm:$0xf0] }
  0x1a   :  { %v4048_v9 = vld [vmem:[%s8773_s2 + $0x120] sm:$0xf]  ;;  %v5570_v10 = vld [vmem:[%s8773_s2 + $0x12c] sm:$0xf0]  ;;  %v3921_v18 = vor.u32 %v5538_v8, %v3920_v5  ;;  %1284 = vmatpush.bf16.msra.mxu2 %v4193_v7  ;;  %v4082_v41 = vld [vmem:[%s8773_s2 + $0x170] sm:$0xf0] }
  0x1b   :  { %v4176_v12 = vld [vmem:[%s8773_s2 + $0x220] sm:$0xf]  ;;  %v5602_v13 = vld [vmem:[%s8773_s2 + $0x22c] sm:$0xf0]  ;;  %v4049_v23 = vor.u32 %v5570_v10, %v4048_v9  ;;  %1298 = vmatpush.bf16.msra.mxu3 %v4321_v11  ;;  %v5552_v10 = vld [vmem:[%s8773_s2 + $0xa4] sm:$0xf] }
  0x1c   :  { %v4304_v14 = vld [vmem:[%s8773_s2 + $0x320] sm:$0xf]  ;;  %v5634_v15 = vld [vmem:[%s8773_s2 + $0x32c] sm:$0xf0]  ;;  %v4177_v24 = vor.u32 %v5602_v13, %v4176_v12  ;;  %1257 = vmatpush.bf16.msra.mxu0 %v3921_v18  ;;  %v3986_v11 = vld [vmem:[%s8773_s2 + $0xb0] sm:$0xf0]  ;;  %v4133_v12 = vor.u32 %v5588_v1, %v4130_v2 }
  0x1d   :  { %v3904_v16 = vld [vmem:[%s8773_s2] sm:$0xf]  ;;  %v5534_v17 = vld [vmem:[%s8773_s2 + $0xc] sm:$0xf0]  ;;  %v4305_v28 = vor.u32 %v5634_v15, %v4304_v14  ;;  %1271 = vmatpush.bf16.msra.mxu1 %v4049_v23  ;;  %v5584_v14 = vld [vmem:[%s8773_s2 + $0x1a4] sm:$0xf] }
  0x1e   :  { %v4032_v19 = vld [vmem:[%s8773_s2 + $0x100] sm:$0xf]  ;;  %v5566_v20 = vld [vmem:[%s8773_s2 + $0x10c] sm:$0xf0]  ;;  %v3905_v35 = vor.u32 %v5534_v17, %v3904_v16  ;;  %1285 = vmatpush.bf16.msra.mxu2 %v4177_v24  ;;  %v4114_v15 = vld [vmem:[%s8773_s2 + $0x1b0] sm:$0xf0]  ;;  %v3989_v17 = vor.u32 %v5552_v10, %v3986_v11 }
  0x1f   :  { %v4160_v21 = vld [vmem:[%s8773_s2 + $0x200] sm:$0xf]  ;;  %v5598_v22 = vld [vmem:[%s8773_s2 + $0x20c] sm:$0xf0]  ;;  %v4033_v39 = vor.u32 %v5566_v20, %v4032_v19  ;;  %1299 = vmatpush.bf16.msra.mxu3 %v4305_v28  ;;  %v3970_v23 = vld [vmem:[%s8773_s2 + $0x90] sm:$0xf0]  ;;  %v4117_v24 = vor.u32 %v5584_v14, %v4114_v15 }
  0x20   :  { %v4288_v25 = vld [vmem:[%s8773_s2 + $0x300] sm:$0xf]  ;;  %v5630_v26 = vld [vmem:[%s8773_s2 + $0x30c] sm:$0xf0]  ;;  %v4161_v40 = vor.u32 %v5598_v22, %v4160_v21  ;;  %1258 = vmatpush.bf16.msra.mxu0 %v3905_v35  ;;  %v5548_v22 = vld [vmem:[%s8773_s2 + $0x84] sm:$0xf] }
  0x21   :  { %v4528_v27 = vld [vmem:[%s8773_s2 + $0x4e0] sm:$0xf]  ;;  %v5690_v29 = vld [vmem:[%s8773_s2 + $0x4ec] sm:$0xf0]  ;;  %v4289_v44 = vor.u32 %v5630_v26, %v4288_v25  ;;  %1272 = vmatpush.bf16.msra.mxu1 %v4033_v39  ;;  %v5580_v26 = vld [vmem:[%s8773_s2 + $0x184] sm:$0xf] }
  0x22   :  { %v4656_v30 = vld [vmem:[%s8773_s2 + $0x5e0] sm:$0xf]  ;;  %v5722_v31 = vld [vmem:[%s8773_s2 + $0x5ec] sm:$0xf0]  ;;  %v4529_v45 = vor.u32 %v5690_v29, %v4528_v27  ;;  %1286 = vmatpush.bf16.msra.mxu2 %v4161_v40  ;;  %v4098_v27 = vld [vmem:[%s8773_s2 + $0x190] sm:$0xf0]  ;;  %v3973_v29 = vor.u32 %v5548_v22, %v3970_v23 }
  0x23   :  { %v42_v34 = vld [vmem:[%s8771_s0 + $0x10] sm:$0xff]  ;;  %v4672_v37 = vld [vmem:[%s8773_s2 + $0x600] sm:$0xf]  ;;  %v4657_v49 = vor.u32 %v5722_v31, %v4656_v30  ;;  %1300 = vmatpush.bf16.msra.mxu3 %v4289_v44  ;;  %v5576_v40 = vld [vmem:[%s8773_s2 + $0x164] sm:$0xf] }
  0x24   :  { %v5726_v38 = vld [vmem:[%s8773_s2 + $0x60c] sm:$0xf0]  ;;  %v40_v42 = vld [vmem:[%s8771_s0] sm:$0xff]  ;;  %v6368_v54 = vpack.c.bf16 %v49_v36, %v42_v34  ;;  %1307 = vmatpush.bf16.msrb.mxu0 %v4529_v45  ;;  %v3954_v35 = vld [vmem:[%s8773_s2 + $0x70] sm:$0xf0] }
  0x25   :  { %v50_v48 = vld [vmem:[%s8771_s0 + $0x50] sm:$0xff]  ;;  %v4512_v51 = vld [vmem:[%s8773_s2 + $0x4c0] sm:$0xf]  ;;  %v6370_v55 = vpack.c.bf16 %v47_v43, %v40_v42  ;;  %v4673_v59 = vor.u32 %v5726_v38, %v4672_v37  ;;  %1321 = vmatpush.bf16.msrb.mxu1 %v4657_v49  ;;  %v5544_v34 = vld [vmem:[%s8773_s2 + $0x64] sm:$0xf]  ;;  %v4101_v38 = vor.u32 %v5580_v26, %v4098_v27 }
  0x26   :  { %v5686_v52 = vld [vmem:[%s8773_s2 + $0x4cc] sm:$0xf0]  ;;  %v4640_v53 = vld [vmem:[%s8773_s2 + $0x5c0] sm:$0xf]  ;;  %v6381_v60 = vpack.c.bf16 %v50_v48, %v43_v47  ;;  %1287 = vmatmul.bf16.vlgmr.msra.gmra.mxu2 %v6368_v54  ;;  %v53_v37 = vld [vmem:[%s8771_s0 + $0x68] sm:$0xff]  ;;  %v3957_v43 = vor.u32 %v5544_v34, %v3954_v35 }
  0x27   :  { %v5718_v56 = vld [vmem:[%s8773_s2 + $0x5cc] sm:$0xf0]  ;;  %v48_v62 = vld [vmem:[%s8771_s0 + $0x40] sm:$0xff]  ;;  %v4513_v0 = vor.u32 %v5686_v52, %v4512_v51  ;;  %1349 = vmatpush.bf16.msrb.mxu3 %v4021_v50  ;;  %1259 = vmatmul.bf16.vlgmr.msra.gmra.mxu0 %v6370_v55  ;;  %v3938_v49 = vld [vmem:[%s8773_s2 + $0x50] sm:$0xf0]  ;;  %v4085_v51 = vor.u32 %v5576_v40, %v4082_v41 }
  0x28   :  { %v4641_v3 = vor.u32 %v5718_v56, %v4640_v53  ;;  %v4496_v5 = vld [vmem:[%s8773_s2 + $0x4a0] sm:$0xf]  ;;  %v5682_v6 = vld [vmem:[%s8773_s2 + $0x4ac] sm:$0xf0]  ;;  %v6406_v8 = vpack.c.bf16 %v48_v62, %v41_v61  ;;  %1342 = vmatpush.bf16.msrb.mxu2 %v4673_v59  ;;  %1301 = vmatmul.bf16.vlgmr.msra.gmra.mxu3 %v6381_v60  ;;  %v5540_v48 = vld [vmem:[%s8773_s2 + $0x44] sm:$0xf] }
  0x29   :  { %v4624_v7 = vld [vmem:[%s8773_s2 + $0x5a0] sm:$0xf]  ;;  %v5714_v9 = vld [vmem:[%s8773_s2 + $0x5ac] sm:$0xf0]  ;;  %1308 = vmatpush.bf16.msrb.mxu0 %v4513_v0  ;;  %v4497_v13 = vor.u32 %v5682_v6, %v4496_v5  ;;  %v5572_v53 = vld [vmem:[%s8773_s2 + $0x144] sm:$0xf]  ;;  %v3941_v58 = vor.u32 %v5540_v48, %v3938_v49 }
  0x2a   :  { %1322 = vmatpush.bf16.msrb.mxu1 %v4641_v3  ;;  %v4625_v16 = vor.u32 %v5714_v9, %v4624_v7  ;;  %v4480_v18 = vld [vmem:[%s8773_s2 + $0x480] sm:$0xf]  ;;  %v5678_v19 = vld [vmem:[%s8773_s2 + $0x48c] sm:$0xf0]  ;;  %v4066_v56 = vld [vmem:[%s8773_s2 + $0x150] sm:$0xf0] }
  0x2b   :  { %1350 = vmatpush.bf16.msrb.mxu3 %v4005_v4  ;;  %v4608_v20 = vld [vmem:[%s8773_s2 + $0x580] sm:$0xf]  ;;  %1273 = vmatmul.bf16.vlgmr.msra.gmra.mxu1 %v6406_v8  ;;  %v5710_v21 = vld [vmem:[%s8773_s2 + $0x58c] sm:$0xf0]  ;;  %v4481_v25 = vor.u32 %v5678_v19, %v4480_v18  ;;  %v5536_v0 = vld [vmem:[%s8773_s2 + $0x24] sm:$0xf]  ;;  %v4069_v4 = vor.u32 %v5572_v53, %v4066_v56 }
  0x2c   :  { %1363 = vmatpush.bf16.msra.mxu2 %v4149_v63  ;;  %v4609_v28 = vor.u32 %v5710_v21, %v4608_v20  ;;  %v4464_v30 = vld [vmem:[%s8773_s2 + $0x460] sm:$0xf]  ;;  %v5674_v31 = vld [vmem:[%s8773_s2 + $0x46c] sm:$0xf0]  ;;  %v3922_v1 = vld [vmem:[%s8773_s2 + $0x30] sm:$0xf0] }
  0x2d   :  { %1309 = vmatpush.bf16.msrb.mxu0 %v4497_v13  ;;  %v4592_v32 = vld [vmem:[%s8773_s2 + $0x560] sm:$0xf]  ;;  %v5706_v33 = vld [vmem:[%s8773_s2 + $0x56c] sm:$0xf0]  ;;  %v4465_v39 = vor.u32 %v5674_v31, %v4464_v30  ;;  %v5568_v2 = vld [vmem:[%s8773_s2 + $0x124] sm:$0xf]  ;;  %v3925_v11 = vor.u32 %v5536_v0, %v3922_v1 }
  0x2e   :  { %1323 = vmatpush.bf16.msrb.mxu1 %v4625_v16  ;;  %v46_v36 = vld [vmem:[%s8771_s0 + $0x30] sm:$0xff]  ;;  %v4593_v42 = vor.u32 %v5706_v33, %v4592_v32  ;;  %v4448_v44 = vld [vmem:[%s8773_s2 + $0x440] sm:$0xf]  ;;  %v5532_v13 = vld [vmem:[%s8773_s2 + $0x4] sm:$0xf] }
  0x2f   :  { %1351 = vmatpush.bf16.msrb.mxu3 %v3989_v17  ;;  %v5670_v45 = vld [vmem:[%s8773_s2 + $0x44c] sm:$0xf0]  ;;  %v4576_v46 = vld [vmem:[%s8773_s2 + $0x540] sm:$0xf]  ;;  %v6497_v50 = vpack.c.bf16 %v53_v37, %v46_v36  ;;  %v4050_v3 = vld [vmem:[%s8773_s2 + $0x130] sm:$0xf0] }
  0x30   :  { %1364 = vmatpush.bf16.msra.mxu2 %v4133_v12  ;;  %v5702_v47 = vld [vmem:[%s8773_s2 + $0x54c] sm:$0xf0]  ;;  %v4449_v52 = vor.u32 %v5670_v45, %v4448_v44  ;;  %v4432_v59 = vld [vmem:[%s8773_s2 + $0x420] sm:$0xf]  ;;  %v3906_v14 = vld [vmem:[%s8773_s2 + $0x10] sm:$0xf0]  ;;  %v4053_v21 = vor.u32 %v5568_v2, %v4050_v3 }
  0x31   :  { %1310 = vmatpush.bf16.msrb.mxu0 %v4481_v25  ;;  %v4577_v57 = vor.u32 %v5702_v47, %v4576_v46  ;;  %v5666_v61 = vld [vmem:[%s8773_s2 + $0x42c] sm:$0xf0]  ;;  %v4560_v62 = vld [vmem:[%s8773_s2 + $0x520] sm:$0xf]  ;;  %v5624_v15 = vld [vmem:[%s8773_s2 + $0x2e4] sm:$0xf]  ;;  %v3909_v27 = vor.u32 %v5532_v13, %v3906_v14 }
  0x32   :  { %1324 = vmatpush.bf16.msrb.mxu1 %v4609_v28  ;;  %v5698_v63 = vld [vmem:[%s8773_s2 + $0x52c] sm:$0xf0]  ;;  %v4433_v5 = vor.u32 %v5666_v61, %v4432_v59  ;;  %v4416_v6 = vld [vmem:[%s8773_s2 + $0x400] sm:$0xf]  ;;  %v4274_v16 = vld [vmem:[%s8773_s2 + $0x2f0] sm:$0xf0] }
  0x33   :  { %1352 = vmatpush.bf16.msrb.mxu3 %v3973_v29  ;;  %v5662_v7 = vld [vmem:[%s8773_s2 + $0x40c] sm:$0xf0]  ;;  %v4544_v9 = vld [vmem:[%s8773_s2 + $0x500] sm:$0xf]  ;;  %v4561_v10 = vor.u32 %v5698_v63, %v4560_v62  ;;  %v5656_v17 = vld [vmem:[%s8773_s2 + $0x3e4] sm:$0xf]  ;;  %v4277_v31 = vor.u32 %v5624_v15, %v4274_v16 }
  0x34   :  { %1365 = vmatpush.bf16.msra.mxu2 %v4117_v24  ;;  %v5694_v12 = vld [vmem:[%s8773_s2 + $0x50c] sm:$0xf0]  ;;  %v4402_v18 = vld [vmem:[%s8773_s2 + $0x3f0] sm:$0xf0]  ;;  %v5688_v19 = vld [vmem:[%s8773_s2 + $0x4e4] sm:$0xf]  ;;  %v4417_v22 = vor.u32 %v5662_v7, %v4416_v6 }
  0x35   :  { %1311 = vmatpush.bf16.msrb.mxu0 %v4465_v39  ;;  %v4530_v20 = vld [vmem:[%s8773_s2 + $0x4f0] sm:$0xf0]  ;;  %v44_v23 = vld [vmem:[%s8771_s0 + $0x20] sm:$0xff]  ;;  %v51_v24 = vld [vmem:[%s8771_s0 + $0x58] sm:$0xff]  ;;  %v4545_v26 = vor.u32 %v5694_v12, %v4544_v9  ;;  %v4405_v32 = vor.u32 %v5656_v17, %v4402_v18 }
  0x36   :  { %1325 = vmatpush.bf16.msrb.mxu1 %v4593_v42  ;;  %4686 = vmatmul.msk.bf16.vlgmr.msrb.gmra.mxu2 %vm1247_vm0, %v6497_v50  ;;  %v5564_v25 = vld [vmem:[%s8773_s2 + $0x104] sm:$0xf]  ;;  %v4034_v28 = vld [vmem:[%s8773_s2 + $0x110] sm:$0xf0]  ;;  %v45_v29 = vld [vmem:[%s8771_s0 + $0x28] sm:$0xff]  ;;  %v4533_v36 = vor.u32 %v5688_v19, %v4530_v20  ;;  %v6594_v37 = vpack.c.bf16 %v51_v24, %v44_v23 }
  0x37   :  { %1353 = vmatpush.bf16.msrb.mxu3 %v3957_v43  ;;  %v52_v30 = vld [vmem:[%s8771_s0 + $0x60] sm:$0xff]  ;;  %v4658_v34 = vld [vmem:[%s8773_s2 + $0x5f0] sm:$0xf0]  ;;  %v4037_v41 = vor.u32 %v5564_v25, %v4034_v28 }
  0x38   :  { %1366 = vmatpush.bf16.msra.mxu2 %v4101_v38  ;;  %v5720_v33 = vld [vmem:[%s8773_s2 + $0x5e4] sm:$0xf]  ;;  %v4258_v38 = vld [vmem:[%s8773_s2 + $0x2d0] sm:$0xf0]  ;;  %v6605_v42 = vpack.c.bf16 %v52_v30, %v45_v29 }
  0x39   :  { %1312 = vmatpush.bf16.msrb.mxu0 %v4449_v52  ;;  %v5620_v35 = vld [vmem:[%s8773_s2 + $0x2c4] sm:$0xf]  ;;  %v4386_v40 = vld [vmem:[%s8773_s2 + $0x3d0] sm:$0xf0]  ;;  %v4661_v45 = vor.u32 %v5720_v33, %v4658_v34 }
  0x3a   :  { %1326 = vmatpush.bf16.msrb.mxu1 %v4577_v57  ;;  %v5652_v39 = vld [vmem:[%s8773_s2 + $0x3c4] sm:$0xf]  ;;  %v4514_v44 = vld [vmem:[%s8773_s2 + $0x4d0] sm:$0xf0]  ;;  %v4261_v46 = vor.u32 %v5620_v35, %v4258_v38 }
  0x3b   :  { %1354 = vmatpush.bf16.msrb.mxu3 %v3941_v58  ;;  %v5684_v43 = vld [vmem:[%s8773_s2 + $0x4c4] sm:$0xf]  ;;  %v4389_v47 = vor.u32 %v5652_v39, %v4386_v40  ;;  %v4642_v49 = vld [vmem:[%s8773_s2 + $0x5d0] sm:$0xf0] }
  0x3c   :  { %1367 = vmatpush.bf16.msra.mxu2 %v4085_v51  ;;  %v5716_v48 = vld [vmem:[%s8773_s2 + $0x5c4] sm:$0xf]  ;;  %v4517_v52 = vor.u32 %v5684_v43, %v4514_v44  ;;  %v4242_v53 = vld [vmem:[%s8773_s2 + $0x2b0] sm:$0xf0] }
  0x3d   :  { %1313 = vmatpush.bf16.msrb.mxu0 %v4433_v5  ;;  %v5616_v51 = vld [vmem:[%s8773_s2 + $0x2a4] sm:$0xf]  ;;  %v4370_v57 = vld [vmem:[%s8773_s2 + $0x3b0] sm:$0xf0]  ;;  %v4645_v61 = vor.u32 %v5716_v48, %v4642_v49 }
  0x3e   :  { %1327 = vmatpush.bf16.msrb.mxu1 %v4561_v10  ;;  %v5648_v56 = vld [vmem:[%s8773_s2 + $0x3a4] sm:$0xf]  ;;  %v4498_v59 = vld [vmem:[%s8773_s2 + $0x4b0] sm:$0xf0]  ;;  %v4245_v62 = vor.u32 %v5616_v51, %v4242_v53 }
  0x3f   :  { %1355 = vmatpush.bf16.msrb.mxu3 %v3925_v11  ;;  %v5680_v58 = vld [vmem:[%s8773_s2 + $0x4a4] sm:$0xf]  ;;  %v4373_v63 = vor.u32 %v5648_v56, %v4370_v57  ;;  %v4626_v1 = vld [vmem:[%s8773_s2 + $0x5b0] sm:$0xf0] }
  0x40   :  { %1368 = vmatpush.bf16.msra.mxu2 %v4069_v4  ;;  %v5712_v0 = vld [vmem:[%s8773_s2 + $0x5a4] sm:$0xf]  ;;  %v4501_v3 = vor.u32 %v5680_v58, %v4498_v59  ;;  %v4226_v4 = vld [vmem:[%s8773_s2 + $0x290] sm:$0xf0] }
  0x41   :  { %1314 = vmatpush.bf16.msrb.mxu0 %v4417_v22  ;;  %v5612_v2 = vld [vmem:[%s8773_s2 + $0x284] sm:$0xf]  ;;  %v4354_v6 = vld [vmem:[%s8773_s2 + $0x390] sm:$0xf0]  ;;  %v4629_v10 = vor.u32 %v5712_v0, %v4626_v1  ;;  %v4024_v0 = vld [vmem:[%s8773_s2 + $0xe8] sm:$0xf] }
  0x42   :  { %1328 = vmatpush.bf16.msrb.mxu1 %v4545_v26  ;;  %v5644_v5 = vld [vmem:[%s8773_s2 + $0x384] sm:$0xf]  ;;  %v4482_v9 = vld [vmem:[%s8773_s2 + $0x490] sm:$0xf0]  ;;  %v4229_v11 = vor.u32 %v5612_v2, %v4226_v4  ;;  %v5563_v1 = vld [vmem:[%s8773_s2 + $0xf4] sm:$0xf0] }
  0x43   :  { %1356 = vmatpush.bf16.msrb.mxu3 %v3909_v27  ;;  %v5676_v7 = vld [vmem:[%s8773_s2 + $0x484] sm:$0xf]  ;;  %v4357_v12 = vor.u32 %v5644_v5, %v4354_v6  ;;  %v4610_v14 = vld [vmem:[%s8773_s2 + $0x590] sm:$0xf0]  ;;  %v4152_v2 = vld [vmem:[%s8773_s2 + $0x1e8] sm:$0xf] }
  0x44   :  { %1369 = vmatpush.bf16.msra.mxu2 %v4053_v21  ;;  %1315 = vmatmul.bf16.vlgmr.msrb.gmra.mxu0 %v6594_v37  ;;  %v5708_v13 = vld [vmem:[%s8773_s2 + $0x584] sm:$0xf]  ;;  %v4485_v16 = vor.u32 %v5676_v7, %v4482_v9  ;;  %v4210_v17 = vld [vmem:[%s8773_s2 + $0x270] sm:$0xf0]  ;;  %v5595_v4 = vld [vmem:[%s8773_s2 + $0x1f4] sm:$0xf0] }
  0x45   :  { %1377 = vmatpush.bf16.msra.mxu0 %v4277_v31  ;;  %1329 = vmatmul.bf16.vlgmr.msrb.gmra.mxu1 %v6605_v42  ;;  %v5608_v15 = vld [vmem:[%s8773_s2 + $0x264] sm:$0xf]  ;;  %v4338_v19 = vld [vmem:[%s8773_s2 + $0x370] sm:$0xf0]  ;;  %v4613_v22 = vor.u32 %v5708_v13, %v4610_v14  ;;  %v4025_v13 = vor.u32 %v5563_v1, %v4024_v0  ;;  %v4280_v14 = vld [vmem:[%s8773_s2 + $0x2e8] sm:$0xf] }
  0x46   :  { %1391 = vmatpush.bf16.msra.mxu1 %v4405_v32  ;;  %1357 = vmatmul.bf16.vlgmr.msrb.gmra.mxu3 %v6370_v55  ;;  %v5640_v18 = vld [vmem:[%s8773_s2 + $0x364] sm:$0xf]  ;;  %v4466_v21 = vld [vmem:[%s8773_s2 + $0x470] sm:$0xf0]  ;;  %v4213_v23 = vor.u32 %v5608_v15, %v4210_v17  ;;  %v5627_v15 = vld [vmem:[%s8773_s2 + $0x2f4] sm:$0xf0]  ;;  %v4153_v17 = vor.u32 %v5595_v4, %v4152_v2 }
  0x47   :  { %1405 = vmatpush.bf16.msra.mxu3 %v4533_v36  ;;  %v5672_v20 = vld [vmem:[%s8773_s2 + $0x464] sm:$0xf]  ;;  %v4341_v24 = vor.u32 %v5640_v18, %v4338_v19  ;;  %v4594_v26 = vld [vmem:[%s8773_s2 + $0x570] sm:$0xf0]  ;;  %v5659_v19 = vld [vmem:[%s8773_s2 + $0x3f4] sm:$0xf0] }
  0x48   :  { %1370 = vmatpush.bf16.msra.mxu2 %v4037_v41  ;;  %v5704_v25 = vld [vmem:[%s8773_s2 + $0x564] sm:$0xf]  ;;  %v4469_v28 = vor.u32 %v5672_v20, %v4466_v21  ;;  %v4194_v29 = vld [vmem:[%s8773_s2 + $0x250] sm:$0xf0]  ;;  %v4008_v20 = vld [vmem:[%s8773_s2 + $0xc8] sm:$0xf] }
  0x49   :  { %1378 = vmatpush.bf16.msra.mxu0 %v4261_v46  ;;  %v5604_v27 = vld [vmem:[%s8773_s2 + $0x244] sm:$0xf]  ;;  %v4322_v31 = vld [vmem:[%s8773_s2 + $0x350] sm:$0xf0]  ;;  %v4597_v34 = vor.u32 %v5704_v25, %v4594_v26  ;;  %v5559_v21 = vld [vmem:[%s8773_s2 + $0xd4] sm:$0xf0]  ;;  %v4281_v25 = vor.u32 %v5627_v15, %v4280_v14 }
  0x4a   :  { %1392 = vmatpush.bf16.msra.mxu1 %v4389_v47  ;;  %v5636_v30 = vld [vmem:[%s8773_s2 + $0x344] sm:$0xf]  ;;  %v4450_v33 = vld [vmem:[%s8773_s2 + $0x450] sm:$0xf0]  ;;  %v4197_v35 = vor.u32 %v5604_v27, %v4194_v29  ;;  %v4009_v27 = vor.u32 %v5559_v21, %v4008_v20  ;;  %v5623_v29 = vld [vmem:[%s8773_s2 + $0x2d4] sm:$0xf0] }
  0x4b   :  { %1406 = vmatpush.bf16.msra.mxu3 %v4517_v52  ;;  %1371 = vmatmul.bf16.vlgmr.msra.gmra.mxu2 %v6406_v8  ;;  %v5668_v32 = vld [vmem:[%s8773_s2 + $0x444] sm:$0xf]  ;;  %v4325_v36 = vor.u32 %v5636_v30, %v4322_v31  ;;  %v4578_v39 = vld [vmem:[%s8773_s2 + $0x550] sm:$0xf0]  ;;  %v4392_v30 = vld [vmem:[%s8773_s2 + $0x3c8] sm:$0xf] }
  0x4c   :  { %1419 = vmatpush.bf16.msrb.mxu2 %v4661_v45  ;;  %v5700_v38 = vld [vmem:[%s8773_s2 + $0x544] sm:$0xf]  ;;  %v4453_v41 = vor.u32 %v5668_v32, %v4450_v33  ;;  %v4178_v43 = vld [vmem:[%s8773_s2 + $0x230] sm:$0xf0]  ;;  %v5655_v32 = vld [vmem:[%s8773_s2 + $0x3d4] sm:$0xf0] }
  0x4d   :  { %1379 = vmatpush.bf16.msra.mxu0 %v4245_v62  ;;  %v5600_v40 = vld [vmem:[%s8773_s2 + $0x224] sm:$0xf]  ;;  %v4306_v45 = vld [vmem:[%s8773_s2 + $0x330] sm:$0xf0]  ;;  %v4581_v48 = vor.u32 %v5700_v38, %v4578_v39  ;;  %v3992_v33 = vld [vmem:[%s8773_s2 + $0xa8] sm:$0xf]  ;;  %v4393_v39 = vor.u32 %v5655_v32, %v4392_v30 }
  0x4e   :  { %1393 = vmatpush.bf16.msra.mxu1 %v4373_v63  ;;  %v5632_v44 = vld [vmem:[%s8773_s2 + $0x324] sm:$0xf]  ;;  %v4434_v47 = vld [vmem:[%s8773_s2 + $0x430] sm:$0xf0]  ;;  %v4181_v52 = vor.u32 %v5600_v40, %v4178_v43  ;;  %v5619_v43 = vld [vmem:[%s8773_s2 + $0x2b4] sm:$0xf0] }
  0x4f   :  { %1407 = vmatpush.bf16.msra.mxu3 %v4501_v3  ;;  %v5664_v46 = vld [vmem:[%s8773_s2 + $0x424] sm:$0xf]  ;;  %v4562_v51 = vld [vmem:[%s8773_s2 + $0x530] sm:$0xf0]  ;;  %v4309_v53 = vor.u32 %v5632_v44, %v4306_v45  ;;  %v4376_v44 = vld [vmem:[%s8773_s2 + $0x3a8] sm:$0xf] }
  0x50   :  { %1420 = vmatpush.bf16.msrb.mxu2 %v4645_v61  ;;  %v5696_v49 = vld [vmem:[%s8773_s2 + $0x524] sm:$0xf]  ;;  %v4162_v57 = vld [vmem:[%s8773_s2 + $0x210] sm:$0xf0]  ;;  %v4437_v59 = vor.u32 %v5664_v46, %v4434_v47  ;;  %v5651_v46 = vld [vmem:[%s8773_s2 + $0x3b4] sm:$0xf0] }
  0x51   :  { %1380 = vmatpush.bf16.msra.mxu0 %v4229_v11  ;;  %v5596_v56 = vld [vmem:[%s8773_s2 + $0x204] sm:$0xf]  ;;  %v4290_v61 = vld [vmem:[%s8773_s2 + $0x310] sm:$0xf0]  ;;  %v4565_v3 = vor.u32 %v5696_v49, %v4562_v51  ;;  %v3976_v47 = vld [vmem:[%s8773_s2 + $0x88] sm:$0xf] }
  0x52   :  { %1394 = vmatpush.bf16.msra.mxu1 %v4357_v12  ;;  %v5628_v58 = vld [vmem:[%s8773_s2 + $0x304] sm:$0xf]  ;;  %v4418_v63 = vld [vmem:[%s8773_s2 + $0x410] sm:$0xf0]  ;;  %v4165_v7 = vor.u32 %v5596_v56, %v4162_v57  ;;  %v4104_v49 = vld [vmem:[%s8773_s2 + $0x188] sm:$0xf]  ;;  %v4377_v57 = vor.u32 %v5651_v46, %v4376_v44 }
  0x53   :  { %1408 = vmatpush.bf16.msra.mxu3 %v4485_v16  ;;  %v5660_v62 = vld [vmem:[%s8773_s2 + $0x404] sm:$0xf]  ;;  %v4674_v6 = vld [vmem:[%s8773_s2 + $0x610] sm:$0xf0]  ;;  %v4293_v9 = vor.u32 %v5628_v58, %v4290_v61  ;;  %v4408_v16 = vld [vmem:[%s8773_s2 + $0x3e8] sm:$0xf] }
  0x54   :  { %1421 = vmatpush.bf16.msrb.mxu2 %v4629_v10  ;;  %v5724_v5 = vld [vmem:[%s8773_s2 + $0x604] sm:$0xf]  ;;  %v4546_v11 = vld [vmem:[%s8773_s2 + $0x510] sm:$0xf0]  ;;  %v4421_v12 = vor.u32 %v5660_v62, %v4418_v63  ;;  %v4409_v26 = vor.u32 %v5659_v19, %v4408_v16  ;;  %v5583_v51 = vld [vmem:[%s8773_s2 + $0x194] sm:$0xf0] }
  0x55   :  { %1381 = vmatpush.bf16.msra.mxu0 %v4213_v23  ;;  %v5692_v10 = vld [vmem:[%s8773_s2 + $0x504] sm:$0xf]  ;;  %v4677_v18 = vor.u32 %v5724_v5, %v4674_v6  ;;  %v4136_v23 = vld [vmem:[%s8773_s2 + $0x1c8] sm:$0xf]  ;;  %v5615_v56 = vld [vmem:[%s8773_s2 + $0x294] sm:$0xf0]  ;;  %v4105_v62 = vor.u32 %v5583_v51, %v4104_v49 }
  0x56   :  { %1395 = vmatpush.bf16.msra.mxu1 %v4341_v24  ;;  %v5591_v24 = vld [vmem:[%s8773_s2 + $0x1d4] sm:$0xf0]  ;;  %v3960_v63 = vld [vmem:[%s8773_s2 + $0x68] sm:$0xf] }
  0x57   :  { %1409 = vmatpush.bf16.msra.mxu3 %v4469_v28  ;;  %v4264_v28 = vld [vmem:[%s8773_s2 + $0x2c8] sm:$0xf]  ;;  %v4137_v31 = vor.u32 %v5591_v24, %v4136_v23  ;;  %v5647_v61 = vld [vmem:[%s8773_s2 + $0x394] sm:$0xf0] }
  0x58   :  { %1422 = vmatpush.bf16.msrb.mxu2 %v4613_v22  ;;  %v4549_v22 = vor.u32 %v5692_v10, %v4546_v11  ;;  %v4265_v38 = vor.u32 %v5623_v29, %v4264_v28  ;;  %v5547_v0 = vld [vmem:[%s8773_s2 + $0x74] sm:$0xf0] }
  0x59   :  { %1382 = vmatpush.bf16.msra.mxu0 %v4197_v35  ;;  %v4120_v35 = vld [vmem:[%s8773_s2 + $0x1a8] sm:$0xf] }
  0x5a   :  { %1396 = vmatpush.bf16.msra.mxu1 %v4325_v36  ;;  %v5587_v36 = vld [vmem:[%s8773_s2 + $0x1b4] sm:$0xf0] }
  0x5b   :  { %1410 = vmatpush.bf16.msra.mxu3 %v4453_v41  ;;  %v4248_v41 = vld [vmem:[%s8773_s2 + $0x2a8] sm:$0xf]  ;;  %v4121_v45 = vor.u32 %v5587_v36, %v4120_v35 }
  0x5c   :  { %1423 = vmatpush.bf16.msrb.mxu2 %v4597_v34  ;;  %v5555_v34 = vld [vmem:[%s8773_s2 + $0xb4] sm:$0xf0] }
  0x5d   :  { %1383 = vmatpush.bf16.msra.mxu0 %v4181_v52  ;;  %v3993_v40 = vor.u32 %v5555_v34, %v3992_v33  ;;  %v4249_v52 = vor.u32 %v5619_v43, %v4248_v41 }
  0x5e   :  { %1397 = vmatpush.bf16.msra.mxu1 %v4309_v53  ;;  %v4232_v53 = vld [vmem:[%s8773_s2 + $0x288] sm:$0xf] }
  0x5f   :  { %1411 = vmatpush.bf16.msra.mxu3 %v4437_v59  ;;  %v4360_v59 = vld [vmem:[%s8773_s2 + $0x388] sm:$0xf] }
  0x60   :  { %1424 = vmatpush.bf16.msrb.mxu2 %v4581_v48  ;;  %v5551_v48 = vld [vmem:[%s8773_s2 + $0x94] sm:$0xf0] }
  0x61   :  { %1384 = vmatpush.bf16.msra.mxu0 %v4165_v7  ;;  %v3977_v58 = vor.u32 %v5551_v48, %v3976_v47 }
  0x62   :  { %1398 = vmatpush.bf16.msra.mxu1 %v4293_v9 }
  0x63   :  { %1412 = vmatpush.bf16.msra.mxu3 %v4421_v12 }
  0x64   :  { %1425 = vmatpush.bf16.msrb.mxu2 %v4565_v3  ;;  %1385 = vmatmul.bf16.vlgmr.msra.gmra.mxu0 %v6368_v54 }
  0x65   :  { %1440 = vmatpush.bf16.msrb.mxu0 %v4677_v18  ;;  %1399 = vmatmul.bf16.vlgmr.msra.gmra.mxu1 %v6381_v60 }
  0x66   :  { %1447 = vmatpush.bf16.msrb.mxu1 %v4025_v13  ;;  %1413 = vmatmul.bf16.vlgmr.msra.gmra.mxu3 %v6594_v37 }
  0x67   :  { %1461 = vmatpush.bf16.msrb.mxu3 %v4153_v17 }
  0x68   :  { %1426 = vmatpush.bf16.msrb.mxu2 %v4549_v22 }
  0x69   :  { %1475 = vmatpush.bf16.msra.mxu0 %v4281_v25 }
  0x6a   :  { %1448 = vmatpush.bf16.msrb.mxu1 %v4009_v27 }
  0x6b   :  { %1462 = vmatpush.bf16.msrb.mxu3 %v4137_v31  ;;  %1427 = vmatmul.bf16.vlgmr.msrb.gmra.mxu2 %v6605_v42 }
  0x6c   :  { %1489 = vmatpush.bf16.msra.mxu2 %v4409_v26 }
  0x6d   :  { %1476 = vmatpush.bf16.msra.mxu0 %v4265_v38 }
  0x6e   :  { %1449 = vmatpush.bf16.msrb.mxu1 %v3993_v40 }
  0x6f   :  { %1463 = vmatpush.bf16.msrb.mxu3 %v4121_v45 }
  0x70   :  { %1490 = vmatpush.bf16.msra.mxu2 %v4393_v39 }
  0x71   :  { %18 = vsyncpa [#allocation5], 0  ;;  %v4088_v1 = vld [vmem:[%s8773_s2 + $0x168] sm:$0xf]  ;;  %v5579_v2 = vld [vmem:[%s8773_s2 + $0x174] sm:$0xf0]  ;;  %1477 = vmatpush.bf16.msra.mxu0 %v4249_v52  ;;  %v4233_v3 = vor.u32 %v5615_v56, %v4232_v53  ;;  %v4361_v4 = vor.u32 %v5647_v61, %v4360_v59  ;;  %v3961_v5 = vor.u32 %v5547_v0, %v3960_v63 }
  0x72   :  { %1450 = vmatpush.bf16.msrb.mxu1 %v3977_v58  ;;  %v4216_v6 = vld [vmem:[%s8773_s2 + $0x268] sm:$0xf]  ;;  %v5611_v7 = vld [vmem:[%s8773_s2 + $0x274] sm:$0xf0]  ;;  %v4089_v10 = vor.u32 %v5579_v2, %v4088_v1  ;;  %v5561_v58 = vld [vmem:[%s8773_s2 + $0xec] sm:$0xf] }
  0x73   :  { %v4344_v9 = vld [vmem:[%s8773_s2 + $0x368] sm:$0xf]  ;;  %1464 = vmatpush.bf16.msrb.mxu3 %v4105_v62  ;;  %v5643_v11 = vld [vmem:[%s8773_s2 + $0x374] sm:$0xf0]  ;;  %v4217_v16 = vor.u32 %v5611_v7, %v4216_v6  ;;  %v4026_v59 = vld [vmem:[%s8773_s2 + $0xf8] sm:$0xf0] }
  0x74   :  { %1491 = vmatpush.bf16.msra.mxu2 %v4377_v57  ;;  %v3944_v12 = vld [vmem:[%s8773_s2 + $0x48] sm:$0xf]  ;;  %v5543_v13 = vld [vmem:[%s8773_s2 + $0x54] sm:$0xf0]  ;;  %v4345_v17 = vor.u32 %v5643_v11, %v4344_v9  ;;  %4687 = vmatmul.msk.bf16.vlgmr.msrb.gmra.mxu0 %vm1247_vm0, %v6497_v50  ;;  %v4029_v6 = vor.u32 %v5561_v58, %v4026_v59  ;;  %v5593_v9 = vld [vmem:[%s8773_s2 + $0x1ec] sm:$0xf] }
  0x75   :  { %v4072_v14 = vld [vmem:[%s8773_s2 + $0x148] sm:$0xf]  ;;  %v5575_v15 = vld [vmem:[%s8773_s2 + $0x154] sm:$0xf0]  ;;  %1478 = vmatpush.bf16.msra.mxu0 %v4233_v3  ;;  %v3945_v18 = vor.u32 %v5543_v13, %v3944_v12  ;;  %v5557_v11 = vld [vmem:[%s8773_s2 + $0xcc] sm:$0xf] }
  0x76   :  { %1451 = vmatpush.bf16.msrb.mxu1 %v3961_v5  ;;  %v4200_v19 = vld [vmem:[%s8773_s2 + $0x248] sm:$0xf]  ;;  %v5607_v20 = vld [vmem:[%s8773_s2 + $0x254] sm:$0xf0]  ;;  %v4073_v22 = vor.u32 %v5575_v15, %v4072_v14  ;;  %v4010_v14 = vld [vmem:[%s8773_s2 + $0xd8] sm:$0xf0] }
  0x77   :  { %v4328_v21 = vld [vmem:[%s8773_s2 + $0x348] sm:$0xf]  ;;  %1465 = vmatpush.bf16.msrb.mxu3 %v4089_v10  ;;  %v5639_v23 = vld [vmem:[%s8773_s2 + $0x354] sm:$0xf0]  ;;  %v4201_v28 = vor.u32 %v5607_v20, %v4200_v19  ;;  %v4154_v10 = vld [vmem:[%s8773_s2 + $0x1f8] sm:$0xf0]  ;;  %v4013_v20 = vor.u32 %v5557_v11, %v4010_v14 }
  0x78   :  { %1492 = vmatpush.bf16.msra.mxu2 %v4361_v4  ;;  %v3928_v24 = vld [vmem:[%s8773_s2 + $0x28] sm:$0xf]  ;;  %v5539_v25 = vld [vmem:[%s8773_s2 + $0x34] sm:$0xf0]  ;;  %v4329_v30 = vor.u32 %v5639_v23, %v4328_v21  ;;  %v4157_v19 = vor.u32 %v5593_v9, %v4154_v10  ;;  %v4138_v23 = vld [vmem:[%s8773_s2 + $0x1d8] sm:$0xf0] }
  0x79   :  { %v4056_v26 = vld [vmem:[%s8773_s2 + $0x128] sm:$0xf]  ;;  %v5571_v27 = vld [vmem:[%s8773_s2 + $0x134] sm:$0xf0]  ;;  %1479 = vmatpush.bf16.msra.mxu0 %v4217_v16  ;;  %v3929_v31 = vor.u32 %v5539_v25, %v3928_v24  ;;  %v5553_v24 = vld [vmem:[%s8773_s2 + $0xac] sm:$0xf] }
  0x7a   :  { %v4184_v29 = vld [vmem:[%s8773_s2 + $0x228] sm:$0xf]  ;;  %1452 = vmatpush.bf16.msrb.mxu1 %v3945_v18  ;;  %v5603_v32 = vld [vmem:[%s8773_s2 + $0x234] sm:$0xf0]  ;;  %v4057_v35 = vor.u32 %v5571_v27, %v4056_v26  ;;  %v3994_v26 = vld [vmem:[%s8773_s2 + $0xb8] sm:$0xf0] }
  0x7b   :  { %v4312_v33 = vld [vmem:[%s8773_s2 + $0x328] sm:$0xf]  ;;  %v5635_v34 = vld [vmem:[%s8773_s2 + $0x334] sm:$0xf0]  ;;  %1466 = vmatpush.bf16.msrb.mxu3 %v4073_v22  ;;  %v4185_v44 = vor.u32 %v5603_v32, %v4184_v29  ;;  %v5589_v22 = vld [vmem:[%s8773_s2 + $0x1cc] sm:$0xf]  ;;  %v3997_v32 = vor.u32 %v5553_v24, %v3994_v26 }
  0x7c   :  { %1493 = vmatpush.bf16.msra.mxu2 %v4345_v17  ;;  %v3912_v36 = vld [vmem:[%s8773_s2 + $0x8] sm:$0xf]  ;;  %v5535_v38 = vld [vmem:[%s8773_s2 + $0x14] sm:$0xf0]  ;;  %v4313_v47 = vor.u32 %v5635_v34, %v4312_v33  ;;  %v5585_v34 = vld [vmem:[%s8773_s2 + $0x1ac] sm:$0xf] }
  0x7d   :  { %v4040_v39 = vld [vmem:[%s8773_s2 + $0x108] sm:$0xf]  ;;  %v5567_v40 = vld [vmem:[%s8773_s2 + $0x114] sm:$0xf0]  ;;  %1480 = vmatpush.bf16.msra.mxu0 %v4201_v28  ;;  %v3913_v48 = vor.u32 %v5535_v38, %v3912_v36  ;;  %v5549_v36 = vld [vmem:[%s8773_s2 + $0x8c] sm:$0xf] }
  0x7e   :  { %v4536_v41 = vld [vmem:[%s8773_s2 + $0x4e8] sm:$0xf]  ;;  %v5691_v43 = vld [vmem:[%s8773_s2 + $0x4f4] sm:$0xf0]  ;;  %1453 = vmatpush.bf16.msrb.mxu1 %v3929_v31  ;;  %v4041_v53 = vor.u32 %v5567_v40, %v4040_v39  ;;  %v4141_v31 = vor.u32 %v5589_v22, %v4138_v23  ;;  %v3978_v39 = vld [vmem:[%s8773_s2 + $0x98] sm:$0xf0] }
  0x7f   :  { %v4664_v45 = vld [vmem:[%s8773_s2 + $0x5e8] sm:$0xf]  ;;  %v5723_v46 = vld [vmem:[%s8773_s2 + $0x5f4] sm:$0xf0]  ;;  %1467 = vmatpush.bf16.msrb.mxu3 %v4057_v35  ;;  %v4537_v56 = vor.u32 %v5691_v43, %v4536_v41  ;;  %v4122_v35 = vld [vmem:[%s8773_s2 + $0x1b8] sm:$0xf0] }
  0x80   :  { %1494 = vmatpush.bf16.msra.mxu2 %v4329_v30  ;;  %v4168_v49 = vld [vmem:[%s8773_s2 + $0x208] sm:$0xf]  ;;  %v5599_v51 = vld [vmem:[%s8773_s2 + $0x214] sm:$0xf0]  ;;  %v4665_v61 = vor.u32 %v5723_v46, %v4664_v45  ;;  %v4125_v45 = vor.u32 %v5585_v34, %v4122_v35  ;;  %v3981_v46 = vor.u32 %v5549_v36, %v3978_v39  ;;  %v5573_v11 = vld [vmem:[%s8773_s2 + $0x14c] sm:$0xf] }
  0x81   :  { %v4296_v52 = vld [vmem:[%s8773_s2 + $0x308] sm:$0xf]  ;;  %v5631_v57 = vld [vmem:[%s8773_s2 + $0x314] sm:$0xf0]  ;;  %1481 = vmatpush.bf16.msra.mxu0 %v4185_v44  ;;  %v4169_v1 = vor.u32 %v5599_v51, %v4168_v49  ;;  %v4106_v49 = vld [vmem:[%s8773_s2 + $0x198] sm:$0xf0] }
  0x82   :  { %v4520_v62 = vld [vmem:[%s8773_s2 + $0x4c8] sm:$0xf]  ;;  %v5687_v63 = vld [vmem:[%s8773_s2 + $0x4d4] sm:$0xf0]  ;;  %1454 = vmatpush.bf16.msrb.mxu1 %v3913_v48  ;;  %v4297_v5 = vor.u32 %v5631_v57, %v4296_v52  ;;  %v5581_v48 = vld [vmem:[%s8773_s2 + $0x18c] sm:$0xf] }
  0x83   :  { %v4648_v0 = vld [vmem:[%s8773_s2 + $0x5c8] sm:$0xf]  ;;  %v5719_v2 = vld [vmem:[%s8773_s2 + $0x5d4] sm:$0xf0]  ;;  %1468 = vmatpush.bf16.msrb.mxu3 %v4041_v53  ;;  %v4521_v7 = vor.u32 %v5687_v63, %v4520_v62  ;;  %v5545_v51 = vld [vmem:[%s8773_s2 + $0x6c] sm:$0xf] }
  0x84   :  { %v4680_v3 = vld [vmem:[%s8773_s2 + $0x608] sm:$0xf]  ;;  %v5727_v4 = vld [vmem:[%s8773_s2 + $0x614] sm:$0xf0]  ;;  %1495 = vmatpush.bf16.msra.mxu2 %v4313_v47  ;;  %v4649_v12 = vor.u32 %v5719_v2, %v4648_v0  ;;  %v3962_v53 = vld [vmem:[%s8773_s2 + $0x78] sm:$0xf0] }
  0x85   :  { %v4681_v13 = vor.u32 %v5727_v4, %v4680_v3  ;;  %v4504_v15 = vld [vmem:[%s8773_s2 + $0x4a8] sm:$0xf]  ;;  %v5683_v16 = vld [vmem:[%s8773_s2 + $0x4b4] sm:$0xf0]  ;;  %1482 = vmatpush.bf16.msra.mxu0 %v4169_v1  ;;  %1455 = vmatmul.bf16.vlgmr.msrb.gmra.mxu1 %v6370_v55  ;;  %v3965_v62 = vor.u32 %v5545_v51, %v3962_v53  ;;  %v5577_v0 = vld [vmem:[%s8773_s2 + $0x16c] sm:$0xf] }
  0x86   :  { %1503 = vmatpush.bf16.msra.mxu1 %v4537_v56  ;;  %v4632_v17 = vld [vmem:[%s8773_s2 + $0x5a8] sm:$0xf]  ;;  %v5715_v18 = vld [vmem:[%s8773_s2 + $0x5b4] sm:$0xf0]  ;;  %1469 = vmatmul.bf16.vlgmr.msrb.gmra.mxu3 %v6406_v8  ;;  %v4505_v21 = vor.u32 %v5683_v16, %v4504_v15  ;;  %v4090_v1 = vld [vmem:[%s8773_s2 + $0x178] sm:$0xf0] }
  0x87   :  { %1517 = vmatpush.bf16.msra.mxu3 %v4665_v61  ;;  %v4633_v25 = vor.u32 %v5715_v18, %v4632_v17  ;;  %v4488_v27 = vld [vmem:[%s8773_s2 + $0x488] sm:$0xf]  ;;  %v5679_v28 = vld [vmem:[%s8773_s2 + $0x494] sm:$0xf0]  ;;  %v4109_v61 = vor.u32 %v5581_v48, %v4106_v49  ;;  %v5541_v2 = vld [vmem:[%s8773_s2 + $0x4c] sm:$0xf]  ;;  %v4093_v10 = vor.u32 %v5577_v0, %v4090_v1 }
  0x88   :  { %1496 = vmatpush.bf16.msra.mxu2 %v4297_v5  ;;  %1483 = vmatmul.bf16.vlgmr.msra.gmra.mxu0 %v6368_v54  ;;  %v4616_v29 = vld [vmem:[%s8773_s2 + $0x588] sm:$0xf]  ;;  %v5711_v30 = vld [vmem:[%s8773_s2 + $0x594] sm:$0xf0]  ;;  %v4489_v33 = vor.u32 %v5679_v28, %v4488_v27  ;;  %v3946_v4 = vld [vmem:[%s8773_s2 + $0x58] sm:$0xf0] }
  0x89   :  { %1538 = vmatpush.bf16.msrb.mxu0 %v4681_v13  ;;  %v4617_v38 = vor.u32 %v5711_v30, %v4616_v29  ;;  %v4472_v40 = vld [vmem:[%s8773_s2 + $0x468] sm:$0xf]  ;;  %v5675_v41 = vld [vmem:[%s8773_s2 + $0x474] sm:$0xf0]  ;;  %v4074_v14 = vld [vmem:[%s8773_s2 + $0x158] sm:$0xf0] }
  0x8a   :  { %1504 = vmatpush.bf16.msra.mxu1 %v4521_v7  ;;  %v4600_v43 = vld [vmem:[%s8773_s2 + $0x568] sm:$0xf]  ;;  %v5707_v44 = vld [vmem:[%s8773_s2 + $0x574] sm:$0xf0]  ;;  %v4473_v47 = vor.u32 %v5675_v41, %v4472_v40  ;;  %v5537_v15 = vld [vmem:[%s8773_s2 + $0x2c] sm:$0xf]  ;;  %v4077_v24 = vor.u32 %v5573_v11, %v4074_v14 }
  0x8b   :  { %1518 = vmatpush.bf16.msra.mxu3 %v4649_v12  ;;  %1497 = vmatmul.bf16.vlgmr.msra.gmra.mxu2 %v6381_v60  ;;  %v4601_v52 = vor.u32 %v5707_v44, %v4600_v43  ;;  %v4456_v56 = vld [vmem:[%s8773_s2 + $0x448] sm:$0xf]  ;;  %v5671_v57 = vld [vmem:[%s8773_s2 + $0x454] sm:$0xf0]  ;;  %v3949_v12 = vor.u32 %v5541_v2, %v3946_v4  ;;  %v3930_v16 = vld [vmem:[%s8773_s2 + $0x38] sm:$0xf0] }
  0x8c   :  { %1545 = vmatpush.bf16.msrb.mxu2 %v4029_v6  ;;  %v4584_v58 = vld [vmem:[%s8773_s2 + $0x548] sm:$0xf]  ;;  %v5703_v59 = vld [vmem:[%s8773_s2 + $0x554] sm:$0xf0]  ;;  %v4457_v63 = vor.u32 %v5671_v57, %v4456_v56  ;;  %v5625_v22 = vld [vmem:[%s8773_s2 + $0x2ec] sm:$0xf]  ;;  %v3933_v27 = vor.u32 %v5537_v15, %v3930_v16 }
  0x8d   :  { %1559 = vmatpush.bf16.msra.mxu0 %v4157_v19  ;;  %v4585_v3 = vor.u32 %v5703_v59, %v4584_v58  ;;  %v4440_v5 = vld [vmem:[%s8773_s2 + $0x428] sm:$0xf]  ;;  %v5667_v6 = vld [vmem:[%s8773_s2 + $0x434] sm:$0xf0]  ;;  %v4282_v23 = vld [vmem:[%s8773_s2 + $0x2f8] sm:$0xf0] }
  0x8e   :  { %1505 = vmatpush.bf16.msra.mxu1 %v4505_v21  ;;  %v4568_v7 = vld [vmem:[%s8773_s2 + $0x528] sm:$0xf]  ;;  %v5699_v9 = vld [vmem:[%s8773_s2 + $0x534] sm:$0xf0]  ;;  %v4441_v13 = vor.u32 %v5667_v6, %v4440_v5  ;;  %v4410_v26 = vld [vmem:[%s8773_s2 + $0x3f8] sm:$0xf0] }
  0x8f   :  { %1519 = vmatpush.bf16.msra.mxu3 %v4633_v25  ;;  %v4569_v17 = vor.u32 %v5699_v9, %v4568_v7  ;;  %v4424_v18 = vld [vmem:[%s8773_s2 + $0x408] sm:$0xf]  ;;  %v5663_v19 = vld [vmem:[%s8773_s2 + $0x414] sm:$0xf0]  ;;  %v5657_v25 = vld [vmem:[%s8773_s2 + $0x3ec] sm:$0xf] }
  0x90   :  { %1546 = vmatpush.bf16.msrb.mxu2 %v4013_v20  ;;  %v4552_v20 = vld [vmem:[%s8773_s2 + $0x508] sm:$0xf]  ;;  %v5695_v21 = vld [vmem:[%s8773_s2 + $0x514] sm:$0xf0]  ;;  %v4425_v28 = vor.u32 %v5663_v19, %v4424_v18  ;;  %v5569_v29 = vld [vmem:[%s8773_s2 + $0x12c] sm:$0xf]  ;;  %v4413_v36 = vor.u32 %v5657_v25, %v4410_v26 }
  0x91   :  { %1560 = vmatpush.bf16.msra.mxu0 %v4141_v31  ;;  %v4058_v30 = vld [vmem:[%s8773_s2 + $0x138] sm:$0xf0]  ;;  %v4553_v31 = vor.u32 %v5695_v21, %v4552_v20  ;;  %v5689_v35 = vld [vmem:[%s8773_s2 + $0x4ec] sm:$0xf]  ;;  %vm1989_vm1 = vcmask 1041408   ;;  %vm1985_vm2 = vcmask 162816  }
  0x92   :  { %1506 = vmatpush.bf16.msra.mxu1 %v4489_v33  ;;  %v5533_v33 = vld [vmem:[%s8773_s2 + $0xc] sm:$0xf]  ;;  %v3914_v34 = vld [vmem:[%s8773_s2 + $0x18] sm:$0xf0]  ;;  %v4061_v41 = vor.u32 %v5569_v29, %v4058_v30  ;;  %s6054_s22 = smov 128   ;;  %s6055_s23 = smov 8  }
  0x93   :  { %1520 = vmatpush.bf16.msra.mxu3 %v4617_v38  ;;  %v4538_v38 = vld [vmem:[%s8773_s2 + $0x4f8] sm:$0xf0]  ;;  %v5621_v39 = vld [vmem:[%s8773_s2 + $0x2cc] sm:$0xf]  ;;  %s3872_s27 = sshll.u32 %s8781_s10, 4  ;;  %s6058_s28 = smov 28   ;;  %s3873_s27 = int_to_ptr.hbm [resolvable:$true] %s3872_s27 }
  0x94   :  { %1547 = vmatpush.bf16.msrb.mxu2 %v3997_v32  ;;  %v4285_v32 = vor.u32 %v5625_v22, %v4282_v23  ;;  %v4266_v40 = vld [vmem:[%s8773_s2 + $0x2d8] sm:$0xf0]  ;;  %v5653_v43 = vld [vmem:[%s8773_s2 + $0x3cc] sm:$0xf]  ;;  %v4541_v48 = vor.u32 %v5689_v35, %v4538_v38 }
  0x95   :  { %1561 = vmatpush.bf16.msra.mxu0 %v4125_v45  ;;  %v4394_v44 = vld [vmem:[%s8773_s2 + $0x3d8] sm:$0xf0]  ;;  %v3917_v45 = vor.u32 %v5533_v33, %v3914_v34  ;;  %v4269_v49 = vor.u32 %v5621_v39, %v4266_v40  ;;  %v5721_v51 = vld [vmem:[%s8773_s2 + $0x5ec] sm:$0xf] }
  0x96   :  { %1507 = vmatpush.bf16.msra.mxu1 %v4473_v47  ;;  %v4042_v47 = vld [vmem:[%s8773_s2 + $0x118] sm:$0xf0]  ;;  %v5685_v53 = vld [vmem:[%s8773_s2 + $0x4cc] sm:$0xf]  ;;  %v4397_v56 = vor.u32 %v5653_v43, %v4394_v44 }
  0x97   :  { %1521 = vmatpush.bf16.msra.mxu3 %v4601_v52  ;;  %v4666_v52 = vld [vmem:[%s8773_s2 + $0x5f8] sm:$0xf0]  ;;  %v5617_v58 = vld [vmem:[%s8773_s2 + $0x2ac] sm:$0xf] }
  0x98   :  { %1548 = vmatpush.bf16.msrb.mxu2 %v3981_v46  ;;  %4688 = vmatmul.msk.bf16.vlgmr.msrb.gmra.mxu0 %vm1247_vm0, %v6497_v50  ;;  %v5565_v46 = vld [vmem:[%s8773_s2 + $0x10c] sm:$0xf]  ;;  %v4522_v57 = vld [vmem:[%s8773_s2 + $0x4d8] sm:$0xf0]  ;;  %v4669_v0 = vor.u32 %v5721_v51, %v4666_v52  ;;  %v7335_v52 = vld [vmem:[%s8774_s3] sm:$0xf] }
  0x99   :  { %1562 = vmatpush.bf16.msra.mxu0 %v4109_v61  ;;  %v4250_v59 = vld [vmem:[%s8773_s2 + $0x2b8] sm:$0xf0]  ;;  %v4045_v61 = vor.u32 %v5565_v46, %v4042_v47  ;;  %v4525_v1 = vor.u32 %v5685_v53, %v4522_v57  ;;  %v5681_v5 = vld [vmem:[%s8773_s2 + $0x4ac] sm:$0xf]  ;;  %s3885_s3 = sshll.u32 %s8782_s11, 4  ;;  %s6056_s11 = smov [#allocation2]   ;;  %s3886_s3 = int_to_ptr.hbm [resolvable:$true] %s3885_s3 }
  0x9a   :  { %1508 = vmatpush.bf16.msra.mxu1 %v4457_v63  ;;  %v4378_v63 = vld [vmem:[%s8773_s2 + $0x3b8] sm:$0xf0]  ;;  %v4253_v2 = vor.u32 %v5617_v58, %v4250_v59  ;;  %v5613_v9 = vld [vmem:[%s8773_s2 + $0x28c] sm:$0xf]  ;;  %s3870_s24 = sshll.u32 %s6056_s11, 4  ;;  %s3871_s24 = int_to_ptr.vmem [resolvable:$true] %s3870_s24 }
  0x9b   :  { %1522 = vmatpush.bf16.msra.mxu3 %v4585_v3  ;;  %v5717_v3 = vld [vmem:[%s8773_s2 + $0x5cc] sm:$0xf]  ;;  %v4650_v4 = vld [vmem:[%s8773_s2 + $0x5d8] sm:$0xf0] }
  0x9c   :  { %1549 = vmatpush.bf16.msrb.mxu2 %v3965_v62  ;;  %v5649_v62 = vld [vmem:[%s8773_s2 + $0x3ac] sm:$0xf]  ;;  %v4506_v7 = vld [vmem:[%s8773_s2 + $0x4b8] sm:$0xf0] }
  0x9d   :  { %1563 = vmatpush.bf16.msra.mxu0 %v4093_v10  ;;  %v4381_v6 = vor.u32 %v5649_v62, %v4378_v63  ;;  %v4234_v10 = vld [vmem:[%s8773_s2 + $0x298] sm:$0xf0]  ;;  %v5645_v11 = vld [vmem:[%s8773_s2 + $0x38c] sm:$0xf]  ;;  %v4509_v14 = vor.u32 %v5681_v5, %v4506_v7 }
  0x9e   :  { %1509 = vmatpush.bf16.msra.mxu1 %v4441_v13  ;;  %v4653_v13 = vor.u32 %v5717_v3, %v4650_v4  ;;  %v4237_v15 = vor.u32 %v5613_v9, %v4234_v10  ;;  %v5713_v16 = vld [vmem:[%s8773_s2 + $0x5ac] sm:$0xf]  ;;  %v4490_v19 = vld [vmem:[%s8773_s2 + $0x498] sm:$0xf0] }
  0x9f   :  { %1523 = vmatpush.bf16.msra.mxu3 %v4569_v17  ;;  %v4634_v17 = vld [vmem:[%s8773_s2 + $0x5b8] sm:$0xf0]  ;;  %v5677_v18 = vld [vmem:[%s8773_s2 + $0x48c] sm:$0xf] }
  0xa0   :  { %1550 = vmatpush.bf16.msrb.mxu2 %v3949_v12  ;;  %v4362_v12 = vld [vmem:[%s8773_s2 + $0x398] sm:$0xf0]  ;;  %v5609_v20 = vld [vmem:[%s8773_s2 + $0x26c] sm:$0xf]  ;;  %v4493_v25 = vor.u32 %v5677_v18, %v4490_v19 }
  0xa1   :  { %1564 = vmatpush.bf16.msra.mxu0 %v4077_v24  ;;  %v4218_v21 = vld [vmem:[%s8773_s2 + $0x278] sm:$0xf0]  ;;  %v5641_v22 = vld [vmem:[%s8773_s2 + $0x36c] sm:$0xf]  ;;  %v4637_v24 = vor.u32 %v5713_v16, %v4634_v17 }
  0xa2   :  { %1510 = vmatpush.bf16.msra.mxu1 %v4425_v28  ;;  %v4346_v23 = vld [vmem:[%s8773_s2 + $0x378] sm:$0xf0]  ;;  %v4221_v26 = vor.u32 %v5609_v20, %v4218_v21  ;;  %v5673_v28 = vld [vmem:[%s8773_s2 + $0x46c] sm:$0xf] }
  0xa3   :  { %1524 = vmatpush.bf16.msra.mxu3 %v4553_v31  ;;  %v4349_v29 = vor.u32 %v5641_v22, %v4346_v23  ;;  %v4474_v30 = vld [vmem:[%s8773_s2 + $0x478] sm:$0xf0]  ;;  %v5605_v31 = vld [vmem:[%s8773_s2 + $0x24c] sm:$0xf]  ;;  %v5734_v23 = vld [vmem:[%s8775_s4 + $0x30] sm:$0xff] }
  0xa4   :  { %1551 = vmatpush.bf16.msrb.mxu2 %v3933_v27  ;;  %v5709_v27 = vld [vmem:[%s8773_s2 + $0x58c] sm:$0xf]  ;;  %v4330_v34 = vld [vmem:[%s8773_s2 + $0x358] sm:$0xf0] }
  0xa5   :  { %1565 = vmatpush.bf16.msra.mxu0 %v4061_v41  ;;  %1511 = vmatmul.bf16.vlgmr.msra.gmra.mxu1 %v6594_v37  ;;  %v5637_v33 = vld [vmem:[%s8773_s2 + $0x34c] sm:$0xf]  ;;  %v4602_v40 = vld [vmem:[%s8773_s2 + $0x578] sm:$0xf0] }
  0xa6   :  { %1573 = vmatpush.bf16.msrb.mxu1 %v4285_v32  ;;  %1525 = vmatmul.bf16.vlgmr.msra.gmra.mxu3 %v6605_v42  ;;  %v4202_v32 = vld [vmem:[%s8773_s2 + $0x258] sm:$0xf0]  ;;  %v5705_v39 = vld [vmem:[%s8773_s2 + $0x56c] sm:$0xf]  ;;  %v4333_v43 = vor.u32 %v5637_v33, %v4330_v34 }
  0xa7   :  { %1587 = vmatpush.bf16.msrb.mxu3 %v4413_v36  ;;  %v4477_v36 = vor.u32 %v5673_v28, %v4474_v30  ;;  %v4205_v38 = vor.u32 %v5605_v31, %v4202_v32  ;;  %v5669_v41 = vld [vmem:[%s8773_s2 + $0x44c] sm:$0xf]  ;;  %v4458_v44 = vld [vmem:[%s8773_s2 + $0x458] sm:$0xf0] }
  0xa8   :  { %1552 = vmatpush.bf16.msrb.mxu2 %v3917_v45  ;;  %v5601_v45 = vld [vmem:[%s8773_s2 + $0x22c] sm:$0xf]  ;;  %v4186_v46 = vld [vmem:[%s8773_s2 + $0x238] sm:$0xf0]  ;;  %v4461_v53 = vor.u32 %v5669_v41, %v4458_v44  ;;  %v5730_v44 = vld [vmem:[%s8775_s4 + $0x10] sm:$0xff] }
  0xa9   :  { %1566 = vmatpush.bf16.msra.mxu0 %v4045_v61  ;;  %v5633_v47 = vld [vmem:[%s8773_s2 + $0x32c] sm:$0xf]  ;;  %v4586_v57 = vld [vmem:[%s8773_s2 + $0x558] sm:$0xf0]  ;;  %v1260_v61 = vpop.f32.mrf.mxu0 }
  0xaa   :  { %1574 = vmatpush.bf16.msrb.mxu1 %v4269_v49  ;;  %v4605_v49 = vor.u32 %v5705_v39, %v4602_v40  ;;  %v5701_v51 = vld [vmem:[%s8773_s2 + $0x54c] sm:$0xf]  ;;  %v4442_v59 = vld [vmem:[%s8773_s2 + $0x438] sm:$0xf0] }
  0xab   :  { %1588 = vmatpush.bf16.msrb.mxu3 %v4397_v56  ;;  %1553 = vmatmul.bf16.vlgmr.msrb.gmra.mxu2 %v6370_v55  ;;  %v4365_v55 = vor.u32 %v5645_v11, %v4362_v12  ;;  %v4189_v56 = vor.u32 %v5601_v45, %v4186_v46  ;;  %v5665_v58 = vld [vmem:[%s8773_s2 + $0x42c] sm:$0xf]  ;;  %v4298_v3 = vld [vmem:[%s8773_s2 + $0x318] sm:$0xf0]  ;;  %v4589_v7 = vor.u32 %v5701_v51, %v4586_v57 }
  0xac   :  { %1601 = vmatpush.bf16.msra.mxu2 %v4541_v48  ;;  %1567 = vmatmul.bf16.vlgmr.msra.gmra.mxu0 %v6406_v8  ;;  %v4618_v8 = vld [vmem:[%s8773_s2 + $0x598] sm:$0xf0]  ;;  %v5597_v63 = vld [vmem:[%s8773_s2 + $0x20c] sm:$0xf]  ;;  %v4445_v9 = vor.u32 %v5665_v58, %v4442_v59 }
  0xad   :  { %1615 = vmatpush.bf16.msrb.mxu0 %v4669_v0  ;;  %v4621_v35 = vor.u32 %v5709_v27, %v4618_v8  ;;  %v4314_v48 = vld [vmem:[%s8773_s2 + $0x338] sm:$0xf0]  ;;  %v5725_v4 = vld [vmem:[%s8773_s2 + $0x60c] sm:$0xf]  ;;  %v1302_v8 = vpop.f32.mrf.mxu3 }
  0xae   :  { %1575 = vmatpush.bf16.msrb.mxu1 %v4253_v2  ;;  %v4317_v62 = vor.u32 %v5633_v47, %v4314_v48  ;;  %v4170_v0 = vld [vmem:[%s8773_s2 + $0x218] sm:$0xf0]  ;;  %v1274_v2 = vpop.f32.mrf.mxu1  ;;  %v5697_v11 = vld [vmem:[%s8773_s2 + $0x52c] sm:$0xf] }
  0xaf   :  { %1589 = vmatpush.bf16.msrb.mxu3 %v4381_v6  ;;  %v4682_v5 = vld [vmem:[%s8773_s2 + $0x618] sm:$0xf0]  ;;  %v1288_v6 = vpop.f32.mrf.mxu2  ;;  %v4173_v10 = vor.u32 %v5597_v63, %v4170_v0  ;;  %v5693_v20 = vld [vmem:[%s8773_s2 + $0x50c] sm:$0xf]  ;;  %v5738_v0 = vld [vmem:[%s8775_s4 + $0x50] sm:$0xff] }
  0xb0   :  { %1602 = vmatpush.bf16.msra.mxu2 %v4525_v1  ;;  %v5629_v1 = vld [vmem:[%s8773_s2 + $0x30c] sm:$0xf]  ;;  %v4570_v12 = vld [vmem:[%s8773_s2 + $0x538] sm:$0xf0]  ;;  %v4685_v17 = vor.u32 %v5725_v4, %v4682_v5  ;;  %v260_v4 = vperm.slane %v7335_v52, 1  ;;  %v5736_v5 = vld [vmem:[%s8775_s4 + $0x40] sm:$0xff] }
  0xb1   :  { %1616 = vmatpush.bf16.msrb.mxu0 %v4653_v13  ;;  %v259_v13 = vperm.slane %v7335_v52, 0  ;;  %v4426_v16 = vld [vmem:[%s8773_s2 + $0x418] sm:$0xf0]  ;;  %v5733_v30 = vld [vmem:[%s8775_s4 + $0x28] sm:$0xff] }
  0xb2   :  { %1576 = vmatpush.bf16.msrb.mxu1 %v4237_v15  ;;  %v5661_v15 = vld [vmem:[%s8773_s2 + $0x40c] sm:$0xf]  ;;  %v5735_v18 = vld [vmem:[%s8775_s4 + $0x38] sm:$0xff] }
  0xb3   :  { %1590 = vmatpush.bf16.msrb.mxu3 %v4365_v55  ;;  %v4573_v55 = vor.u32 %v5697_v11, %v4570_v12  ;;  %v4429_v19 = vor.u32 %v5661_v15, %v4426_v16  ;;  %v4554_v21 = vld [vmem:[%s8773_s2 + $0x518] sm:$0xf0]  ;;  %v1261_v22 = vadd.f32 %v1260_v61, %v259_v13  ;;  %v5741_v41 = vld [vmem:[%s8775_s4 + $0x68] sm:$0xff]  ;;  %v5728_v61 = vld [vmem:[%s8775_s4] sm:$0xff]  ;;  %s6057_s2 = smov 448  }
  0xb4   :  { %1603 = vmatpush.bf16.msra.mxu2 %v4509_v14  ;;  %v4301_v14 = vor.u32 %v5629_v1, %v4298_v3  ;;  %v5737_v3 = vld [vmem:[%s8775_s4 + $0x48] sm:$0xff] }
  0xb5   :  { %1617 = vmatpush.bf16.msrb.mxu0 %v4637_v24  ;;  %v1262_v24 = vpop.f32.mrf.mxu0  ;;  %v1275_v27 = vadd.f32 %v1274_v2, %v1261_v22  ;;  %v1304_v39 = vpop.f32.mrf.mxu3 }
  0xb6   :  { %1577 = vmatpush.bf16.msrb.mxu1 %v4221_v26  ;;  %v1276_v26 = vpop.f32.mrf.mxu1 }
  0xb7   :  { %1591 = vmatpush.bf16.msrb.mxu3 %v4349_v29  ;;  %v1290_v28 = vpop.f32.mrf.mxu2  ;;  %v1263_v29 = vadd.f32 %v1262_v24, %v259_v13  ;;  %v1289_v31 = vadd.f32 %v1288_v6, %v1275_v27 }
  0xb8   :  { %1604 = vmatpush.bf16.msra.mxu2 %v4493_v25  ;;  %v4557_v25 = vor.u32 %v5693_v20, %v4554_v21 }
  0xb9   :  { %1618 = vmatpush.bf16.msrb.mxu0 %v4621_v35  ;;  %v1277_v32 = vadd.f32 %v1276_v26, %v1263_v29  ;;  %v1303_v35 = vadd.f32 %v1302_v8, %v1289_v31  ;;  %v5750_v8 = vld [vmem:[%s8775_s4 + $0xb0] sm:$0xff] }
  0xba   :  { %1578 = vmatpush.bf16.msrb.mxu1 %v4205_v38 }
  0xbb   :  { %1592 = vmatpush.bf16.msrb.mxu3 %v4333_v43  ;;  %v1291_v38 = vadd.f32 %v1290_v28, %v1277_v32  ;;  %v5749_v32 = vld [vmem:[%s8775_s4 + $0xa8] sm:$0xff] }
  0xbc   :  { %1605 = vmatpush.bf16.msra.mxu2 %v4477_v36 }
  0xbd   :  { %1619 = vmatpush.bf16.msrb.mxu0 %v4605_v49  ;;  %v1305_v43 = vadd.f32 %v1304_v39, %v1291_v38  ;;  %v5740_v49 = vld [vmem:[%s8775_s4 + $0x60] sm:$0xff]  ;;  %v5745_v39 = vld [vmem:[%s8775_s4 + $0x88] sm:$0xff] }
  0xbe   :  { %1579 = vmatpush.bf16.msrb.mxu1 %v4189_v56 }
  0xbf   :  { %1593 = vmatpush.bf16.msrb.mxu3 %v4317_v62  ;;  %v1344_v36 = vpop.f32.mrf.mxu2 }
  0xc0   :  { %1606 = vmatpush.bf16.msra.mxu2 %v4461_v53  ;;  %v5729_v53 = vld [vmem:[%s8775_s4 + $0x8] sm:$0xff] }
  0xc1   :  { %1620 = vmatpush.bf16.msrb.mxu0 %v4589_v7  ;;  %v1316_v33 = vpop.f32.mrf.mxu0 }
  0xc2   :  { %1580 = vmatpush.bf16.msrb.mxu1 %v4173_v10  ;;  %v1330_v34 = vpop.f32.mrf.mxu1  ;;  %v1317_v40 = vadd.f32 %v1316_v33, %v1303_v35  ;;  %v5747_v35 = vld [vmem:[%s8775_s4 + $0x98] sm:$0xff] }
  0xc3   :  { %1594 = vmatpush.bf16.msrb.mxu3 %v4301_v14 }
  0xc4   :  { %1607 = vmatpush.bf16.msra.mxu2 %v4445_v9  ;;  %v1331_v45 = vadd.f32 %v1330_v34, %v1317_v40  ;;  %v5748_v34 = vld [vmem:[%s8775_s4 + $0xa0] sm:$0xff] }
  0xc5   :  { %1621 = vmatpush.bf16.msrb.mxu0 %v4573_v55  ;;  %1581 = vmatmul.bf16.vlgmr.msrb.gmra.mxu1 %v6368_v54  ;;  %v5743_v54 = vld [vmem:[%s8775_s4 + $0x78] sm:$0xff]  ;;  %v5744_v40 = vld [vmem:[%s8775_s4 + $0x80] sm:$0xff] }
  0xc6   :  { %1636 = vmatpush.bf16.msra.mxu1 %v4685_v17  ;;  %1595 = vmatmul.bf16.vlgmr.msrb.gmra.mxu3 %v6381_v60  ;;  %v5732_v60 = vld [vmem:[%s8775_s4 + $0x20] sm:$0xff]  ;;  %v1345_v56 = vadd.f32 %v1344_v36, %v1331_v45  ;;  %v5746_v36 = vld [vmem:[%s8775_s4 + $0x90] sm:$0xff] }
  0xc7   :  { %1862 = vmatpush.bf16.msra.mxu3 %v5735_v18  ;;  %v1346_v57 = vpop.f32.mrf.mxu2 }
  0xc8   :  { %1608 = vmatpush.bf16.msra.mxu2 %v4429_v19  ;;  %v1643_v62 = vmax.f32 %v1345_v56, 0.0 }
  0xc9   :  { %1622 = vmatpush.bf16.msrb.mxu0 %v4557_v25  ;;  %v1318_v46 = vpop.f32.mrf.mxu0  ;;  %v1358_v63 = vpop.f32.mrf.mxu3  ;;  %v5751_v25 = vld [vmem:[%s8775_s4 + $0xb8] sm:$0xff] }
  0xca   :  { %1876 = vmatpush.bf16.msrb.mxu1 %v5743_v54  ;;  %v1319_v47 = vadd.f32 %v1318_v46, %v1305_v43  ;;  %v1332_v48 = vpop.f32.mrf.mxu1  ;;  %v1359_v7 = vadd.f32 %v1358_v63, %v260_v4  ;;  %v261_v43 = vperm.slane %v7335_v52, 2 }
  0xcb   :  { %1863 = vmatpush.bf16.msra.mxu3 %v5734_v23  ;;  %1609 = vmatmul.bf16.vlgmr.msra.gmra.mxu2 %v6594_v37  ;;  %v5742_v37 = vld [vmem:[%s8775_s4 + $0x70] sm:$0xff] }
  0xcc   :  { %1623 = vmatmul.bf16.vlgmr.msrb.gmra.mxu0 %v6605_v42  ;;  %v5731_v42 = vld [vmem:[%s8775_s4 + $0x18] sm:$0xff]  ;;  %v1333_v51 = vadd.f32 %v1332_v48, %v1319_v47  ;;  %1890 = vmatpush.bf16.msrb.mxu2 %v5751_v25 }
  0xce   :  { %1877 = vmatpush.bf16.msrb.mxu1 %v5742_v37  ;;  %v1347_v58 = vadd.f32 %v1346_v57, %v1333_v51 }
  0xcf   :  { %1864 = vmatpush.bf16.msra.mxu3 %v5733_v30  ;;  %v1372_v2 = vpop.f32.mrf.mxu2 }
  0xd0   :  { %v1647_v59 = vmax.f32 %v1347_v58, 0.0  ;;  %v1373_v11 = vadd.f32 %v1372_v2, %v1359_v7  ;;  %1891 = vmatpush.bf16.msrb.mxu2 %v5750_v8 }
  0xd1   :  { %v1360_v6 = vpop.f32.mrf.mxu3 }
  0xd2   :  { %1878 = vmatpush.bf16.msrb.mxu1 %v5741_v41  ;;  %v1651_v1 = vpack.c.bf16 %v1647_v59, %v1643_v62  ;;  %v1361_v12 = vadd.f32 %v1360_v6, %v260_v4 }
  0xd3   :  { %1865 = vmatpush.bf16.msra.mxu3 %v5732_v60 }
  0xd4   :  { %1892 = vmatpush.bf16.msrb.mxu2 %v5749_v32 }
  0xd5   :  { %4689 = vmatmul.msk.bf16.vlgmr.msra.gmra.mxu1 %vm1247_vm0, %v6497_v50  ;;  %v5739_v50 = vld [vmem:[%s8775_s4 + $0x58] sm:$0xff] }
  0xd6   :  { %1879 = vmatpush.bf16.msrb.mxu1 %v5740_v49 }
  0xd7   :  { %1866 = vmatpush.bf16.msra.mxu3 %v5731_v42  ;;  %v1374_v10 = vpop.f32.mrf.mxu2 }
  0xd8   :  { %v1375_v15 = vadd.f32 %v1374_v10, %v1361_v12  ;;  %1893 = vmatpush.bf16.msrb.mxu2 %v5748_v34 }
  0xda   :  { %1880 = vmatpush.bf16.msrb.mxu1 %v5739_v50 }
  0xdb   :  { %1867 = vmatpush.bf16.msra.mxu3 %v5730_v44 }
  0xdc   :  { %1894 = vmatpush.bf16.msrb.mxu2 %v5747_v35 }
  0xde   :  { %1881 = vmatpush.bf16.msrb.mxu1 %v5738_v0 }
  0xdf   :  { %1868 = vmatpush.bf16.msra.mxu3 %v5729_v53 }
  0xe0   :  { %1895 = vmatpush.bf16.msrb.mxu2 %v5746_v36 }
  0xe1   :  { %v1386_v9 = vpop.f32.mrf.mxu0 }
  0xe2   :  { %1882 = vmatpush.bf16.msrb.mxu1 %v5737_v3  ;;  %v1400_v13 = vpop.f32.mrf.mxu1  ;;  %v1387_v14 = vadd.f32 %v1386_v9, %v1373_v11 }
  0xe3   :  { %1869 = vmatpush.bf16.msra.mxu3 %v5728_v61 }
  0xe4   :  { %v1401_v55 = vadd.f32 %v1400_v13, %v1387_v14  ;;  %1896 = vmatpush.bf16.msrb.mxu2 %v5745_v39 }
  0xe6   :  { %1870 = vmatmul.bf16.vlgmr.msra.gmra.mxu3 %v1651_v1  ;;  %1883 = vmatpush.bf16.msrb.mxu1 %v5736_v5 }
  0xe8   :  { %1897 = vmatpush.bf16.msrb.mxu2 %v5744_v40 }
  0xe9   :  { %v1414_v16 = vpop.f32.mrf.mxu3  ;;  %v1388_v17 = vpop.f32.mrf.mxu0 }
  0xea   :  { %v1389_v19 = vadd.f32 %v1388_v17, %v1375_v15  ;;  %v1402_v20 = vpop.f32.mrf.mxu1  ;;  %v1415_v21 = vadd.f32 %v1414_v16, %v1401_v55  ;;  %v5752_v15 = vld [vmem:[%s8775_s4 + $0xc0] sm:$0xff]  ;;  %v262_v16 = vperm.slane %v7335_v52, 3 }
  0xeb   :  { %1911 = vmatpush.bf16.msra.mxu0 %v5752_v15 }
  0xec   :  { %v1403_v22 = vadd.f32 %v1402_v20, %v1389_v19 }
  0xee   :  { %v1428_v18 = vpop.f32.mrf.mxu2 }
  0xef   :  { %v1429_v26 = vadd.f32 %v1428_v18, %v1415_v21 }
  0xf1   :  { %v1416_v23 = vpop.f32.mrf.mxu3  ;;  %v1442_v24 = vpop.f32.mrf.mxu0 }
  0xf2   :  { %v1417_v27 = vadd.f32 %v1416_v23, %v1403_v22  ;;  %v1443_v29 = vadd.f32 %v1442_v24, %v1429_v26 }
  0xf4   :  { %v1644_v60 = vmax.f32 %v1443_v29, 0.0 }
  0xf6   :  { %v1430_v28 = vpop.f32.mrf.mxu2 }
  0xf7   :  { %v1431_v30 = vadd.f32 %v1430_v28, %v1417_v27 }
  0xf9   :  { %v1444_v54 = vpop.f32.mrf.mxu0 }
  0xfa   :  { %v1445_v31 = vadd.f32 %v1444_v54, %v1431_v30 }
  0xfc   :  { %v1648_v33 = vmax.f32 %v1445_v31, 0.0 }
  0xfe   :  { %v1652_v37 = vpack.c.bf16 %v1648_v33, %v1644_v60 }
 0x100   :  { %1884 = vmatmul.bf16.vlgmr.msrb.gmra.mxu1 %v1652_v37 }
 0x102   :  { %v1456_v38 = vpop.f32.mrf.mxu1 }
 0x103   :  { %v1457_v46 = vadd.f32 %v1456_v38, %v261_v43 }
 0x105   :  { %v1484_v42 = vpop.f32.mrf.mxu0 }
 0x109   :  { %v1470_v41 = vpop.f32.mrf.mxu3 }
 0x10a   :  { %v1458_v44 = vpop.f32.mrf.mxu1  ;;  %v1471_v49 = vadd.f32 %v1470_v41, %v1457_v46  ;;  %v5939_v41 = vld [vmem:[%s8776_s5] ss:$0 sm:$0xff]  ;;  %s6052_s5 = smov 108  }
 0x10b   :  { %v1459_v51 = vadd.f32 %v1458_v44, %v261_v43 }
 0x10c   :  { %v1485_v57 = vadd.f32 %v1484_v42, %v1471_v49 }
 0x10d   :  { %v1486_v45 = vpop.f32.mrf.mxu0 }
 0x10e   :  { %v1498_v47 = vpop.f32.mrf.mxu2 }
 0x10f   :  { %v1499_v59 = vadd.f32 %v1498_v47, %v1485_v57 }
 0x111   :  { %v1472_v48 = vpop.f32.mrf.mxu3 }
 0x112   :  { %v1473_v58 = vadd.f32 %v1472_v48, %v1459_v51 }
 0x114   :  { %v1487_v61 = vadd.f32 %v1486_v45, %v1473_v58 }
 0x115   :  { %v1540_v56 = vpop.f32.mrf.mxu0 }
 0x116   :  { %v1500_v62 = vpop.f32.mrf.mxu2 }
 0x117   :  { %v1501_v2 = vadd.f32 %v1500_v62, %v1487_v61 }
 0x11d   :  { %v1542_v1 = vpop.f32.mrf.mxu0 }
 0x122   :  { %v1512_v53 = vpop.f32.mrf.mxu1 }
 0x123   :  { %v1513_v63 = vadd.f32 %v1512_v53, %v1499_v59 }
 0x129   :  { %v1526_v50 = vpop.f32.mrf.mxu3  ;;  %v1568_v13 = vpop.f32.mrf.mxu0 }
 0x12a   :  { %v1514_v0 = vpop.f32.mrf.mxu1  ;;  %v1527_v3 = vadd.f32 %v1526_v50, %v1513_v63 }
 0x12b   :  { %v1515_v4 = vadd.f32 %v1514_v0, %v1501_v2 }
 0x12c   :  { %v1541_v6 = vadd.f32 %v1540_v56, %v1527_v3 }
 0x12e   :  { %v1645_v10 = vmax.f32 %v1541_v6, 0.0  ;;  %v1554_v12 = vpop.f32.mrf.mxu2 }
 0x12f   :  { %v1555_v19 = vadd.f32 %v1554_v12, %v262_v16 }
 0x131   :  { %v1528_v5 = vpop.f32.mrf.mxu3  ;;  %v1570_v55 = vpop.f32.mrf.mxu0  ;;  %v1569_v20 = vadd.f32 %v1568_v13, %v1555_v19  ;;  %v5755_v19 = vld [vmem:[%s8777_s6 + $0xc] sm:$0xf0] }
 0x132   :  { %v1529_v7 = vadd.f32 %v1528_v5, %v1515_v4  ;;  %v1943_v4 = vld [vmem:[%s8777_s6 + $0x20] sm:$0x33]  ;;  %v1944_v5 = vld [vmem:[%s8777_s6 + $0x28] sm:$0x33] }
 0x133   :  { %v1969_v6 = vunpack.c.l.b16 %v1943_v4 }
 0x134   :  { %v1543_v9 = vadd.f32 %v1542_v1, %v1529_v7  ;;  %v1970_v7 = vunpack.c.h.b16 %v1943_v4 }
 0x136   :  { %v1649_v11 = vmax.f32 %v1543_v9, 0.0  ;;  %v1556_v18 = vpop.f32.mrf.mxu2  ;;  %v1971_v9 = vunpack.c.l.b16 %v1944_v5  ;;  %v1978_v12 = vpack.c.b16 %v1970_v7, %v1970_v7 }
 0x137   :  { %v1557_v22 = vadd.f32 %v1556_v18, %v262_v16 }
 0x138   :  { %v1653_v14 = vpack.c.bf16 %v1649_v11, %v1645_v10  ;;  %v1972_v10 = vunpack.c.h.b16 %v1944_v5  ;;  %v1977_v11 = vpack.c.b16 %v1969_v6, %v1969_v6  ;;  %v1979_v13 = vpack.c.b16 %v1971_v9, %v1971_v9  ;;  %v5121_v5 = vld [vmem:[%s8779_s8 + $0x268] sm:$0xf]  ;;  %v5837_v6 = vld [vmem:[%s8779_s8 + $0x280] sm:$0xf0] }
 0x139   :  { %v1571_v26 = vadd.f32 %v1570_v55, %v1557_v22  ;;  %v1994_v16 = vsel %vm1989_vm1, %v1978_v12, 0  ;;  %v4793_v55 = vld [vmem:[%s8777_s6] sm:$0xf]  ;;  %v4795_v22 = vld [vmem:[%s8777_s6 + $0x10] sm:$0xf0] }
 0x13a   :  { %1898 = vmatmul.bf16.vlgmr.msrb.gmra.mxu2 %v1653_v14  ;;  %v1980_v14 = vpack.c.b16 %v1972_v10, %v1972_v10  ;;  %v1991_v15 = vsel %vm1989_vm1, %v1977_v11, 0  ;;  %2022 = vmatpush.bf16.msrb.mxu0 %v1994_v16  ;;  %v5373_v10 = vld [vmem:[%s8779_s8 + $0x460] sm:$0xf]  ;;  %v5900_v11 = vld [vmem:[%s8779_s8 + $0x478] sm:$0xf0] }
 0x13b   :  { %2008 = vmatpush.bf16.msrb.mxu3 %v1991_v15  ;;  %v5122_v15 = vor.u32 %v5837_v6, %v5121_v5  ;;  %v5093_v16 = vld [vmem:[%s8779_s8 + $0x230] sm:$0xf]  ;;  %v5785_v5 = vld [vmem:[%s8779_s8 + $0xe4] sm:$0xf]  ;;  %v4927_v6 = vld [vmem:[%s8779_s8 + $0xfc] sm:$0xf0] }
 0x13c   :  { %v2000_v18 = vsel %vm1989_vm1, %v1980_v14, 0  ;;  %v5774_v14 = vld [vmem:[%s8779_s8 + $0x88] sm:$0xf0] }
 0x13d   :  { %2050 = vmatpush.bf16.msra.mxu2 %v2000_v18  ;;  %v5374_v18 = vor.u32 %v5900_v11, %v5373_v10  ;;  %v5841_v10 = vld [vmem:[%s8779_s8 + $0x2a4] sm:$0xf]  ;;  %v5151_v11 = vld [vmem:[%s8779_s8 + $0x2bc] sm:$0xf0] }
 0x142   :  { %v1582_v17 = vpop.f32.mrf.mxu1 }
 0x143   :  { %v1583_v25 = vadd.f32 %v1582_v17, %v1569_v20  ;;  %v1997_v17 = vsel %vm1989_vm1, %v1979_v13, 0  ;;  %v5753_v20 = vld [vmem:[%s8777_s6 + $0x4] sm:$0xf]  ;;  %v4869_v13 = vld [vmem:[%s8779_s8 + $0x70] sm:$0xf] }
 0x144   :  { %2036 = vmatpush.bf16.msra.mxu1 %v1997_v17  ;;  %v5830_v17 = vld [vmem:[%s8779_s8 + $0x248] sm:$0xf0] }
 0x149   :  { %v1596_v21 = vpop.f32.mrf.mxu3  ;;  %v1624_v27 = vpop.f32.mrf.mxu0 }
 0x14a   :  { %v1584_v23 = vpop.f32.mrf.mxu1  ;;  %v1597_v8 = vadd.f32 %v1596_v21, %v1583_v25  ;;  %v4794_v21 = vor.u32 %v5755_v19, %v4793_v55  ;;  %v4798_v25 = vor.u32 %v5753_v20, %v4795_v22  ;;  %v4870_v55 = vor.u32 %v5774_v14, %v4869_v13  ;;  %v5345_v19 = vld [vmem:[%s8779_s8 + $0x428] sm:$0xf]  ;;  %v5893_v20 = vld [vmem:[%s8779_s8 + $0x440] sm:$0xf0]  ;;  %v4841_v22 = vld [vmem:[%s8779_s8 + $0x38] sm:$0xf] }
 0x14b   :  { %v1585_v28 = vadd.f32 %v1584_v23, %v1571_v26  ;;  %v4801_v23 = vld [vmem:[%s8777_s6 + $0x8] sm:$0xf]  ;;  %v5289_v13 = vld [vmem:[%s8779_s8 + $0x3b8] sm:$0xf]  ;;  %v5879_v14 = vld [vmem:[%s8779_s8 + $0x3d0] sm:$0xf0] }
 0x14c   :  { %2009 = vmatpush.bf16.msrb.mxu3 %v4794_v21  ;;  %2023 = vmatpush.bf16.msrb.mxu0 %v4798_v25  ;;  %v1924_v21 = vld [vmem:[%s8772_s1] sm:$0xff]  ;;  %v5065_v25 = vld [vmem:[%s8779_s8 + $0x1f8] sm:$0xf] }
 0x14e   :  { %v1610_v24 = vpop.f32.mrf.mxu2 }
 0x14f   :  { %v1611_v31 = vadd.f32 %v1610_v24, %v1597_v8  ;;  %v5756_v24 = vld [vmem:[%s8777_s6 + $0x14] sm:$0xf0]  ;;  %v4803_v8 = vld [vmem:[%s8777_s6 + $0x18] sm:$0xf0] }
 0x150   :  { %v4802_v26 = vor.u32 %v5756_v24, %v4801_v23  ;;  %v5767_v23 = vld [vmem:[%s8779_s8 + $0x50] sm:$0xf0]  ;;  %v5094_v24 = vor.u32 %v5830_v17, %v5093_v16  ;;  %v5290_v16 = vor.u32 %v5879_v14, %v5289_v13  ;;  %v5403_v17 = vld [vmem:[%s8779_s8 + $0x4b4] sm:$0xf0]  ;;  %v5493_v13 = vld [vmem:[%s8779_s8 + $0x548] sm:$0xf] }
 0x151   :  { %v1598_v29 = vpop.f32.mrf.mxu3  ;;  %v1625_v60 = vadd.f32 %v1624_v27, %v1611_v31  ;;  %v1626_v33 = vpop.f32.mrf.mxu0  ;;  %v5754_v27 = vld [vmem:[%s8777_s6 + $0xc] sm:$0xf]  ;;  %v5929_v14 = vld [vmem:[%s8779_s8 + $0x560] sm:$0xf0] }
 0x152   :  { %v1599_v30 = vadd.f32 %v1598_v29, %v1585_v28  ;;  %v1638_v54 = vpop.f32.mrf.mxu1  ;;  %v4806_v28 = vor.u32 %v5754_v27, %v4803_v8  ;;  %2037 = vmatpush.bf16.msra.mxu1 %v4802_v26  ;;  %v5009_v29 = vld [vmem:[%s8779_s8 + $0x188] sm:$0xf]  ;;  %v5823_v26 = vld [vmem:[%s8779_s8 + $0x210] sm:$0xf0]  ;;  %v5346_v8 = vor.u32 %v5893_v20, %v5345_v19  ;;  %v5834_v20 = vld [vmem:[%s8779_s8 + $0x26c] sm:$0xf] }
 0x153   :  { %v1639_v34 = vadd.f32 %v1638_v54, %v1625_v60  ;;  %v4981_v54 = vld [vmem:[%s8779_s8 + $0x150] sm:$0xf]  ;;  %v5865_v60 = vld [vmem:[%s8779_s8 + $0x360] sm:$0xf0]  ;;  %v1925_v27 = vld [vmem:[%s8772_s1 + $0x8] sm:$0xff] }
 0x154   :  { %2051 = vmatpush.bf16.msra.mxu2 %v4806_v28  ;;  %v4899_v19 = vld [vmem:[%s8779_s8 + $0xc4] sm:$0xf0] }
 0x155   :  { %v1646_v38 = vmax.f32 %v1639_v34, 0.0  ;;  %v5205_v34 = vld [vmem:[%s8779_s8 + $0x310] sm:$0xf] }
 0x156   :  { %v1612_v32 = vpop.f32.mrf.mxu2 }
 0x157   :  { %v1613_v52 = vadd.f32 %v1612_v32, %v1599_v30  ;;  %v5809_v30 = vld [vmem:[%s8779_s8 + $0x1a0] sm:$0xf0]  ;;  %v5802_v32 = vld [vmem:[%s8779_s8 + $0x168] sm:$0xf0] }
 0x158   :  { %v5010_v31 = vor.u32 %v5809_v30, %v5009_v29  ;;  %v4842_v29 = vor.u32 %v5767_v23, %v4841_v22 }
 0x159   :  { %v1627_v37 = vadd.f32 %v1626_v33, %v1613_v52  ;;  %v5233_v52 = vld [vmem:[%s8779_s8 + $0x348] sm:$0xf] }
 0x15a   :  { %v1640_v35 = vpop.f32.mrf.mxu1  ;;  %v5234_v33 = vor.u32 %v5865_v60, %v5233_v52  ;;  %3189 = vmatpush.bf16.msra.mxu3 %v5010_v31  ;;  %v5760_v52 = vld [vmem:[%s8779_s8 + $0x18] sm:$0xf0]  ;;  %v5806_v60 = vld [vmem:[%s8779_s8 + $0x18c] sm:$0xf] }
 0x15b   :  { %v1641_v36 = vadd.f32 %v1640_v35, %v1627_v37  ;;  %v4982_v37 = vor.u32 %v5802_v32, %v4981_v54  ;;  %v5858_v35 = vld [vmem:[%s8779_s8 + $0x328] sm:$0xf0]  ;;  %v5066_v54 = vor.u32 %v5823_v26, %v5065_v25  ;;  %v4813_v32 = vld [vmem:[%s8779_s8] sm:$0xf]  ;;  %v5872_v25 = vld [vmem:[%s8779_s8 + $0x398] sm:$0xf0] }
 0x15c   :  { %v5897_v26 = vld [vmem:[%s8779_s8 + $0x464] sm:$0xf] }
 0x15d   :  { %v1650_v42 = vmax.f32 %v1641_v36, 0.0  ;;  %v4953_v36 = vld [vmem:[%s8779_s8 + $0x118] sm:$0xf] }
 0x15e   :  { %3190 = vmatpush.bf16.msra.mxu3 %v4982_v37 }
 0x15f   :  { %v1654_v39 = vpack.c.bf16 %v1650_v42, %v1646_v38  ;;  %v5795_v38 = vld [vmem:[%s8779_s8 + $0x130] sm:$0xf0]  ;;  %v5206_v42 = vor.u32 %v5858_v35, %v5205_v34  ;;  %v5862_v34 = vld [vmem:[%s8779_s8 + $0x34c] sm:$0xf] }
 0x161   :  { %4790 = vmatmul.msk.bf16.vlgmr.msra.gmra.mxu0 %vm1247_vm0, %v1654_v39  ;;  %v5177_v39 = vld [vmem:[%s8779_s8 + $0x2d8] sm:$0xf] }
 0x162   :  { %3203 = vmatpush.bf16.msra.mxu0 %v5234_v33  ;;  %v5011_v33 = vld [vmem:[%s8779_s8 + $0x1a4] sm:$0xf0] }
 0x166   :  { %3204 = vmatpush.bf16.msra.mxu0 %v5206_v42  ;;  %v5816_v42 = vld [vmem:[%s8779_s8 + $0x1d8] sm:$0xf0] }
 0x169   :  { %v1871_v40 = vpop.f32.mrf.mxu3 }
 0x16a   :  { %v1872_v45 = vadd.f32 %v5939_v41, %v1871_v40  ;;  %v5851_v40 = vld [vmem:[%s8779_s8 + $0x2f0] sm:$0xf0] }
 0x171   :  { %v1873_v48 = vpop.f32.mrf.mxu3 }
 0x172   :  { %v1874_v56 = vadd.f32 %v5939_v41, %v1873_v48  ;;  %v5457_v41 = vld [vmem:[%s8779_s8 + $0x508] sm:$0xf] }
 0x17d   :  { %v1885_v43 = vpop.f32.mrf.mxu1 }
 0x17e   :  { %v1886_v46 = vadd.f32 %v1885_v43, %v1872_v45  ;;  %v4954_v43 = vor.u32 %v5795_v38, %v4953_v36  ;;  %v4925_v45 = vld [vmem:[%s8779_s8 + $0xe0] sm:$0xf]  ;;  %v5235_v36 = vld [vmem:[%s8779_s8 + $0x364] sm:$0xf0] }
 0x17f   :  { %v5037_v38 = vld [vmem:[%s8779_s8 + $0x1c0] sm:$0xf] }
 0x180   :  { %3191 = vmatpush.bf16.msra.mxu3 %v4954_v43  ;;  %v5238_v43 = vor.u32 %v5862_v34, %v5235_v36 }
 0x185   :  { %v1887_v53 = vpop.f32.mrf.mxu1 }
 0x186   :  { %v1888_v50 = vadd.f32 %v1887_v53, %v1874_v56  ;;  %v5149_v53 = vld [vmem:[%s8779_s8 + $0x2a0] sm:$0xf]  ;;  %v5844_v56 = vld [vmem:[%s8779_s8 + $0x2b8] sm:$0xf0] }
 0x1bd   :  { %v1899_v44 = vpop.f32.mrf.mxu2 }
 0x1be   :  { %v1900_v47 = vadd.f32 %v1899_v44, %v1886_v46  ;;  %v5921_v44 = vld [vmem:[%s8779_s8 + $0x520] sm:$0xf0]  ;;  %v5788_v46 = vld [vmem:[%s8779_s8 + $0xf8] sm:$0xf0] }
 0x1bf   :  { %v5458_v48 = vor.u32 %v5921_v44, %v5457_v41  ;;  %v5014_v41 = vor.u32 %v5806_v60, %v5011_v33  ;;  %v5799_v44 = vld [vmem:[%s8779_s8 + $0x154] sm:$0xf]  ;;  %v5925_v60 = vld [vmem:[%s8779_s8 + $0x544] sm:$0xf]  ;;  %v5487_v33 = vld [vmem:[%s8779_s8 + $0x55c] sm:$0xf0] }
 0x1c0   :  { %v5490_v34 = vor.u32 %v5925_v60, %v5487_v33  ;;  %v5241_v60 = vld [vmem:[%s8779_s8 + $0x350] sm:$0xf]  ;;  %v5866_v33 = vld [vmem:[%s8779_s8 + $0x368] sm:$0xf0] }
 0x1c1   :  { %3217 = vmatpush.bf16.msrb.mxu1 %v5458_v48  ;;  %v5207_v48 = vld [vmem:[%s8779_s8 + $0x32c] sm:$0xf0] }
 0x1c5   :  { %v1901_v58 = vpop.f32.mrf.mxu2 }
 0x1c6   :  { %v1902_v61 = vadd.f32 %v1901_v58, %v1888_v50  ;;  %v5401_v50 = vld [vmem:[%s8779_s8 + $0x498] sm:$0xf] }
 0x1de   :  { %v1913_v49 = vpop.f32.mrf.mxu0 }
 0x1df   :  { %v7471_v51 = vadd.f32 %v1913_v49, %v1900_v47  ;;  %v5178_v47 = vor.u32 %v5851_v40, %v5177_v39  ;;  %v5429_v49 = vld [vmem:[%s8779_s8 + $0x4d0] sm:$0xf]  ;;  %v4814_v40 = vor.u32 %v5760_v52, %v4813_v32 }
 0x1e0   :  { %v5095_v32 = vld [vmem:[%s8779_s8 + $0x24c] sm:$0xf0] }
 0x1e1   :  { %v1918_v57 = vmul.f32 0.5, %v7471_v51  ;;  %3864 = vst [vmem:[#allocation4] sm:$0xff] %v7471_v51  ;;  %3205 = vmatpush.bf16.msra.mxu0 %v5178_v47  ;;  %v5855_v47 = vld [vmem:[%s8779_s8 + $0x314] sm:$0xf] }
 0x1e3   :  { %v1920_v59 = vmul.f32 1.442695, %v1918_v57  ;;  %v5914_v57 = vld [vmem:[%s8779_s8 + $0x4e8] sm:$0xf0] }
 0x1e4   :  { %v5430_v58 = vor.u32 %v5914_v57, %v5429_v49  ;;  %v5792_v57 = vld [vmem:[%s8779_s8 + $0x11c] sm:$0xf] }
 0x1e5   :  { %5940 = vpow2.f32 %v1920_v59  ;;  %v4926_v59 = vor.u32 %v5788_v46, %v4925_v45  ;;  %v4983_v45 = vld [vmem:[%s8779_s8 + $0x16c] sm:$0xf0]  ;;  %v5038_v46 = vor.u32 %v5816_v42, %v5037_v38  ;;  %v5764_v38 = vld [vmem:[%s8779_s8 + $0x3c] sm:$0xf]  ;;  %v4843_v42 = vld [vmem:[%s8779_s8 + $0x54] sm:$0xf0] }
 0x1e6   :  { %v1915_v62 = vpop.f32.mrf.mxu0  ;;  %3218 = vmatpush.bf16.msrb.mxu1 %v5430_v58  ;;  %v4955_v58 = vld [vmem:[%s8779_s8 + $0x134] sm:$0xf0] }
 0x1e7   :  { %v7475_v63 = vadd.f32 %v1915_v62, %v1902_v61  ;;  %v5907_v61 = vld [vmem:[%s8779_s8 + $0x4b0] sm:$0xf0]  ;;  %v5485_v62 = vld [vmem:[%s8779_s8 + $0x540] sm:$0xf]  ;;  %3192 = vmatpush.bf16.msra.mxu3 %v4926_v59  ;;  %v4958_v59 = vor.u32 %v5792_v57, %v4955_v58  ;;  %v5291_v57 = vld [vmem:[%s8779_s8 + $0x3d4] sm:$0xf0] }
 0x1e8   :  { %v5402_v7 = vor.u32 %v5907_v61, %v5401_v50  ;;  %v5848_v50 = vld [vmem:[%s8779_s8 + $0x2dc] sm:$0xf]  ;;  %v5179_v61 = vld [vmem:[%s8779_s8 + $0x2f4] sm:$0xf0] }
 0x1e9   :  { %v1919_v0 = vmul.f32 0.5, %v7475_v63  ;;  %3865 = vst [vmem:[#allocation4 + $0x8] sm:$0xff] %v7475_v63 }
 0x1ea   :  { %3219 = vmatpush.bf16.msrb.mxu1 %v5402_v7 }
 0x1eb   :  { %v5941_v1 = vpop.eup %5940  ;;  %v1922_v2 = vmul.f32 1.442695, %v1919_v0  ;;  %v5928_v0 = vld [vmem:[%s8779_s8 + $0x558] sm:$0xf0] }
 0x1ec   :  { %1928 = vrot.lane.b32.xlu0 %v5941_v1, %s6052_s5  ;;  %v4897_v1 = vld [vmem:[%s8779_s8 + $0xa8] sm:$0xf]  ;;  %v5486_v4 = vor.u32 %v5928_v0, %v5485_v62  ;;  %v5182_v62 = vor.u32 %v5848_v50, %v5179_v61  ;;  %v5317_v0 = vld [vmem:[%s8779_s8 + $0x3f0] sm:$0xf]  ;;  %v5869_v50 = vld [vmem:[%s8779_s8 + $0x384] sm:$0xf] }
 0x1ed   :  { %5942 = vpow2.f32 %v1922_v2  ;;  %v5781_v2 = vld [vmem:[%s8779_s8 + $0xc0] sm:$0xf0] }
 0x1ee   :  { %3238 = vmatpush.bf16.msrb.mxu2 %v5486_v4  ;;  %v4898_v9 = vor.u32 %v5781_v2, %v4897_v1  ;;  %3220 = vmatpush.bf16.msrb.mxu1 %v5374_v18  ;;  %v5886_v1 = vld [vmem:[%s8779_s8 + $0x408] sm:$0xf0]  ;;  %v5911_v2 = vld [vmem:[%s8779_s8 + $0x4d4] sm:$0xf]  ;;  %v5431_v4 = vld [vmem:[%s8779_s8 + $0x4ec] sm:$0xf0] }
 0x1ef   :  { %v5434_v7 = vor.u32 %v5911_v2, %v5431_v4  ;;  %v5778_v18 = vld [vmem:[%s8779_s8 + $0xac] sm:$0xf] }
 0x1f0   :  { %3193 = vmatpush.bf16.msra.mxu3 %v4898_v9  ;;  %v4930_v9 = vor.u32 %v5785_v5, %v4927_v6  ;;  %v4902_v22 = vor.u32 %v5778_v18, %v4899_v19  ;;  %v5810_v18 = vld [vmem:[%s8779_s8 + $0x1a8] sm:$0xf0] }
 0x1f2   :  { %3221 = vmatpush.bf16.msrb.mxu1 %v5346_v8  ;;  %v5375_v8 = vld [vmem:[%s8779_s8 + $0x47c] sm:$0xf0] }
 0x1f3   :  { %v5943_v3 = vpop.eup %5942 }
 0x1f4   :  { %1930 = vrot.lane.b32.xlu0 %v5943_v3, %s6052_s5  ;;  %v5150_v3 = vor.u32 %v5844_v56, %v5149_v53  ;;  %3194 = vmatpush.bf16.msra.mxu3 %v4870_v55  ;;  %v4986_v53 = vor.u32 %v5799_v44, %v4983_v45  ;;  %v5210_v56 = vor.u32 %v5855_v47, %v5207_v48  ;;  %v5757_v45 = vld [vmem:[%s8779_s8 + $0x4] sm:$0xf] }
 0x1f5   :  { %v5813_v48 = vld [vmem:[%s8779_s8 + $0x1c4] sm:$0xf] }
 0x1f6   :  { %3206 = vmatpush.bf16.msra.mxu0 %v5150_v3  ;;  %v5318_v3 = vor.u32 %v5886_v1, %v5317_v0 }
 0x1f8   :  { %3195 = vmatpush.bf16.msra.mxu3 %v4842_v29  ;;  %3222 = vmatpush.bf16.msrb.mxu1 %v5318_v3  ;;  %v4871_v29 = vld [vmem:[%s8779_s8 + $0x8c] sm:$0xf0] }
 0x1fa   :  { %3207 = vmatpush.bf16.msra.mxu0 %v5122_v15  ;;  %v5904_v15 = vld [vmem:[%s8779_s8 + $0x49c] sm:$0xf] }
 0x1fb   :  { %v5406_v55 = vor.u32 %v5904_v15, %v5403_v17  ;;  %v5017_v17 = vld [vmem:[%s8779_s8 + $0x190] sm:$0xf] }
 0x1fc   :  { %3196 = vmatpush.bf16.msra.mxu3 %v4814_v40  ;;  %3223 = vmatpush.bf16.msrb.mxu1 %v5290_v16 }
 0x1fe   :  { %3208 = vmatpush.bf16.msra.mxu0 %v5094_v24  ;;  %v5261_v24 = vld [vmem:[%s8779_s8 + $0x380] sm:$0xf] }
 0x202   :  { %3209 = vmatpush.bf16.msra.mxu0 %v5066_v54 }
 0x206   :  { %3210 = vmatpush.bf16.msra.mxu0 %v5038_v46  ;;  %v4815_v46 = vld [vmem:[%s8779_s8 + $0x1c] sm:$0xf0] }
 0x207   :  { %v4818_v47 = vor.u32 %v5757_v45, %v4815_v46  ;;  %v5213_v45 = vld [vmem:[%s8779_s8 + $0x318] sm:$0xf]  ;;  %v5859_v46 = vld [vmem:[%s8779_s8 + $0x330] sm:$0xf0] }
 0x25e   :  { %v1929_v12 = vpop.permute.xlu0 %1928 }
 0x25f   :  { %v1934_v28 = vmul.f32 %v1929_v12, %v1924_v21  ;;  %v5154_v12 = vor.u32 %v5841_v10, %v5151_v11  ;;  %v5123_v21 = vld [vmem:[%s8779_s8 + $0x284] sm:$0xf0] }
 0x260   :  { %v5126_v23 = vor.u32 %v5834_v20, %v5123_v21 }
 0x261   :  { %v1936_v37 = vadd.f32 %v1934_v28, %v7471_v51  ;;  %v5918_v51 = vld [vmem:[%s8779_s8 + $0x50c] sm:$0xf]  ;;  %v5771_v28 = vld [vmem:[%s8779_s8 + $0x74] sm:$0xf] }
 0x262   :  { %v4874_v54 = vor.u32 %v5771_v28, %v4871_v29  ;;  %v4989_v28 = vld [vmem:[%s8779_s8 + $0x158] sm:$0xf]  ;;  %v5803_v29 = vld [vmem:[%s8779_s8 + $0x170] sm:$0xf0] }
 0x266   :  { %v1931_v30 = vpop.permute.xlu0 %1930 }
 0x267   :  { %v1935_v31 = vmul.f32 %v1931_v30, %v1925_v27  ;;  %v5262_v27 = vor.u32 %v5872_v25, %v5261_v24  ;;  %v5378_v30 = vor.u32 %v5897_v26, %v5375_v8  ;;  %v5018_v25 = vor.u32 %v5810_v18, %v5017_v17  ;;  %v5353_v18 = vld [vmem:[%s8779_s8 + $0x430] sm:$0xf] }
 0x269   :  { %v1937_v35 = vadd.f32 %v1935_v31, %v7475_v63  ;;  %v5459_v63 = vld [vmem:[%s8779_s8 + $0x524] sm:$0xf0]  ;;  %v5827_v31 = vld [vmem:[%s8779_s8 + $0x234] sm:$0xf]  ;;  %3224 = vmatpush.bf16.msrb.mxu1 %v5262_v27 }
 0x26a   :  { %v5462_v49 = vor.u32 %v5918_v51, %v5459_v63  ;;  %v5098_v52 = vor.u32 %v5827_v31, %v5095_v32  ;;  %v5820_v51 = vld [vmem:[%s8779_s8 + $0x1fc] sm:$0xf]  ;;  %v4846_v63 = vor.u32 %v5764_v38, %v4843_v42  ;;  %v5465_v31 = vld [vmem:[%s8779_s8 + $0x510] sm:$0xf]  ;;  %v5922_v32 = vld [vmem:[%s8779_s8 + $0x528] sm:$0xf0] }
 0x26b   :  { %v1938_v39 = vpack.c.bf16 %v1937_v35, %v1936_v37  ;;  %v5890_v37 = vld [vmem:[%s8779_s8 + $0x42c] sm:$0xf]  ;;  %v5347_v35 = vld [vmem:[%s8779_s8 + $0x444] sm:$0xf0]  ;;  %v5466_v42 = vor.u32 %v5922_v32, %v5465_v31  ;;  %v5101_v32 = vld [vmem:[%s8779_s8 + $0x238] sm:$0xf] }
 0x26c   :  { %v5350_v36 = vor.u32 %v5890_v37, %v5347_v35  ;;  %v4990_v35 = vor.u32 %v5803_v29, %v4989_v28  ;;  %v5768_v28 = vld [vmem:[%s8779_s8 + $0x58] sm:$0xf0] }
 0x26d   :  { %4807 = vmatmul.msk.bf16.vlgmr.msrb.gmra.mxu3 %vm1985_vm2, %v1938_v39  ;;  %4808 = vmatmul.msk.bf16.vlgmr.msrb.gmra.mxu0 %vm1985_vm2, %v1938_v39 }
 0x26e   :  { %4809 = vmatmul.msk.bf16.vlgmr.msra.gmra.mxu1 %vm1985_vm2, %v1938_v39  ;;  %4810 = vmatmul.msk.bf16.vlgmr.msra.gmra.mxu2 %vm1985_vm2, %v1938_v39  ;;  %v5067_v39 = vld [vmem:[%s8779_s8 + $0x214] sm:$0xf0] }
 0x26f   :  { %3245 = vmatpush.bf16.msra.mxu2 %v5014_v41  ;;  %3259 = vmatpush.bf16.msrb.mxu3 %v5238_v43  ;;  %v5070_v40 = vor.u32 %v5820_v51, %v5067_v39  ;;  %v5883_v41 = vld [vmem:[%s8779_s8 + $0x3f4] sm:$0xf]  ;;  %v5319_v43 = vld [vmem:[%s8779_s8 + $0x40c] sm:$0xf0]  ;;  %v4961_v51 = vld [vmem:[%s8779_s8 + $0x120] sm:$0xf] }
 0x270   :  { %3273 = vmatpush.bf16.msrb.mxu0 %v5462_v49  ;;  %3294 = vmatpush.bf16.msra.mxu1 %v5490_v34  ;;  %v5322_v44 = vor.u32 %v5883_v41, %v5319_v43  ;;  %v5039_v49 = vld [vmem:[%s8779_s8 + $0x1dc] sm:$0xf0]  ;;  %v5437_v41 = vld [vmem:[%s8779_s8 + $0x4d8] sm:$0xf]  ;;  %v5915_v43 = vld [vmem:[%s8779_s8 + $0x4f0] sm:$0xf0] }
 0x273   :  { %3246 = vmatpush.bf16.msra.mxu2 %v4986_v53  ;;  %3260 = vmatpush.bf16.msrb.mxu3 %v5210_v56  ;;  %v5042_v53 = vor.u32 %v5813_v48, %v5039_v49  ;;  %v5876_v56 = vld [vmem:[%s8779_s8 + $0x3bc] sm:$0xf]  ;;  %v5438_v48 = vor.u32 %v5915_v43, %v5437_v41  ;;  %v4933_v49 = vld [vmem:[%s8779_s8 + $0xe8] sm:$0xf]  ;;  %v5073_v43 = vld [vmem:[%s8779_s8 + $0x200] sm:$0xf] }
 0x274   :  { %3274 = vmatpush.bf16.msrb.mxu0 %v5434_v7  ;;  %v5294_v58 = vor.u32 %v5876_v56, %v5291_v57  ;;  %v5214_v56 = vor.u32 %v5859_v46, %v5213_v45  ;;  %v5409_v57 = vld [vmem:[%s8779_s8 + $0x4a0] sm:$0xf]  ;;  %v5824_v45 = vld [vmem:[%s8779_s8 + $0x218] sm:$0xf0] }
 0x277   :  { %3247 = vmatpush.bf16.msra.mxu2 %v4958_v59  ;;  %3261 = vmatpush.bf16.msrb.mxu3 %v5182_v62  ;;  %v5263_v59 = vld [vmem:[%s8779_s8 + $0x39c] sm:$0xf0] }
 0x278   :  { %3275 = vmatpush.bf16.msrb.mxu0 %v5406_v55  ;;  %v5266_v61 = vor.u32 %v5869_v50, %v5263_v59  ;;  %v1945_v62 = vld [vmem:[%s8778_s7] sm:$0xf]  ;;  %v5852_v59 = vld [vmem:[%s8779_s8 + $0x2f8] sm:$0xf0] }
 0x279   :  { %v1948_v2 = vperm.slane %v1945_v62, 1  ;;  %v1949_v3 = vperm.slane %v1945_v62, 2  ;;  %v1947_v10 = vperm.slane %v1945_v62, 0  ;;  %v1950_v15 = vperm.slane %v1945_v62, 3  ;;  %v5185_v50 = vld [vmem:[%s8779_s8 + $0x2e0] sm:$0xf] }
 0x27a   :  { %v5807_v62 = vld [vmem:[%s8779_s8 + $0x194] sm:$0xf] }
 0x27b   :  { %3248 = vmatpush.bf16.msra.mxu2 %v4930_v9  ;;  %3262 = vmatpush.bf16.msrb.mxu3 %v5154_v12 }
 0x27c   :  { %3276 = vmatpush.bf16.msrb.mxu0 %v5378_v30 }
 0x27f   :  { %3249 = vmatpush.bf16.msra.mxu2 %v4902_v22  ;;  %3263 = vmatpush.bf16.msrb.mxu3 %v5126_v23  ;;  %v5494_v22 = vor.u32 %v5929_v14, %v5493_v13  ;;  %v4991_v13 = vld [vmem:[%s8779_s8 + $0x174] sm:$0xf0] }
 0x280   :  { %3277 = vmatpush.bf16.msrb.mxu0 %v5350_v36 }
 0x283   :  { %3250 = vmatpush.bf16.msra.mxu2 %v4874_v54  ;;  %3264 = vmatpush.bf16.msrb.mxu3 %v5098_v52 }
 0x284   :  { %3278 = vmatpush.bf16.msrb.mxu0 %v5322_v44 }
 0x287   :  { %3251 = vmatpush.bf16.msra.mxu2 %v4846_v63  ;;  %3265 = vmatpush.bf16.msrb.mxu3 %v5070_v40  ;;  %v5796_v63 = vld [vmem:[%s8779_s8 + $0x138] sm:$0xf0]  ;;  %v5242_v40 = vor.u32 %v5866_v33, %v5241_v60  ;;  %v5786_v33 = vld [vmem:[%s8779_s8 + $0xec] sm:$0xf] }
 0x288   :  { %3279 = vmatpush.bf16.msrb.mxu0 %v5294_v58  ;;  %v5908_v58 = vld [vmem:[%s8779_s8 + $0x4b8] sm:$0xf0] }
 0x28b   :  { %3252 = vmatpush.bf16.msra.mxu2 %v4818_v47  ;;  %3266 = vmatpush.bf16.msrb.mxu3 %v5042_v53  ;;  %v4962_v47 = vor.u32 %v5796_v63, %v4961_v51  ;;  %v5789_v53 = vld [vmem:[%s8779_s8 + $0x100] sm:$0xf0]  ;;  %v5243_v51 = vld [vmem:[%s8779_s8 + $0x36c] sm:$0xf0]  ;;  %v5297_v63 = vld [vmem:[%s8779_s8 + $0x3c0] sm:$0xf] }
 0x28c   :  { %3280 = vmatpush.bf16.msrb.mxu0 %v5266_v61  ;;  %v4934_v61 = vor.u32 %v5789_v53, %v4933_v49 }
 0x2ea   :  { %v2025_v0 = vpop.f32.mrf.mxu0 }
 0x2eb   :  { %v2039_v1 = vpop.f32.mrf.mxu1  ;;  %v2026_v5 = vadd.f32 %v2025_v0, %v1948_v2  ;;  %v5019_v0 = vld [vmem:[%s8779_s8 + $0x1ac] sm:$0xf0] }
 0x2ec   :  { %v2040_v7 = vadd.f32 %v2039_v1, %v1949_v3  ;;  %v5410_v1 = vor.u32 %v5908_v58, %v5409_v57  ;;  %v5215_v57 = vld [vmem:[%s8779_s8 + $0x334] sm:$0xf0]  ;;  %v5045_v58 = vld [vmem:[%s8779_s8 + $0x1c8] sm:$0xf] }
 0x2ed   :  { %v2059_v55 = vmax.f32 %v2026_v5, 0.0  ;;  %v5381_v5 = vld [vmem:[%s8779_s8 + $0x468] sm:$0xf] }
 0x2ee   :  { %v2060_v20 = vmax.f32 %v2040_v7, 0.0  ;;  %v5022_v7 = vor.u32 %v5807_v62, %v5019_v0  ;;  %v5873_v62 = vld [vmem:[%s8779_s8 + $0x3a0] sm:$0xf0] }
 0x2f0   :  { %v2011_v4 = vpop.f32.mrf.mxu3 }
 0x2f1   :  { %v2053_v6 = vpop.f32.mrf.mxu2  ;;  %v2012_v23 = vadd.f32 %v2011_v4, %v1947_v10  ;;  %v5186_v4 = vor.u32 %v5852_v59, %v5185_v50  ;;  %v5074_v50 = vor.u32 %v5824_v45, %v5073_v43  ;;  %v5817_v59 = vld [vmem:[%s8779_s8 + $0x1e0] sm:$0xf0]  ;;  %v5221_v45 = vld [vmem:[%s8779_s8 + $0x320] sm:$0xf] }
 0x2f2   :  { %v2027_v9 = vpop.f32.mrf.mxu0  ;;  %v2054_v26 = vadd.f32 %v2053_v6, %v1950_v15  ;;  %v5901_v6 = vld [vmem:[%s8779_s8 + $0x480] sm:$0xf0] }
 0x2f3   :  { %v2028_v11 = vadd.f32 %v2027_v9, %v1948_v2  ;;  %v2041_v12 = vpop.f32.mrf.mxu1  ;;  %v2058_v34 = vmax.f32 %v2012_v23, 0.0  ;;  %v4905_v2 = vld [vmem:[%s8779_s8 + $0xb0] sm:$0xf]  ;;  %v5157_v9 = vld [vmem:[%s8779_s8 + $0x2a8] sm:$0xf]  ;;  %v5382_v14 = vor.u32 %v5901_v6, %v5381_v5 }
 0x2f4   :  { %v2042_v16 = vadd.f32 %v2041_v12, %v1949_v3  ;;  %v2061_v36 = vmax.f32 %v2054_v26, 0.0  ;;  %v5782_v3 = vld [vmem:[%s8779_s8 + $0xc8] sm:$0xf0]  ;;  %v5800_v12 = vld [vmem:[%s8779_s8 + $0x15c] sm:$0xf] }
 0x2f5   :  { %v2063_v19 = vmax.f32 %v2028_v11, 0.0  ;;  %v4906_v11 = vor.u32 %v5782_v3, %v4905_v2  ;;  %v5793_v23 = vld [vmem:[%s8779_s8 + $0x124] sm:$0xf]  ;;  %v5926_v2 = vld [vmem:[%s8779_s8 + $0x54c] sm:$0xf] }
 0x2f6   :  { %v2064_v21 = vmax.f32 %v2042_v16, 0.0  ;;  %v5775_v16 = vld [vmem:[%s8779_s8 + $0x90] sm:$0xf0]  ;;  %v5495_v3 = vld [vmem:[%s8779_s8 + $0x564] sm:$0xf0] }
 0x2f7   :  { %v7836_v24 = vpack.c.bf16 %v2063_v19, %v2059_v55  ;;  %v5894_v55 = vld [vmem:[%s8779_s8 + $0x448] sm:$0xf0]  ;;  %v4994_v19 = vor.u32 %v5800_v12, %v4991_v13  ;;  %v5772_v5 = vld [vmem:[%s8779_s8 + $0x7c] sm:$0xf]  ;;  %v4879_v6 = vld [vmem:[%s8779_s8 + $0x94] sm:$0xf0]  ;;  %v5498_v13 = vor.u32 %v5926_v2, %v5495_v3 }
 0x2f8   :  { %v7838_v27 = vpack.c.bf16 %v2064_v21, %v2060_v20  ;;  %v2013_v8 = vpop.f32.mrf.mxu3  ;;  %v5129_v20 = vld [vmem:[%s8779_s8 + $0x270] sm:$0xf]  ;;  %v5838_v21 = vld [vmem:[%s8779_s8 + $0x288] sm:$0xf0]  ;;  %v5354_v26 = vor.u32 %v5894_v55, %v5353_v18  ;;  %v5187_v12 = vld [vmem:[%s8779_s8 + $0x2fc] sm:$0xf0] }
 0x2f9   :  { %v2014_v30 = vadd.f32 %v2013_v8, %v1947_v10  ;;  %v2055_v54 = vpop.f32.mrf.mxu2  ;;  %3211 = vmatmul.bf16.vlgmr.msra.gmra.mxu0 %v7836_v24  ;;  %v5845_v10 = vld [vmem:[%s8779_s8 + $0x2c0] sm:$0xf0]  ;;  %v4849_v8 = vld [vmem:[%s8779_s8 + $0x40] sm:$0xf]  ;;  %v5130_v29 = vor.u32 %v5838_v21, %v5129_v20  ;;  %v5912_v18 = vld [vmem:[%s8779_s8 + $0x4dc] sm:$0xf] }
 0x2fa   :  { %v2056_v52 = vadd.f32 %v2055_v54, %v1950_v15  ;;  %3225 = vmatmul.bf16.vlgmr.msrb.gmra.mxu1 %v7838_v27  ;;  %3350 = vmatpush.bf16.msra.mxu0 %v5494_v22  ;;  %v4877_v15 = vld [vmem:[%s8779_s8 + $0x78] sm:$0xf]  ;;  %v5158_v17 = vor.u32 %v5845_v10, %v5157_v9  ;;  %v5887_v54 = vld [vmem:[%s8779_s8 + $0x410] sm:$0xf0]  ;;  %v4850_v60 = vor.u32 %v5768_v28, %v4849_v8  ;;  %v4851_v20 = vld [vmem:[%s8779_s8 + $0x5c] sm:$0xf0] }
 0x2fb   :  { %v2062_v37 = vmax.f32 %v2014_v30, 0.0  ;;  %3301 = vmatpush.bf16.msrb.mxu1 %v5018_v25  ;;  %v4878_v22 = vor.u32 %v5775_v16, %v4877_v15  ;;  %v4963_v25 = vld [vmem:[%s8779_s8 + $0x13c] sm:$0xf0]  ;;  %v5325_v30 = vld [vmem:[%s8779_s8 + $0x3f8] sm:$0xf]  ;;  %v5046_v10 = vor.u32 %v5817_v59, %v5045_v58  ;;  %v4882_v15 = vor.u32 %v5772_v5, %v4879_v6 }
 0x2fc   :  { %v2065_v38 = vmax.f32 %v2056_v52, 0.0  ;;  %v4966_v31 = vor.u32 %v5793_v23, %v4963_v25  ;;  %v5831_v52 = vld [vmem:[%s8779_s8 + $0x250] sm:$0xf0]  ;;  %v5025_v16 = vld [vmem:[%s8779_s8 + $0x198] sm:$0xf] }
 0x2fd   :  { %v7866_v39 = vpack.c.bf16 %v2062_v37, %v2058_v34  ;;  %v4935_v34 = vld [vmem:[%s8779_s8 + $0x104] sm:$0xf0]  ;;  %v5326_v37 = vor.u32 %v5887_v54, %v5325_v30  ;;  %v5439_v55 = vld [vmem:[%s8779_s8 + $0x4f4] sm:$0xf0]  ;;  %v5842_v23 = vld [vmem:[%s8779_s8 + $0x2ac] sm:$0xf] }
 0x2fe   :  { %v7874_v44 = vpack.c.bf16 %v2065_v38, %v2061_v36  ;;  %v5761_v36 = vld [vmem:[%s8779_s8 + $0x20] sm:$0xf0]  ;;  %v5863_v38 = vld [vmem:[%s8779_s8 + $0x354] sm:$0xf]  ;;  %v4938_v41 = vor.u32 %v5786_v33, %v4935_v34  ;;  %v5159_v25 = vld [vmem:[%s8779_s8 + $0x2c4] sm:$0xf0] }
 0x2ff   :  { %3302 = vmatpush.bf16.msrb.mxu1 %v4990_v35  ;;  %3197 = vmatmul.bf16.vlgmr.msra.gmra.mxu3 %v7866_v39  ;;  %v4821_v35 = vld [vmem:[%s8779_s8 + $0x8] sm:$0xf]  ;;  %v5246_v49 = vor.u32 %v5863_v38, %v5243_v51  ;;  %v4997_v28 = vld [vmem:[%s8779_s8 + $0x160] sm:$0xf]  ;;  %v5905_v30 = vld [vmem:[%s8779_s8 + $0x4a4] sm:$0xf] }
 0x300   :  { %5511 = vmatmul.msk.bf16.vlgmr.msrb.gmra.mxu2 %vm1247_vm0, %v7874_v44  ;;  %3329 = vmatpush.bf16.msra.mxu3 %v5466_v42  ;;  %v5102_v42 = vor.u32 %v5831_v52, %v5101_v32  ;;  %v4822_v46 = vor.u32 %v5761_v36, %v4821_v35  ;;  %v5411_v54 = vld [vmem:[%s8779_s8 + $0x4bc] sm:$0xf0]  ;;  %v4823_v32 = vld [vmem:[%s8779_s8 + $0x24] sm:$0xf0]  ;;  %v5162_v52 = vor.u32 %v5842_v23, %v5159_v25  ;;  %v5867_v33 = vld [vmem:[%s8779_s8 + $0x370] sm:$0xf0] }
 0x301   :  { %3315 = vmatpush.bf16.msrb.mxu2 %v5242_v40  ;;  %v5880_v40 = vld [vmem:[%s8779_s8 + $0x3d8] sm:$0xf0]  ;;  %v5131_v35 = vld [vmem:[%s8779_s8 + $0x28c] sm:$0xf0]  ;;  %v5414_v36 = vor.u32 %v5905_v30, %v5411_v54  ;;  %v5797_v51 = vld [vmem:[%s8779_s8 + $0x140] sm:$0xf0] }
 0x302   :  { %v5298_v53 = vor.u32 %v5880_v40, %v5297_v63  ;;  %v5898_v40 = vld [vmem:[%s8779_s8 + $0x46c] sm:$0xf]  ;;  %v5355_v59 = vld [vmem:[%s8779_s8 + $0x44c] sm:$0xf0]  ;;  %v5821_v2 = vld [vmem:[%s8779_s8 + $0x204] sm:$0xf] }
 0x303   :  { %3303 = vmatpush.bf16.msrb.mxu1 %v4962_v47  ;;  %v5779_v47 = vld [vmem:[%s8779_s8 + $0xb4] sm:$0xf]  ;;  %v5075_v3 = vld [vmem:[%s8779_s8 + $0x21c] sm:$0xf0]  ;;  %v4913_v5 = vld [vmem:[%s8779_s8 + $0xb8] sm:$0xf] }
 0x304   :  { %3330 = vmatpush.bf16.msra.mxu3 %v5438_v48  ;;  %v4907_v48 = vld [vmem:[%s8779_s8 + $0xcc] sm:$0xf0]  ;;  %v5783_v6 = vld [vmem:[%s8779_s8 + $0xd0] sm:$0xf0]  ;;  %v5299_v23 = vld [vmem:[%s8779_s8 + $0x3dc] sm:$0xf0] }
 0x305   :  { %3316 = vmatpush.bf16.msrb.mxu2 %v5214_v56  ;;  %v5856_v56 = vld [vmem:[%s8779_s8 + $0x31c] sm:$0xf]  ;;  %v4910_v0 = vor.u32 %v5779_v47, %v4907_v48  ;;  %v4857_v30 = vld [vmem:[%s8779_s8 + $0x48] sm:$0xf] }
 0x306   :  { %v5828_v48 = vld [vmem:[%s8779_s8 + $0x23c] sm:$0xf] }
 0x307   :  { %3304 = vmatpush.bf16.msrb.mxu1 %v4934_v61  ;;  %v5269_v61 = vld [vmem:[%s8779_s8 + $0x388] sm:$0xf] }
 0x308   :  { %3331 = vmatpush.bf16.msra.mxu3 %v5410_v1  ;;  %v5919_v1 = vld [vmem:[%s8779_s8 + $0x514] sm:$0xf]  ;;  %v5270_v9 = vor.u32 %v5873_v62, %v5269_v61  ;;  %v5193_v62 = vld [vmem:[%s8779_s8 + $0x2e8] sm:$0xf] }
 0x309   :  { %3317 = vmatpush.bf16.msrb.mxu2 %v5186_v4  ;;  %3281 = vmatmul.bf16.vlgmr.msrb.gmra.mxu0 %v7838_v27  ;;  %v5467_v4 = vld [vmem:[%s8779_s8 + $0x52c] sm:$0xf0] }
 0x30a   :  { %5512 = vmatmul.msk.bf16.vlgmr.msra.gmra.mxu1 %vm1247_vm0, %v7874_v44  ;;  %3357 = vmatpush.bf16.msrb.mxu0 %v5022_v7  ;;  %v5218_v7 = vor.u32 %v5856_v56, %v5215_v57  ;;  %v4941_v56 = vld [vmem:[%s8779_s8 + $0xf0] sm:$0xf]  ;;  %v5790_v57 = vld [vmem:[%s8779_s8 + $0x108] sm:$0xf0] }
 0x30b   :  { %3305 = vmatpush.bf16.msrb.mxu1 %v4906_v11  ;;  %v5849_v11 = vld [vmem:[%s8779_s8 + $0x2e4] sm:$0xf] }
 0x30c   :  { %3332 = vmatpush.bf16.msra.mxu3 %v5382_v14  ;;  %v5470_v14 = vor.u32 %v5919_v1, %v5467_v4  ;;  %v5190_v21 = vor.u32 %v5849_v11, %v5187_v12  ;;  %v4942_v1 = vor.u32 %v5790_v57, %v4941_v56  ;;  %v5078_v11 = vor.u32 %v5821_v2, %v5075_v3  ;;  %v5165_v12 = vld [vmem:[%s8779_s8 + $0x2b0] sm:$0xf]  ;;  %v5251_v56 = vld [vmem:[%s8779_s8 + $0x374] sm:$0xf0]  ;;  %v5081_v57 = vld [vmem:[%s8779_s8 + $0x208] sm:$0xf] }
 0x30d   :  { %3318 = vmatpush.bf16.msrb.mxu2 %v5158_v17  ;;  %v5811_v17 = vld [vmem:[%s8779_s8 + $0x1b0] sm:$0xf0]  ;;  %v5801_v3 = vld [vmem:[%s8779_s8 + $0x164] sm:$0xf] }
 0x30e   :  { %3358 = vmatpush.bf16.msrb.mxu0 %v4994_v19  ;;  %v5765_v19 = vld [vmem:[%s8779_s8 + $0x44] sm:$0xf] }
 0x30f   :  { %3306 = vmatpush.bf16.msrb.mxu1 %v4878_v22  ;;  %3267 = vmatmul.bf16.vlgmr.msrb.gmra.mxu3 %v7836_v24  ;;  %v5026_v22 = vor.u32 %v5811_v17, %v5025_v16  ;;  %v4854_v8 = vor.u32 %v5765_v19, %v4851_v20  ;;  %v5047_v16 = vld [vmem:[%s8779_s8 + $0x1e4] sm:$0xf0]  ;;  %v4885_v17 = vld [vmem:[%s8779_s8 + $0x80] sm:$0xf]  ;;  %v5473_v19 = vld [vmem:[%s8779_s8 + $0x518] sm:$0xf] }
 0x310   :  { %3253 = vmatmul.bf16.vlgmr.msra.gmra.mxu2 %v7866_v39  ;;  %3333 = vmatpush.bf16.msra.mxu3 %v5354_v26  ;;  %v5442_v26 = vor.u32 %v5912_v18, %v5439_v55  ;;  %v5776_v55 = vld [vmem:[%s8779_s8 + $0x98] sm:$0xf0]  ;;  %v5923_v20 = vld [vmem:[%s8779_s8 + $0x530] sm:$0xf0] }
 0x311   :  { %3319 = vmatpush.bf16.msrb.mxu2 %v5130_v29  ;;  %v5804_v29 = vld [vmem:[%s8779_s8 + $0x178] sm:$0xf0] }
 0x312   :  { %3359 = vmatpush.bf16.msrb.mxu0 %v4966_v31  ;;  %v5758_v31 = vld [vmem:[%s8779_s8 + $0xc] sm:$0xf]  ;;  %v4998_v34 = vor.u32 %v5804_v29, %v4997_v28  ;;  %v4886_v28 = vor.u32 %v5776_v55, %v4885_v17  ;;  %v5474_v29 = vor.u32 %v5923_v20, %v5473_v19  ;;  %v5895_v17 = vld [vmem:[%s8779_s8 + $0x450] sm:$0xf0]  ;;  %v4971_v55 = vld [vmem:[%s8779_s8 + $0x144] sm:$0xf0] }
 0x313   :  { %3307 = vmatpush.bf16.msrb.mxu1 %v4850_v60  ;;  %v5249_v60 = vld [vmem:[%s8779_s8 + $0x358] sm:$0xf]  ;;  %v4826_v38 = vor.u32 %v5758_v31, %v4823_v32  ;;  %v5769_v31 = vld [vmem:[%s8779_s8 + $0x60] sm:$0xf0]  ;;  %v5445_v32 = vld [vmem:[%s8779_s8 + $0x4e0] sm:$0xf] }
 0x314   :  { %3334 = vmatpush.bf16.msra.mxu3 %v5326_v37  ;;  %v5835_v37 = vld [vmem:[%s8779_s8 + $0x274] sm:$0xf]  ;;  %v5250_v63 = vor.u32 %v5867_v33, %v5249_v60  ;;  %v5870_v33 = vld [vmem:[%s8779_s8 + $0x38c] sm:$0xf] }
 0x315   :  { %3320 = vmatpush.bf16.msrb.mxu2 %v5102_v42  ;;  %v4969_v42 = vld [vmem:[%s8779_s8 + $0x128] sm:$0xf]  ;;  %v5134_v43 = vor.u32 %v5835_v37, %v5131_v35  ;;  %v5109_v37 = vld [vmem:[%s8779_s8 + $0x240] sm:$0xf]  ;;  %v5832_v35 = vld [vmem:[%s8779_s8 + $0x258] sm:$0xf0] }
 0x316   :  { %3360 = vmatpush.bf16.msrb.mxu0 %v4938_v41  ;;  %v5383_v41 = vld [vmem:[%s8779_s8 + $0x484] sm:$0xf0]  ;;  %v4970_v47 = vor.u32 %v5797_v51, %v4969_v42  ;;  %v4858_v42 = vor.u32 %v5769_v31, %v4857_v30  ;;  %v5850_v20 = vld [vmem:[%s8779_s8 + $0x2ec] sm:$0xf]  ;;  %v5787_v30 = vld [vmem:[%s8779_s8 + $0xf4] sm:$0xf] }
 0x317   :  { %3308 = vmatpush.bf16.msrb.mxu1 %v4822_v46  ;;  %v5860_v46 = vld [vmem:[%s8779_s8 + $0x338] sm:$0xf0] }
 0x318   :  { %3335 = vmatpush.bf16.msra.mxu3 %v5298_v53  ;;  %v5386_v53 = vor.u32 %v5898_v40, %v5383_v41  ;;  %v5222_v58 = vor.u32 %v5860_v46, %v5221_v45  ;;  %v5762_v41 = vld [vmem:[%s8779_s8 + $0x28] sm:$0xf0]  ;;  %v5909_v45 = vld [vmem:[%s8779_s8 + $0x4c0] sm:$0xf0]  ;;  %v5110_v46 = vor.u32 %v5832_v35, %v5109_v37  ;;  %v5305_v35 = vld [vmem:[%s8779_s8 + $0x3c8] sm:$0xf] }
 0x319   :  { %3321 = vmatpush.bf16.msrb.mxu2 %v5074_v50  ;;  %5513 = vmatmul.msk.bf16.vlgmr.msra.gmra.mxu0 %vm1247_vm0, %v7874_v44  ;;  %v5891_v50 = vld [vmem:[%s8779_s8 + $0x434] sm:$0xf] }
 0x31a   :  { %3309 = vmatmul.bf16.vlgmr.msrb.gmra.mxu1 %v7866_v39  ;;  %3361 = vmatpush.bf16.msrb.mxu0 %v4910_v0  ;;  %v5853_v0 = vld [vmem:[%s8779_s8 + $0x300] sm:$0xf0]  ;;  %v5358_v4 = vor.u32 %v5891_v50, %v5355_v59 }
 0x31b   :  { %3371 = vmatpush.bf16.msra.mxu1 %v5246_v49  ;;  %v5103_v49 = vld [vmem:[%s8779_s8 + $0x254] sm:$0xf0] }
 0x31c   :  { %3336 = vmatpush.bf16.msra.mxu3 %v5270_v9  ;;  %v5106_v61 = vor.u32 %v5828_v48, %v5103_v49  ;;  %v5884_v9 = vld [vmem:[%s8779_s8 + $0x3fc] sm:$0xf]  ;;  %v5027_v49 = vld [vmem:[%s8779_s8 + $0x1b4] sm:$0xf0] }
 0x31d   :  { %3322 = vmatpush.bf16.msrb.mxu2 %v5046_v10  ;;  %v5327_v10 = vld [vmem:[%s8779_s8 + $0x414] sm:$0xf0]  ;;  %v5808_v48 = vld [vmem:[%s8779_s8 + $0x19c] sm:$0xf] }
 0x31e   :  { %3362 = vmatpush.bf16.msrb.mxu0 %v4882_v15  ;;  %v5814_v15 = vld [vmem:[%s8779_s8 + $0x1cc] sm:$0xf]  ;;  %v5330_v18 = vor.u32 %v5884_v9, %v5327_v10  ;;  %v5920_v10 = vld [vmem:[%s8779_s8 + $0x51c] sm:$0xf] }
 0x31f   :  { %3372 = vmatpush.bf16.msra.mxu1 %v5218_v7  ;;  %3337 = vmatmul.bf16.vlgmr.msra.gmra.mxu3 %v7838_v27  ;;  %v5194_v7 = vor.u32 %v5853_v0, %v5193_v62  ;;  %v5050_v25 = vor.u32 %v5814_v15, %v5047_v16  ;;  %v5389_v62 = vld [vmem:[%s8779_s8 + $0x470] sm:$0xf]  ;;  %v5902_v0 = vld [vmem:[%s8779_s8 + $0x488] sm:$0xf0] }
 0x320   :  { %3406 = vmatpush.bf16.msrb.mxu3 %v5498_v13  ;;  %3323 = vmatmul.bf16.vlgmr.msrb.gmra.mxu2 %v7836_v24  ;;  %v5846_v13 = vld [vmem:[%s8779_s8 + $0x2c8] sm:$0xf0] }
 0x321   :  { %3385 = vmatpush.bf16.msra.mxu2 %v5470_v14  ;;  %v4914_v14 = vor.u32 %v5783_v6, %v4913_v5  ;;  %v5857_v5 = vld [vmem:[%s8779_s8 + $0x324] sm:$0xf]  ;;  %v5223_v6 = vld [vmem:[%s8779_s8 + $0x33c] sm:$0xf0]  ;;  %v5818_v9 = vld [vmem:[%s8779_s8 + $0x1e8] sm:$0xf0] }
 0x322   :  { %3363 = vmatpush.bf16.msrb.mxu0 %v4854_v8  ;;  %v5839_v8 = vld [vmem:[%s8779_s8 + $0x290] sm:$0xf0]  ;;  %v5226_v15 = vor.u32 %v5857_v5, %v5223_v6 }
 0x323   :  { %3373 = vmatpush.bf16.msra.mxu1 %v5190_v21  ;;  %v5166_v21 = vor.u32 %v5846_v13, %v5165_v12  ;;  %v5390_v12 = vor.u32 %v5902_v0, %v5389_v62  ;;  %v5503_v62 = vld [vmem:[%s8779_s8 + $0x56c] sm:$0xf0]  ;;  %v5892_v0 = vld [vmem:[%s8779_s8 + $0x43c] sm:$0xf] }
 0x324   :  { %3413 = vmatpush.bf16.msra.mxu3 %v5026_v22  ;;  %v5877_v22 = vld [vmem:[%s8779_s8 + $0x3c4] sm:$0xf] }
 0x325   :  { %3386 = vmatpush.bf16.msra.mxu2 %v5442_v26  ;;  %v5137_v26 = vld [vmem:[%s8779_s8 + $0x278] sm:$0xf]  ;;  %v5302_v54 = vor.u32 %v5877_v22, %v5299_v23  ;;  %v5913_v22 = vld [vmem:[%s8779_s8 + $0x4e4] sm:$0xf]  ;;  %v5447_v23 = vld [vmem:[%s8779_s8 + $0x4fc] sm:$0xf0] }
 0x326   :  { %3364 = vmatpush.bf16.msrb.mxu0 %v4826_v38  ;;  %v5138_v60 = vor.u32 %v5839_v8, %v5137_v26  ;;  %v5930_v38 = vld [vmem:[%s8779_s8 + $0x568] sm:$0xf0]  ;;  %v5333_v8 = vld [vmem:[%s8779_s8 + $0x400] sm:$0xf]  ;;  %v5450_v31 = vor.u32 %v5913_v22, %v5447_v23  ;;  %v5815_v22 = vld [vmem:[%s8779_s8 + $0x1d4] sm:$0xf] }
 0x327   :  { %3374 = vmatpush.bf16.msra.mxu1 %v5162_v52  ;;  %v5916_v52 = vld [vmem:[%s8779_s8 + $0x4f8] sm:$0xf0]  ;;  %v5055_v23 = vld [vmem:[%s8779_s8 + $0x1ec] sm:$0xf0] }
 0x328   :  { %3414 = vmatpush.bf16.msra.mxu3 %v4998_v34  ;;  %v5271_v34 = vld [vmem:[%s8779_s8 + $0x3a4] sm:$0xf0]  ;;  %v5446_v51 = vor.u32 %v5916_v52, %v5445_v32  ;;  %v5843_v32 = vld [vmem:[%s8779_s8 + $0x2b4] sm:$0xf]  ;;  %v5167_v52 = vld [vmem:[%s8779_s8 + $0x2cc] sm:$0xf0] }
 0x329   :  { %3387 = vmatpush.bf16.msra.mxu2 %v5414_v36  ;;  %3365 = vmatmul.bf16.vlgmr.msrb.gmra.mxu0 %v7866_v39  ;;  %v5501_v36 = vld [vmem:[%s8779_s8 + $0x550] sm:$0xf]  ;;  %v5274_v40 = vor.u32 %v5870_v33, %v5271_v34  ;;  %v5419_v33 = vld [vmem:[%s8779_s8 + $0x4c4] sm:$0xf0] }
 0x32a   :  { %3427 = vmatpush.bf16.msra.mxu0 %v5250_v63  ;;  %v4829_v63 = vld [vmem:[%s8779_s8 + $0x10] sm:$0xf] }
 0x32b   :  { %3375 = vmatpush.bf16.msra.mxu1 %v5134_v43  ;;  %v5417_v43 = vld [vmem:[%s8779_s8 + $0x4a8] sm:$0xf]  ;;  %v4830_v50 = vor.u32 %v5762_v41, %v4829_v63  ;;  %v5139_v41 = vld [vmem:[%s8779_s8 + $0x294] sm:$0xf0] }
 0x32c   :  { %3415 = vmatpush.bf16.msra.mxu3 %v4970_v47  ;;  %v5502_v47 = vor.u32 %v5930_v38, %v5501_v36  ;;  %v5418_v59 = vor.u32 %v5909_v45, %v5417_v43  ;;  %v5170_v36 = vor.u32 %v5843_v32, %v5167_v52  ;;  %v5881_v38 = vld [vmem:[%s8779_s8 + $0x3e0] sm:$0xf0]  ;;  %v5899_v43 = vld [vmem:[%s8779_s8 + $0x474] sm:$0xf]  ;;  %v5391_v45 = vld [vmem:[%s8779_s8 + $0x48c] sm:$0xf0]  ;;  %v5058_v52 = vor.u32 %v5815_v22, %v5055_v23 }
 0x32d   :  { %3388 = vmatpush.bf16.msra.mxu2 %v5386_v53  ;;  %v5864_v53 = vld [vmem:[%s8779_s8 + $0x35c] sm:$0xf]  ;;  %v5833_v22 = vld [vmem:[%s8779_s8 + $0x260] sm:$0xf0]  ;;  %v5341_v23 = vld [vmem:[%s8779_s8 + $0x408] sm:$0xf] }
 0x32e   :  { %3428 = vmatpush.bf16.msra.mxu0 %v5222_v58  ;;  %v5825_v58 = vld [vmem:[%s8779_s8 + $0x220] sm:$0xf0] }
 0x32f   :  { %3376 = vmatpush.bf16.msra.mxu1 %v5106_v61  ;;  %5514 = vmatmul.msk.bf16.vlgmr.msrb.gmra.mxu3 %vm1247_vm0, %v7874_v44  ;;  %v5030_v61 = vor.u32 %v5808_v48, %v5027_v49  ;;  %v5082_v2 = vor.u32 %v5825_v58, %v5081_v57  ;;  %v5277_v48 = vld [vmem:[%s8779_s8 + $0x390] sm:$0xf]  ;;  %v5874_v49 = vld [vmem:[%s8779_s8 + $0x3a8] sm:$0xf0]  ;;  %v4887_v57 = vld [vmem:[%s8779_s8 + $0x9c] sm:$0xf0] }
 0x330   :  { %3416 = vmatpush.bf16.msra.mxu3 %v4942_v1  ;;  %v5254_v1 = vor.u32 %v5864_v53, %v5251_v56  ;;  %v5773_v56 = vld [vmem:[%s8779_s8 + $0x84] sm:$0xf] }
 0x331   :  { %3389 = vmatpush.bf16.msra.mxu2 %v5358_v4  ;;  %v4999_v4 = vld [vmem:[%s8779_s8 + $0x17c] sm:$0xf0]  ;;  %v5829_v58 = vld [vmem:[%s8779_s8 + $0x244] sm:$0xf] }
 0x332   :  { %3429 = vmatpush.bf16.msra.mxu0 %v5194_v7  ;;  %v5053_v7 = vld [vmem:[%s8779_s8 + $0x1d0] sm:$0xf]  ;;  %v5002_v13 = vor.u32 %v5801_v3, %v4999_v4  ;;  %v4890_v3 = vor.u32 %v5773_v56, %v4887_v57  ;;  %v5033_v4 = vld [vmem:[%s8779_s8 + $0x1a0] sm:$0xf]  ;;  %v5854_v57 = vld [vmem:[%s8779_s8 + $0x308] sm:$0xf0] }
 0x333   :  { %3377 = vmatpush.bf16.msra.mxu1 %v5078_v11  ;;  %v5475_v11 = vld [vmem:[%s8779_s8 + $0x534] sm:$0xf0]  ;;  %v5054_v16 = vor.u32 %v5818_v9, %v5053_v7  ;;  %v5812_v7 = vld [vmem:[%s8779_s8 + $0x1b8] sm:$0xf0]  ;;  %v5766_v9 = vld [vmem:[%s8779_s8 + $0x4c] sm:$0xf] }
 0x334   :  { %3417 = vmatpush.bf16.msra.mxu3 %v4914_v14  ;;  %v5361_v14 = vld [vmem:[%s8779_s8 + $0x438] sm:$0xf]  ;;  %v5478_v19 = vor.u32 %v5920_v10, %v5475_v11  ;;  %v4859_v10 = vld [vmem:[%s8779_s8 + $0x64] sm:$0xf0]  ;;  %v5201_v56 = vld [vmem:[%s8779_s8 + $0x2f0] sm:$0xf] }
 0x335   :  { %3390 = vmatpush.bf16.msra.mxu2 %v5330_v18  ;;  %v5794_v18 = vld [vmem:[%s8779_s8 + $0x12c] sm:$0xf] }
 0x336   :  { %3430 = vmatpush.bf16.msra.mxu0 %v5166_v21  ;;  %v5195_v21 = vld [vmem:[%s8779_s8 + $0x304] sm:$0xf0]  ;;  %v4974_v26 = vor.u32 %v5794_v18, %v4971_v55  ;;  %v5805_v55 = vld [vmem:[%s8779_s8 + $0x180] sm:$0xf0] }
 0x337   :  { %3378 = vmatpush.bf16.msra.mxu1 %v5050_v25  ;;  %v5362_v25 = vor.u32 %v5895_v17, %v5361_v14  ;;  %v5885_v14 = vld [vmem:[%s8779_s8 + $0x404] sm:$0xf]  ;;  %v4862_v17 = vor.u32 %v5766_v9, %v4859_v10  ;;  %v5005_v18 = vld [vmem:[%s8779_s8 + $0x168] sm:$0xf] }
 0x338   :  { %3418 = vmatpush.bf16.msra.mxu3 %v4886_v28  ;;  %v5198_v28 = vor.u32 %v5850_v20, %v5195_v21  ;;  %v4831_v21 = vld [vmem:[%s8779_s8 + $0x2c] sm:$0xf0]  ;;  %v4893_v10 = vld [vmem:[%s8779_s8 + $0x88] sm:$0xf] }
 0x339   :  { %3391 = vmatpush.bf16.msra.mxu2 %v5302_v54  ;;  %v4943_v54 = vld [vmem:[%s8779_s8 + $0x10c] sm:$0xf0] }
 0x33a   :  { %3379 = vmatmul.bf16.vlgmr.msra.gmra.mxu1 %v7836_v24  ;;  %3431 = vmatpush.bf16.msra.mxu0 %v5138_v60  ;;  %v5906_v60 = vld [vmem:[%s8779_s8 + $0x4ac] sm:$0xf]  ;;  %v4946_v37 = vor.u32 %v5787_v30, %v4943_v54  ;;  %v5307_v54 = vld [vmem:[%s8779_s8 + $0x3e4] sm:$0xf0] }
 0x33b   :  { %3441 = vmatpush.bf16.msrb.mxu1 %v5474_v29  ;;  %v5888_v29 = vld [vmem:[%s8779_s8 + $0x418] sm:$0xf0]  ;;  %v5422_v63 = vor.u32 %v5906_v60, %v5419_v33  ;;  %v5878_v30 = vld [vmem:[%s8779_s8 + $0x3cc] sm:$0xf]  ;;  %v4977_v33 = vld [vmem:[%s8779_s8 + $0x130] sm:$0xf] }
 0x33c   :  { %3419 = vmatpush.bf16.msra.mxu3 %v4858_v42  ;;  %v5334_v34 = vor.u32 %v5888_v29, %v5333_v8  ;;  %v5780_v42 = vld [vmem:[%s8779_s8 + $0xbc] sm:$0xf] }
 0x33d   :  { %3392 = vmatpush.bf16.msra.mxu2 %v5274_v40  ;;  %v5836_v40 = vld [vmem:[%s8779_s8 + $0x27c] sm:$0xf] }
 0x33e   :  { %3432 = vmatpush.bf16.msra.mxu0 %v5110_v46  ;;  %v5306_v46 = vor.u32 %v5881_v38, %v5305_v35  ;;  %v5142_v53 = vor.u32 %v5836_v40, %v5139_v41  ;;  %v5868_v8 = vld [vmem:[%s8779_s8 + $0x378] sm:$0xf0]  ;;  %v5310_v35 = vor.u32 %v5878_v30, %v5307_v54  ;;  %v5861_v38 = vld [vmem:[%s8779_s8 + $0x340] sm:$0xf0]  ;;  %v5279_v40 = vld [vmem:[%s8779_s8 + $0x3ac] sm:$0xf0] }
 0x33f   :  { %3442 = vmatpush.bf16.msrb.mxu1 %v5446_v51  ;;  %v4915_v51 = vld [vmem:[%s8779_s8 + $0xd4] sm:$0xf0]  ;;  %v5924_v29 = vld [vmem:[%s8779_s8 + $0x538] sm:$0xf0]  ;;  %v5089_v54 = vld [vmem:[%s8779_s8 + $0x210] sm:$0xf] }
 0x340   :  { %3393 = vmatmul.bf16.vlgmr.msra.gmra.mxu2 %v7838_v27  ;;  %3420 = vmatpush.bf16.msra.mxu3 %v4830_v50  ;;  %v5394_v50 = vor.u32 %v5899_v43, %v5391_v45  ;;  %v5509_v43 = vld [vmem:[%s8779_s8 + $0x558] sm:$0xf]  ;;  %v5931_v45 = vld [vmem:[%s8779_s8 + $0x570] sm:$0xf0] }
 0x341   :  { %3462 = vmatpush.bf16.msrb.mxu2 %v5502_v47  ;;  %v4918_v47 = vor.u32 %v5780_v42, %v4915_v51  ;;  %v5453_v42 = vld [vmem:[%s8779_s8 + $0x4e8] sm:$0xf]  ;;  %v5917_v51 = vld [vmem:[%s8779_s8 + $0x500] sm:$0xf0] }
 0x342   :  { %3433 = vmatpush.bf16.msra.mxu0 %v5082_v2  ;;  %v5278_v2 = vor.u32 %v5874_v49, %v5277_v48  ;;  %v5791_v48 = vld [vmem:[%s8779_s8 + $0x110] sm:$0xf0]  ;;  %v5454_v49 = vor.u32 %v5917_v51, %v5453_v42 }
 0x343   :  { %3443 = vmatpush.bf16.msrb.mxu1 %v5418_v59  ;;  %3421 = vmatmul.bf16.vlgmr.msra.gmra.mxu3 %v7866_v39  ;;  %v5111_v59 = vld [vmem:[%s8779_s8 + $0x25c] sm:$0xf0] }
 0x344   :  { %3483 = vmatpush.bf16.msrb.mxu3 %v5254_v1  ;;  %v5363_v1 = vld [vmem:[%s8779_s8 + $0x454] sm:$0xf0]  ;;  %v5114_v5 = vor.u32 %v5829_v58, %v5111_v59  ;;  %v5425_v58 = vld [vmem:[%s8779_s8 + $0x4b0] sm:$0xf]  ;;  %v5510_v59 = vor.u32 %v5931_v45, %v5509_v43 }
 0x345   :  { %3469 = vmatpush.bf16.msra.mxu2 %v5030_v61  ;;  %v5927_v61 = vld [vmem:[%s8779_s8 + $0x554] sm:$0xf]  ;;  %v5366_v11 = vor.u32 %v5892_v0, %v5363_v1  ;;  %v4921_v0 = vld [vmem:[%s8779_s8 + $0xc0] sm:$0xf]  ;;  %v5784_v1 = vld [vmem:[%s8779_s8 + $0xd8] sm:$0xf0] }
 0x346   :  { %3434 = vmatpush.bf16.msra.mxu0 %v5054_v16  ;;  %v5506_v6 = vor.u32 %v5927_v61, %v5503_v62  ;;  %v5034_v16 = vor.u32 %v5812_v7, %v5033_v4  ;;  %v5202_v62 = vor.u32 %v5854_v57, %v5201_v56  ;;  %v5847_v4 = vld [vmem:[%s8779_s8 + $0x2d0] sm:$0xf0]  ;;  %v4922_v7 = vor.u32 %v5784_v1, %v4921_v0 }
 0x347   :  { %3444 = vmatpush.bf16.msrb.mxu1 %v5390_v12  ;;  %v5822_v12 = vld [vmem:[%s8779_s8 + $0x20c] sm:$0xf] }
 0x348   :  { %3484 = vmatpush.bf16.msrb.mxu3 %v5226_v15  ;;  %v5335_v15 = vld [vmem:[%s8779_s8 + $0x41c] sm:$0xf0] }
 0x349   :  { %3470 = vmatpush.bf16.msra.mxu2 %v5002_v13  ;;  %3435 = vmatmul.bf16.vlgmr.msra.gmra.mxu0 %v7836_v24  ;;  %v5083_v13 = vld [vmem:[%s8779_s8 + $0x224] sm:$0xf0] }
 0x34a   :  { %3497 = vmatpush.bf16.msrb.mxu0 %v5478_v19  ;;  %v5759_v19 = vld [vmem:[%s8779_s8 + $0x14] sm:$0xf]  ;;  %v5086_v20 = vor.u32 %v5822_v12, %v5083_v13  ;;  %v5145_v13 = vld [vmem:[%s8779_s8 + $0x280] sm:$0xf] }
 0x34b   :  { %3445 = vmatpush.bf16.msrb.mxu1 %v5362_v25  ;;  %v5338_v25 = vor.u32 %v5885_v14, %v5335_v15  ;;  %v4834_v32 = vor.u32 %v5759_v19, %v4831_v21  ;;  %v5840_v14 = vld [vmem:[%s8779_s8 + $0x298] sm:$0xf0]  ;;  %v5369_v15 = vld [vmem:[%s8779_s8 + $0x440] sm:$0xf]  ;;  %v5770_v19 = vld [vmem:[%s8779_s8 + $0x68] sm:$0xf0] }
 0x34c   :  { %3485 = vmatpush.bf16.msrb.mxu3 %v5198_v28  ;;  %v5481_v28 = vld [vmem:[%s8779_s8 + $0x520] sm:$0xf]  ;;  %v5117_v21 = vld [vmem:[%s8779_s8 + $0x248] sm:$0xf] }
 0x34d   :  { %3471 = vmatpush.bf16.msra.mxu2 %v4974_v26  ;;  %v5257_v26 = vld [vmem:[%s8779_s8 + $0x360] sm:$0xf] }
 0x34e   :  { %3498 = vmatpush.bf16.msrb.mxu0 %v5450_v31  ;;  %v5006_v31 = vor.u32 %v5805_v55, %v5005_v18  ;;  %v5258_v60 = vor.u32 %v5868_v8, %v5257_v26  ;;  %v5146_v18 = vor.u32 %v5840_v14, %v5145_v13  ;;  %v4865_v55 = vld [vmem:[%s8779_s8 + $0x50] sm:$0xf]  ;;  %v5118_v8 = vor.u32 %v5833_v22, %v5117_v21 }
 0x34f   :  { %3446 = vmatpush.bf16.msrb.mxu1 %v5334_v34  ;;  %v5798_v34 = vld [vmem:[%s8779_s8 + $0x148] sm:$0xf0]  ;;  %v4866_v26 = vor.u32 %v5770_v19, %v4865_v55 }
 0x350   :  { %3486 = vmatpush.bf16.msrb.mxu3 %v5170_v36  ;;  %5515 = vmatmul.msk.bf16.vlgmr.msrb.gmra.mxu2 %vm1247_vm0, %v7874_v44  ;;  %v5229_v36 = vld [vmem:[%s8779_s8 + $0x328] sm:$0xf]  ;;  %v4978_v41 = vor.u32 %v5798_v34, %v4977_v33 }
 0x351   :  { %3472 = vmatpush.bf16.msra.mxu2 %v4946_v37  ;;  %v5482_v37 = vor.u32 %v5924_v29, %v5481_v28  ;;  %v4837_v28 = vld [vmem:[%s8779_s8 + $0x18] sm:$0xf]  ;;  %v5763_v29 = vld [vmem:[%s8779_s8 + $0x30] sm:$0xf0] }
 0x352   :  { %3499 = vmatpush.bf16.msrb.mxu0 %v5422_v63  ;;  %v5871_v63 = vld [vmem:[%s8779_s8 + $0x394] sm:$0xf] }
 0x353   :  { %3447 = vmatpush.bf16.msrb.mxu1 %v5306_v46  ;;  %v5230_v46 = vor.u32 %v5861_v38, %v5229_v36  ;;  %v5285_v36 = vld [vmem:[%s8779_s8 + $0x398] sm:$0xf]  ;;  %v5875_v38 = vld [vmem:[%s8779_s8 + $0x3b0] sm:$0xf0] }
 0x354   :  { %3487 = vmatpush.bf16.msrb.mxu3 %v5142_v53  ;;  %v5282_v53 = vor.u32 %v5871_v63, %v5279_v40  ;;  %v5286_v51 = vor.u32 %v5875_v38, %v5285_v36 }
 0x355   :  { %3473 = vmatpush.bf16.msra.mxu2 %v4918_v47  ;;  %v4949_v47 = vld [vmem:[%s8779_s8 + $0xf8] sm:$0xf] }
 0x356   :  { %3500 = vmatpush.bf16.msrb.mxu0 %v5394_v50  ;;  %v5910_v50 = vld [vmem:[%s8779_s8 + $0x4c8] sm:$0xf0]  ;;  %v4950_v61 = vor.u32 %v5791_v48, %v4949_v47 }
 0x357   :  { %3448 = vmatpush.bf16.msrb.mxu1 %v5278_v2  ;;  %v5426_v2 = vor.u32 %v5910_v50, %v5425_v58 }
 0x358   :  { %3488 = vmatpush.bf16.msrb.mxu3 %v5114_v5  ;;  %v5397_v5 = vld [vmem:[%s8779_s8 + $0x478] sm:$0xf] }
 0x359   :  { %3474 = vmatpush.bf16.msra.mxu2 %v4890_v3  ;;  %v5173_v3 = vld [vmem:[%s8779_s8 + $0x2b8] sm:$0xf] }
 0x35a   :  { %3501 = vmatpush.bf16.msrb.mxu0 %v5366_v11  ;;  %3449 = vmatmul.bf16.vlgmr.msrb.gmra.mxu1 %v7838_v27  ;;  %v5174_v9 = vor.u32 %v5847_v4, %v5173_v3  ;;  %v5777_v11 = vld [vmem:[%s8779_s8 + $0xa0] sm:$0xf0] }
 0x35b   :  { %3518 = vmatpush.bf16.msra.mxu1 %v5506_v6  ;;  %v5903_v6 = vld [vmem:[%s8779_s8 + $0x490] sm:$0xf0] }
 0x35c   :  { %3489 = vmatpush.bf16.msrb.mxu3 %v5086_v20  ;;  %v5398_v12 = vor.u32 %v5903_v6, %v5397_v5 }
 0x35d   :  { %3475 = vmatpush.bf16.msra.mxu2 %v4862_v17  ;;  %v4894_v17 = vor.u32 %v5777_v11, %v4893_v10 }
 0x35e   :  { %3502 = vmatpush.bf16.msrb.mxu0 %v5338_v25  ;;  %v5889_v25 = vld [vmem:[%s8779_s8 + $0x420] sm:$0xf0] }
 0x35f   :  { %3525 = vmatpush.bf16.msrb.mxu1 %v5034_v16  ;;  %v5896_v16 = vld [vmem:[%s8779_s8 + $0x458] sm:$0xf0]  ;;  %v5342_v30 = vor.u32 %v5889_v25, %v5341_v23 }
 0x360   :  { %3490 = vmatpush.bf16.msrb.mxu3 %v5058_v52  ;;  %v5370_v20 = vor.u32 %v5896_v16, %v5369_v15  ;;  %v5882_v52 = vld [vmem:[%s8779_s8 + $0x3e8] sm:$0xf0] }
 0x361   :  { %3476 = vmatpush.bf16.msra.mxu2 %v4834_v32  ;;  %v5313_v32 = vld [vmem:[%s8779_s8 + $0x3d0] sm:$0xf] }
 0x362   :  { %3503 = vmatpush.bf16.msrb.mxu0 %v5310_v35  ;;  %v5314_v34 = vor.u32 %v5882_v52, %v5313_v32  ;;  %v5819_v35 = vld [vmem:[%s8779_s8 + $0x1f0] sm:$0xf0] }
 0x363   :  { %3526 = vmatpush.bf16.msrb.mxu1 %v5006_v31  ;;  %3491 = vmatmul.bf16.vlgmr.msrb.gmra.mxu3 %v7836_v24  ;;  %v5826_v31 = vld [vmem:[%s8779_s8 + $0x228] sm:$0xf0] }
 0x364   :  { %3553 = vmatpush.bf16.msra.mxu3 %v5482_v37  ;;  %3477 = vmatmul.bf16.vlgmr.msra.gmra.mxu2 %v7866_v39  ;;  %v5090_v33 = vor.u32 %v5826_v31, %v5089_v54  ;;  %v5061_v37 = vld [vmem:[%s8779_s8 + $0x1d8] sm:$0xf] }
 0x365   :  { %3539 = vmatpush.bf16.msrb.mxu2 %v5258_v60  ;;  %v4838_v60 = vor.u32 %v5763_v29, %v4837_v28  ;;  %v5062_v42 = vor.u32 %v5819_v35, %v5061_v37 }
 0x366   :  { %3504 = vmatpush.bf16.msrb.mxu0 %v5282_v53 }
 0x367   :  { %3527 = vmatpush.bf16.msrb.mxu1 %v4978_v41  ;;  %v8620_v41 = vld [vmem:[%s8780_s9] sm:$0x7f]  ;;  %s6053_s9 = smov [#allocation4]  }
 0x368   :  { %3554 = vmatpush.bf16.msra.mxu3 %v5454_v49  ;;  %v2274_v19 = vperm.slane %v8620_v41, 2  ;;  %s3883_s1 = sshll.u32 %s6053_s9, 4  ;;  %s3884_s1 = int_to_ptr.vmem [resolvable:$true] %s3883_s1 }
 0x369   :  { %3540 = vmatpush.bf16.msrb.mxu2 %v5230_v46  ;;  %3505 = vmatmul.bf16.vlgmr.msrb.gmra.mxu0 %v7838_v27  ;;  %3891 = dma.vmem_to_hbm [thread:$0]  %s3884_s1, 256, %s3886_s3, [#allocation5], %s6054_s22, %s6054_s22, %s6055_s23  }
 0x36a   :  { %3574 = vmatpush.bf16.msra.mxu0 %v5510_v59  ;;  %5516 = vmatmul.msk.bf16.vlgmr.msra.gmra.mxu1 %vm1247_vm0, %v7874_v44 }
 0x36b   :  { %3528 = vmatpush.bf16.msrb.mxu1 %v4950_v61 }
 0x36c   :  { %3555 = vmatpush.bf16.msra.mxu3 %v5426_v2 }
 0x36d   :  { %3541 = vmatpush.bf16.msrb.mxu2 %v5202_v62  ;;  %v2273_v62 = vperm.slane %v8620_v41, 1 }
 0x36f   :  { %3529 = vmatpush.bf16.msrb.mxu1 %v4922_v7 }
 0x370   :  { %3556 = vmatpush.bf16.msra.mxu3 %v5398_v12 }
 0x371   :  { %3542 = vmatpush.bf16.msrb.mxu2 %v5174_v9 }
 0x373   :  { %3530 = vmatpush.bf16.msrb.mxu1 %v4894_v17 }
 0x374   :  { %3557 = vmatpush.bf16.msra.mxu3 %v5370_v20 }
 0x375   :  { %3543 = vmatpush.bf16.msrb.mxu2 %v5146_v18 }
 0x376   :  { %v3212_v40 = vpop.f32.mrf.mxu0 }
 0x377   :  { %3531 = vmatpush.bf16.msrb.mxu1 %v4866_v26  ;;  %v3226_v63 = vpop.f32.mrf.mxu1 }
 0x378   :  { %3558 = vmatpush.bf16.msra.mxu3 %v5342_v30 }
 0x379   :  { %3544 = vmatpush.bf16.msrb.mxu2 %v5118_v8  ;;  %5517 = vmatmul.msk.bf16.vlgmr.msra.gmra.mxu0 %vm1247_vm0, %v7874_v44  ;;  %v2272_v44 = vperm.slane %v8620_v41, 0 }
 0x37b   :  { %3532 = vmatpush.bf16.msrb.mxu1 %v4838_v60 }
 0x37c   :  { %3559 = vmatpush.bf16.msra.mxu3 %v5314_v34 }
 0x37d   :  { %3545 = vmatpush.bf16.msrb.mxu2 %v5090_v33 }
 0x37e   :  { %3533 = vmatmul.bf16.vlgmr.msrb.gmra.mxu1 %v7866_v39  ;;  %v3214_v48 = vpop.f32.mrf.mxu0 }
 0x37f   :  { %v3228_v43 = vpop.f32.mrf.mxu1 }
 0x380   :  { %3560 = vmatpush.bf16.msra.mxu3 %v5286_v51 }
 0x381   :  { %3546 = vmatpush.bf16.msrb.mxu2 %v5062_v42 }
 0x382   :  { %v3198_v45 = vpop.f32.mrf.mxu3 }
 0x383   :  { %3561 = vmatmul.bf16.vlgmr.msra.gmra.mxu3 %v7838_v27  ;;  %v3199_v46 = vadd.f32 %v3198_v45, %v2272_v44  ;;  %v3240_v47 = vpop.f32.mrf.mxu2 }
 0x384   :  { %3547 = vmatmul.bf16.vlgmr.msrb.gmra.mxu2 %v7836_v24 }
 0x385   :  { %v3213_v39 = vadd.f32 %v3212_v40, %v3199_v46 }
 0x386   :  { %v3282_v61 = vpop.f32.mrf.mxu0 }
 0x387   :  { %v3227_v49 = vadd.f32 %v3226_v63, %v3213_v39  ;;  %v3296_v58 = vpop.f32.mrf.mxu1 }
 0x389   :  { %v3241_v53 = vadd.f32 %v3240_v47, %v3227_v49 }
 0x38a   :  { %v3200_v56 = vpop.f32.mrf.mxu3 }
 0x38b   :  { %v5518_v24 = vmul.f32 -1.442695, %v3241_v53  ;;  %v3201_v57 = vadd.f32 %v3200_v56, %v2272_v44  ;;  %v3242_v27 = vpop.f32.mrf.mxu2 }
 0x38d   :  { %v3215_v50 = vadd.f32 %v3214_v48, %v3201_v57  ;;  %5944 = vpow2.f32 %v5518_v24 }
 0x38e   :  { %v3284_v11 = vpop.f32.mrf.mxu0 }
 0x38f   :  { %v3229_v59 = vadd.f32 %v3228_v43, %v3215_v50  ;;  %v3298_v6 = vpop.f32.mrf.mxu1 }
 0x391   :  { %v3243_v0 = vadd.f32 %v3242_v27, %v3229_v59 }
 0x392   :  { %v3268_v1 = vpop.f32.mrf.mxu3 }
 0x393   :  { %v5525_v2 = vmul.f32 -1.442695, %v3243_v0  ;;  %v3254_v3 = vpop.f32.mrf.mxu2  ;;  %v5945_v5 = vpop.eup %5944 }
 0x394   :  { %v3255_v4 = vadd.f32 %v3254_v3, %v2273_v62  ;;  %v8624_v9 = vadd.f32 1.0, %v5945_v5 }
 0x395   :  { %5946 = vpow2.f32 %v5525_v2 }
 0x396   :  { %v3269_v7 = vadd.f32 %v3268_v1, %v3255_v4  ;;  %5948 = vrcp.f32 %v8624_v9  ;;  %v3352_v28 = vpop.f32.mrf.mxu0  ;;  %vm3642_vm3 = vweird.f32 %v8624_v9  ;;  %v3646_v49 = vand.u32 2147483647, %v8624_v9 }
 0x397   :  { %v3310_v20 = vpop.f32.mrf.mxu1  ;;  %v3648_v53 = vand.u32 2147483648, %v8624_v9 }
 0x398   :  { %v3283_v10 = vadd.f32 %v3282_v61, %v3269_v7  ;;  %v3311_v8 = vadd.f32 %v3310_v20, %v2274_v19  ;;  %vm3647_vm8 = vcmp.eq.f32.partialorder %v3646_v49, 8.507059e+37 }
 0x399   :  { %v3649_v2 = vor.u32 1.1754944e-38, %v3648_v53 }
 0x39a   :  { %v3270_v12 = vpop.f32.mrf.mxu3  ;;  %v3297_v13 = vadd.f32 %v3296_v58, %v3283_v10  ;;  %v2275_v10 = vperm.slane %v8620_v41, 3 }
 0x39b   :  { %v3256_v14 = vpop.f32.mrf.mxu2  ;;  %v5947_v16 = vpop.eup %5946 }
 0x39c   :  { %v3257_v15 = vadd.f32 %v3256_v14, %v2273_v62  ;;  %v5519_v17 = vmul.f32 -1.442695, %v3297_v13  ;;  %v8627_v55 = vadd.f32 1.0, %v5947_v16  ;;  %v8630_v22 = vpop.eup %5948 }
 0x39d   :  { %v3638_v30 = vmul.f32 %v8630_v22, %v8624_v9  ;;  %vm3643_vm4 = vweird.f32 %v8630_v22 }
 0x39e   :  { %5950 = vpow2.f32 %v5519_v17  ;;  %v3271_v18 = vadd.f32 %v3270_v12, %v3257_v15  ;;  %v3354_v44 = vpop.f32.mrf.mxu0  ;;  %vm8653_vm6 = vmor %vm3642_vm3, %vm3643_vm4  ;;  %v3751_v15 = vand.u32 2147483647, %v8627_v55  ;;  %v3753_v16 = vand.u32 2147483648, %v8627_v55 }
 0x39f   :  { %5952 = vrcp.f32 %v8627_v55  ;;  %v3639_v52 = vsub.f32 1.0, %v3638_v30  ;;  %v3312_v33 = vpop.f32.mrf.mxu1  ;;  %vm3747_vm12 = vweird.f32 %v8627_v55 }
 0x3a0   :  { %v3285_v21 = vadd.f32 %v3284_v11, %v3271_v18  ;;  %v3313_v51 = vadd.f32 %v3312_v33, %v2274_v19  ;;  %vm3752_vm0 = vcmp.eq.f32.partialorder %v3751_v15, 8.507059e+37 }
 0x3a1   :  { %v3640_v38 = vmul.f32 %v8630_v22, %v3639_v52 }
 0x3a2   :  { %v3338_v23 = vpop.f32.mrf.mxu3  ;;  %v3299_v25 = vadd.f32 %v3298_v6, %v3285_v21 }
 0x3a3   :  { %v3324_v26 = vpop.f32.mrf.mxu2  ;;  %v3641_v47 = vadd.f32 %v8630_v22, %v3640_v38 }
 0x3a4   :  { %v5951_v29 = vpop.eup %5950  ;;  %v5526_v54 = vmul.f32 -1.442695, %v3299_v25  ;;  %v3325_v32 = vadd.f32 %v3324_v26, %v3311_v8 }
 0x3a5   :  { %v3624_v31 = vadd.f32 1.0, %v5951_v29  ;;  %v8635_v60 = vpop.eup %5952  ;;  %v3645_v61 = vsel %vm8653_vm6, %v8630_v22, %v3641_v47 }
 0x3a6   :  { %5954 = vpow2.f32 %v5526_v54  ;;  %v3339_v34 = vadd.f32 %v3338_v23, %v3325_v32  ;;  %v3743_v42 = vmul.f32 %v8635_v60, %v8627_v55  ;;  %v3650_v7 = vsel %vm3647_vm8, %v3649_v2, %v3645_v61  ;;  %v3366_v11 = vpop.f32.mrf.mxu0 }
 0x3a7   :  { %5956 = vrcp.f32 %v3624_v31  ;;  %v3663_v56 = vand.u32 2147483648, %v3624_v31  ;;  %v3661_v27 = vand.u32 2147483647, %v3624_v31  ;;  %vm3657_vm7 = vweird.f32 %v3624_v31 }
 0x3a8   :  { %v3353_v43 = vadd.f32 %v3352_v28, %v3339_v34  ;;  %v3744_v39 = vsub.f32 1.0, %v3743_v42  ;;  %vm3748_vm11 = vweird.f32 %v8635_v60  ;;  %v3367_v8 = vadd.f32 %v3366_v11, %v2275_v10 }
 0x3a9   :  { %v3664_v3 = vor.u32 1.1754944e-38, %v3663_v56  ;;  %vm3662_vm10 = vcmp.eq.f32.partialorder %v3661_v27, 8.507059e+37  ;;  %vm8670_vm14 = vmor %vm3747_vm12, %vm3748_vm11  ;;  %v3754_v28 = vor.u32 1.1754944e-38, %v3753_v16 }
 0x3aa   :  { %v3340_v37 = vpop.f32.mrf.mxu3  ;;  %v5520_v24 = vmul.f32 -1.442695, %v3353_v43  ;;  %v3745_v62 = vmul.f32 %v8635_v60, %v3744_v39 }
 0x3ab   :  { %v3326_v35 = vpop.f32.mrf.mxu2 }
 0x3ac   :  { %v5955_v36 = vpop.eup %5954  ;;  %v3327_v46 = vadd.f32 %v3326_v35, %v3313_v51  ;;  %v3746_v12 = vadd.f32 %v8635_v60, %v3745_v62 }
 0x3ad   :  { %v5957_v63 = vpop.eup %5956  ;;  %v8640_v40 = vadd.f32 1.0, %v5955_v36 }
 0x3ae   :  { %v3653_v45 = vmul.f32 %v5957_v63, %v3624_v31  ;;  %vm3658_vm5 = vweird.f32 %v5957_v63  ;;  %v3341_v58 = vadd.f32 %v3340_v37, %v3327_v46  ;;  %v3750_v25 = vsel %vm8670_vm14, %v8635_v60, %v3746_v12  ;;  %v3368_v37 = vpop.f32.mrf.mxu0 }
 0x3af   :  { %5958 = vrcp.f32 %v8640_v40  ;;  %vm3659_vm9 = vmor %vm3657_vm7, %vm3658_vm5  ;;  %v3766_v17 = vand.u32 2147483647, %v8640_v40  ;;  %v3768_v18 = vand.u32 2147483648, %v8640_v40  ;;  %vm3762_vm15 = vweird.f32 %v8640_v40 }
 0x3b0   :  { %v3654_v48 = vsub.f32 1.0, %v3653_v45  ;;  %5960 = vpow2.f32 %v5520_v24  ;;  %v3355_v6 = vadd.f32 %v3354_v44, %v3341_v58  ;;  %v3755_v32 = vsel %vm3752_vm0, %v3754_v28, %v3750_v25 }
 0x3b1   :  { %vm3767_vm2 = vcmp.eq.f32.partialorder %v3766_v17, 8.507059e+37  ;;  %v3769_v55 = vor.u32 1.1754944e-38, %v3768_v18  ;;  %v3369_v42 = vadd.f32 %v3368_v37, %v2275_v10  ;;  %v2276_v46 = vperm.slane %v8620_v41, 4 }
 0x3b2   :  { %v3655_v57 = vmul.f32 %v5957_v63, %v3654_v48  ;;  %v3408_v59 = vpop.f32.mrf.mxu3  ;;  %v5527_v21 = vmul.f32 -1.442695, %v3355_v6 }
 0x3b4   :  { %v3656_v0 = vadd.f32 %v5957_v63, %v3655_v57  ;;  %5962 = vpow2.f32 %v5527_v21 }
 0x3b5   :  { %v5959_v1 = vpop.eup %5958 }
 0x3b6   :  { %v3660_v4 = vsel %vm3659_vm9, %v5957_v63, %v3656_v0  ;;  %v3758_v5 = vmul.f32 %v5959_v1, %v8640_v40  ;;  %vm3763_vm13 = vweird.f32 %v5959_v1  ;;  %v5961_v22 = vpop.eup %5960 }
 0x3b7   :  { %v3665_v9 = vsel %vm3662_vm10, %v3664_v3, %v3660_v4  ;;  %v3380_v19 = vpop.f32.mrf.mxu1  ;;  %vm3764_vm1 = vmor %vm3762_vm15, %vm3763_vm13  ;;  %v8678_v54 = vadd.f32 1.0, %v5961_v22  ;;  %v2278_v22 = vperm.slane %v8620_v41, 6 }
 0x3b8   :  { %v3847_v13 = vpack.c.bf16 %v3665_v9, %v3650_v7  ;;  %v3759_v14 = vsub.f32 1.0, %v3758_v5  ;;  %v3381_v31 = vadd.f32 %v3380_v19, %v3367_v8  ;;  %v2277_v8 = vperm.slane %v8620_v41, 5 }
 0x3b9   :  { %5964 = vrcp.f32 %v8678_v54  ;;  %vm3672_vm4 = vweird.f32 %v8678_v54  ;;  %v3676_v17 = vand.u32 2147483647, %v8678_v54  ;;  %v3678_v18 = vand.u32 2147483648, %v8678_v54 }
 0x3ba   :  { %3855 = vst [vmem:[#allocation2] sm:$0xff] %v3847_v13  ;;  %v3760_v20 = vmul.f32 %v5959_v1, %v3759_v14  ;;  %v3410_v29 = vpop.f32.mrf.mxu3  ;;  %v5963_v38 = vpop.eup %5962 }
 0x3bb   :  { %v8681_v40 = vadd.f32 1.0, %v5963_v38  ;;  %vm3677_vm9 = vcmp.eq.f32.partialorder %v3676_v17, 8.507059e+37 }
 0x3bc   :  { %v3761_v26 = vadd.f32 %v5959_v1, %v3760_v20 }
 0x3bd   :  { %vm3777_vm12 = vweird.f32 %v8681_v40 }
 0x3be   :  { %v3765_v30 = vsel %vm3764_vm1, %v5959_v1, %v3761_v26 }
 0x3bf   :  { %v3770_v52 = vsel %vm3767_vm2, %v3769_v55, %v3765_v30  ;;  %v3382_v36 = vpop.f32.mrf.mxu1  ;;  %v8683_v45 = vpop.eup %5964 }
 0x3c0   :  { %v3851_v34 = vpack.c.bf16 %v3770_v52, %v3755_v32  ;;  %v3383_v63 = vadd.f32 %v3382_v36, %v3369_v42  ;;  %v3668_v48 = vmul.f32 %v8683_v45, %v8678_v54  ;;  %vm3673_vm3 = vweird.f32 %v8683_v45 }
 0x3c1   :  { %vm8702_vm5 = vmor %vm3672_vm4, %vm3673_vm3  ;;  %v3679_v54 = vor.u32 1.1754944e-38, %v3678_v18 }
 0x3c2   :  { %3860 = vst [vmem:[#allocation2 + $0x1c] sm:$0xff] %v3851_v34  ;;  %v3669_v27 = vsub.f32 1.0, %v3668_v48 }
 0x3c3   :  { %v3394_v33 = vpop.f32.mrf.mxu2 }
 0x3c4   :  { %v3395_v60 = vadd.f32 %v3394_v33, %v3381_v31  ;;  %v3670_v1 = vmul.f32 %v8683_v45, %v3669_v27 }
 0x3c6   :  { %v3409_v35 = vadd.f32 %v3408_v59, %v3395_v60  ;;  %v3422_v44 = vpop.f32.mrf.mxu3  ;;  %v3436_v57 = vpop.f32.mrf.mxu0  ;;  %v3671_v11 = vadd.f32 %v8683_v45, %v3670_v1 }
 0x3c7   :  { %v3423_v53 = vadd.f32 %v3422_v44, %v2276_v46  ;;  %v3783_v44 = vand.u32 2147483648, %v8681_v40 }
 0x3c8   :  { %v5521_v51 = vmul.f32 -1.442695, %v3409_v35  ;;  %v3675_v26 = vsel %vm8702_vm5, %v8683_v45, %v3671_v11 }
 0x3c9   :  { %v3437_v50 = vadd.f32 %v3436_v57, %v3423_v53  ;;  %v3680_v33 = vsel %vm3677_vm9, %v3679_v54, %v3675_v26  ;;  %v3784_v27 = vor.u32 1.1754944e-38, %v3783_v44 }
 0x3ca   :  { %5966 = vpow2.f32 %v5521_v51 }
 0x3cb   :  { %v3396_v43 = vpop.f32.mrf.mxu2  ;;  %5968 = vrcp.f32 %v8681_v40 }
 0x3cc   :  { %v3397_v47 = vadd.f32 %v3396_v43, %v3383_v63  ;;  %v3781_v63 = vand.u32 2147483647, %v8681_v40 }
 0x3ce   :  { %v3411_v39 = vadd.f32 %v3410_v29, %v3397_v47  ;;  %v3424_v61 = vpop.f32.mrf.mxu3  ;;  %v3438_v12 = vpop.f32.mrf.mxu0  ;;  %vm3782_vm1 = vcmp.eq.f32.partialorder %v3781_v63, 8.507059e+37 }
 0x3cf   :  { %v3425_v4 = vadd.f32 %v3424_v61, %v2276_v46 }
 0x3d0   :  { %v5967_v49 = vpop.eup %5966  ;;  %v5528_v56 = vmul.f32 -1.442695, %v3411_v39 }
 0x3d1   :  { %v3626_v24 = vadd.f32 1.0, %v5967_v49  ;;  %v8689_v59 = vpop.eup %5968  ;;  %v3439_v16 = vadd.f32 %v3438_v12, %v3425_v4 }
 0x3d2   :  { %5970 = vpow2.f32 %v5528_v56  ;;  %v3773_v3 = vmul.f32 %v8689_v59, %v8681_v40  ;;  %vm3778_vm11 = vweird.f32 %v8689_v59 }
 0x3d3   :  { %5972 = vrcp.f32 %v3626_v24  ;;  %v3464_v58 = vpop.f32.mrf.mxu2  ;;  %v3691_v19 = vand.u32 2147483647, %v3626_v24  ;;  %v3693_v20 = vand.u32 2147483648, %v3626_v24  ;;  %vm3687_vm7 = vweird.f32 %v3626_v24  ;;  %vm8721_vm14 = vmor %vm3777_vm12, %vm3778_vm11 }
 0x3d4   :  { %v3774_v14 = vsub.f32 1.0, %v3773_v3 }
 0x3d5   :  { %v3694_v31 = vor.u32 1.1754944e-38, %v3693_v20  ;;  %vm3692_vm10 = vcmp.eq.f32.partialorder %v3691_v19, 8.507059e+37 }
 0x3d6   :  { %v3775_v28 = vmul.f32 %v8689_v59, %v3774_v14 }
 0x3d7   :  { %v3450_v62 = vpop.f32.mrf.mxu1 }
 0x3d8   :  { %v3451_v0 = vadd.f32 %v3450_v62, %v3437_v50  ;;  %v5971_v2 = vpop.eup %5970  ;;  %v3776_v36 = vadd.f32 %v8689_v59, %v3775_v28 }
 0x3d9   :  { %v5973_v6 = vpop.eup %5972  ;;  %v8694_v7 = vadd.f32 1.0, %v5971_v2 }
 0x3da   :  { %v3465_v5 = vadd.f32 %v3464_v58, %v3451_v0  ;;  %v3683_v9 = vmul.f32 %v5973_v6, %v3626_v24  ;;  %vm3688_vm6 = vweird.f32 %v5973_v6  ;;  %v3780_v56 = vsel %vm8721_vm14, %v8689_v59, %v3776_v36 }
 0x3db   :  { %5974 = vrcp.f32 %v8694_v7  ;;  %v3466_v13 = vpop.f32.mrf.mxu2  ;;  %vm3689_vm8 = vmor %vm3687_vm7, %vm3688_vm6  ;;  %v3798_v43 = vand.u32 2147483648, %v8694_v7  ;;  %v3796_v47 = vand.u32 2147483647, %v8694_v7  ;;  %vm3792_vm15 = vweird.f32 %v8694_v7 }
 0x3dc   :  { %v5522_v10 = vmul.f32 -1.442695, %v3465_v5  ;;  %v3684_v15 = vsub.f32 1.0, %v3683_v9  ;;  %v3785_v62 = vsel %vm3782_vm1, %v3784_v27, %v3780_v56 }
 0x3dd   :  { %v3799_v58 = vor.u32 1.1754944e-38, %v3798_v43  ;;  %vm3797_vm2 = vcmp.eq.f32.partialorder %v3796_v47, 8.507059e+37 }
 0x3de   :  { %v3685_v23 = vmul.f32 %v5973_v6, %v3684_v15  ;;  %5976 = vpow2.f32 %v5522_v10 }
 0x3df   :  { %v3452_v21 = vpop.f32.mrf.mxu1 }
 0x3e0   :  { %v3453_v25 = vadd.f32 %v3452_v21, %v3439_v16  ;;  %v3686_v55 = vadd.f32 %v5973_v6, %v3685_v23 }
 0x3e1   :  { %v5975_v30 = vpop.eup %5974 }
 0x3e2   :  { %v3467_v29 = vadd.f32 %v3466_v13, %v3453_v25  ;;  %v3690_v32 = vsel %vm3689_vm8, %v5973_v6, %v3686_v55  ;;  %v3788_v52 = vmul.f32 %v5975_v30, %v8694_v7  ;;  %vm3793_vm13 = vweird.f32 %v5975_v30 }
 0x3e3   :  { %v3695_v34 = vsel %vm3692_vm10, %v3694_v31, %v3690_v32  ;;  %vm3794_vm0 = vmor %vm3792_vm15, %vm3793_vm13 }
 0x3e4   :  { %v5529_v60 = vmul.f32 -1.442695, %v3467_v29  ;;  %v5977_v35 = vpop.eup %5976  ;;  %v3848_v38 = vpack.c.bf16 %v3695_v34, %v3680_v33  ;;  %v3789_v42 = vsub.f32 1.0, %v3788_v52 }
 0x3e5   :  { %v8725_v53 = vadd.f32 1.0, %v5977_v35 }
 0x3e6   :  { %v3492_v45 = vpop.f32.mrf.mxu3  ;;  %3856 = vst [vmem:[#allocation2 + $0x8] sm:$0xff] %v3848_v38  ;;  %v3790_v46 = vmul.f32 %v5975_v30, %v3789_v42  ;;  %5978 = vpow2.f32 %v5529_v60  ;;  %v3506_v40 = vpop.f32.mrf.mxu0 }
 0x3e7   :  { %v3478_v37 = vpop.f32.mrf.mxu2  ;;  %v3520_v48 = vpop.f32.mrf.mxu1  ;;  %5980 = vrcp.f32 %v8725_v53  ;;  %vm3702_vm3 = vweird.f32 %v8725_v53  ;;  %v3706_v28 = vand.u32 2147483647, %v8725_v53  ;;  %v3708_v32 = vand.u32 2147483648, %v8725_v53 }
 0x3e8   :  { %v3479_v51 = vadd.f32 %v3478_v37, %v2277_v8  ;;  %v3791_v24 = vadd.f32 %v5975_v30, %v3790_v46 }
 0x3e9   :  { %vm3707_vm8 = vcmp.eq.f32.partialorder %v3706_v28, 8.507059e+37  ;;  %v3709_v44 = vor.u32 1.1754944e-38, %v3708_v32 }
 0x3ea   :  { %v3493_v39 = vadd.f32 %v3492_v45, %v3479_v51  ;;  %v3795_v50 = vsel %vm3794_vm0, %v5975_v30, %v3791_v24 }
 0x3eb   :  { %v3800_v0 = vsel %vm3797_vm2, %v3799_v58, %v3795_v50 }
 0x3ec   :  { %v3507_v57 = vadd.f32 %v3506_v40, %v3493_v39  ;;  %v3852_v2 = vpack.c.bf16 %v3800_v0, %v3785_v62  ;;  %v5979_v4 = vpop.eup %5978 }
 0x3ed   :  { %v8732_v6 = vadd.f32 1.0, %v5979_v4  ;;  %v5981_v10 = vpop.eup %5980 }
 0x3ee   :  { %v3521_v61 = vadd.f32 %v3520_v48, %v3507_v57  ;;  %3861 = vst [vmem:[#allocation2 + $0x24] sm:$0xff] %v3852_v2  ;;  %v3494_v5 = vpop.f32.mrf.mxu3  ;;  %v3508_v11 = vpop.f32.mrf.mxu0  ;;  %v3698_v14 = vmul.f32 %v5981_v10, %v8725_v53  ;;  %vm3703_vm4 = vweird.f32 %v5981_v10 }
 0x3ef   :  { %v3480_v1 = vpop.f32.mrf.mxu2  ;;  %v3522_v9 = vpop.f32.mrf.mxu1  ;;  %vm8749_vm6 = vmor %vm3702_vm3, %vm3703_vm4  ;;  %vm3807_vm12 = vweird.f32 %v8732_v6  ;;  %v3813_v62 = vand.u32 2147483648, %v8732_v6  ;;  %v3811_v2 = vand.u32 2147483647, %v8732_v6 }
 0x3f0   :  { %v5523_v3 = vmul.f32 -1.442695, %v3521_v61  ;;  %v3481_v59 = vadd.f32 %v3480_v1, %v2277_v8  ;;  %v3699_v18 = vsub.f32 1.0, %v3698_v14 }
 0x3f1   :  { %vm3812_vm1 = vcmp.eq.f32.partialorder %v3811_v2, 8.507059e+37 }
 0x3f2   :  { %5982 = vpow2.f32 %v5523_v3  ;;  %v3495_v7 = vadd.f32 %v3494_v5, %v3481_v59  ;;  %v3700_v21 = vmul.f32 %v5981_v10, %v3699_v18 }
 0x3f3   :  { %5984 = vrcp.f32 %v8732_v6 }
 0x3f4   :  { %v3509_v12 = vadd.f32 %v3508_v11, %v3495_v7  ;;  %v3701_v29 = vadd.f32 %v5981_v10, %v3700_v21 }
 0x3f6   :  { %v3523_v15 = vadd.f32 %v3522_v9, %v3509_v12  ;;  %v3576_v37 = vpop.f32.mrf.mxu0  ;;  %v3705_v38 = vsel %vm8749_vm6, %v5981_v10, %v3701_v29  ;;  %v3814_v10 = vor.u32 1.1754944e-38, %v3813_v62 }
 0x3f7   :  { %v3710_v48 = vsel %vm3707_vm8, %v3709_v44, %v3705_v38 }
 0x3f8   :  { %v5983_v13 = vpop.eup %5982  ;;  %v5530_v17 = vmul.f32 -1.442695, %v3523_v15 }
 0x3f9   :  { %v3628_v16 = vadd.f32 1.0, %v5983_v13  ;;  %v8736_v19 = vpop.eup %5984 }
 0x3fa   :  { %v3803_v25 = vmul.f32 %v8736_v19, %v8732_v6  ;;  %vm3808_vm11 = vweird.f32 %v8736_v19 }
 0x3fb   :  { %5986 = vrcp.f32 %v3628_v16  ;;  %v3534_v20 = vpop.f32.mrf.mxu1  ;;  %v3723_v52 = vand.u32 2147483648, %v3628_v16  ;;  %v3721_v60 = vand.u32 2147483647, %v3628_v16  ;;  %vm3717_vm7 = vweird.f32 %v3628_v16  ;;  %vm3809_vm14 = vmor %vm3807_vm12, %vm3808_vm11 }
 0x3fc   :  { %5988 = vpow2.f32 %v5530_v17  ;;  %v3535_v54 = vadd.f32 %v3534_v20, %v2278_v22  ;;  %v3804_v41 = vsub.f32 1.0, %v3803_v25 }
 0x3fd   :  { %v3724_v43 = vor.u32 1.1754944e-38, %v3723_v52  ;;  %vm3722_vm10 = vcmp.eq.f32.partialorder %v3721_v60, 8.507059e+37 }
 0x3fe   :  { %v3805_v45 = vmul.f32 %v8736_v19, %v3804_v41  ;;  %v3578_v59 = vpop.f32.mrf.mxu0 }
 0x400   :  { %v3806_v58 = vadd.f32 %v8736_v19, %v3805_v45 }
 0x401   :  { %v5987_v23 = vpop.eup %5986 }
 0x402   :  { %v5989_v26 = vpop.eup %5988  ;;  %v3713_v8 = vmul.f32 %v5987_v23, %v3628_v16  ;;  %vm3718_vm5 = vweird.f32 %v5987_v23  ;;  %v3810_v7 = vsel %vm3809_vm14, %v8736_v19, %v3806_v58 }
 0x403   :  { %v8743_v55 = vadd.f32 1.0, %v5989_v26  ;;  %v3536_v51 = vpop.f32.mrf.mxu1  ;;  %vm3719_vm9 = vmor %vm3717_vm7, %vm3718_vm5  ;;  %v3815_v6 = vsel %vm3812_vm1, %v3814_v10, %v3810_v7  ;;  %vm3858_vm7 = vcmask 125952  }
 0x404   :  { %v3714_v30 = vsub.f32 1.0, %v3713_v8  ;;  %v3537_v53 = vadd.f32 %v3536_v51, %v2278_v22 }
 0x405   :  { %5990 = vrcp.f32 %v8743_v55  ;;  %v3828_v0 = vand.u32 2147483648, %v8743_v55  ;;  %v3826_v4 = vand.u32 2147483647, %v8743_v55  ;;  %vm3822_vm15 = vweird.f32 %v8743_v55 }
 0x406   :  { %v3562_v33 = vpop.f32.mrf.mxu3  ;;  %v3715_v34 = vmul.f32 %v5987_v23, %v3714_v30 }
 0x407   :  { %v3548_v31 = vpop.f32.mrf.mxu2  ;;  %v3829_v11 = vor.u32 1.1754944e-38, %v3828_v0  ;;  %vm3827_vm2 = vcmp.eq.f32.partialorder %v3826_v4, 8.507059e+37 }
 0x408   :  { %v3549_v35 = vadd.f32 %v3548_v31, %v3535_v54  ;;  %v3716_v42 = vadd.f32 %v5987_v23, %v3715_v34 }
 0x40a   :  { %v3563_v63 = vadd.f32 %v3562_v33, %v3549_v35  ;;  %v3720_v46 = vsel %vm3719_vm9, %v5987_v23, %v3716_v42 }
 0x40b   :  { %v5991_v39 = vpop.eup %5990  ;;  %v3725_v49 = vsel %vm3722_vm10, %v3724_v43, %v3720_v46 }
 0x40c   :  { %v3577_v47 = vadd.f32 %v3576_v37, %v3563_v63  ;;  %v3849_v40 = vpack.c.bf16 %v3725_v49, %v3710_v48  ;;  %v3818_v56 = vmul.f32 %v5991_v39, %v8743_v55  ;;  %vm3823_vm13 = vweird.f32 %v5991_v39 }
 0x40d   :  { %vm3824_vm0 = vmor %vm3822_vm15, %vm3823_vm13 }
 0x40e   :  { %v5524_v24 = vmul.f32 -1.442695, %v3577_v47  ;;  %3857 = vst [vmem:[#allocation2 + $0x10] sm:$0xff] %v3849_v40  ;;  %v3819_v50 = vsub.f32 1.0, %v3818_v56  ;;  %v3564_v61 = vpop.f32.mrf.mxu3 }
 0x40f   :  { %v3550_v57 = vpop.f32.mrf.mxu2 }
 0x410   :  { %v3551_v27 = vadd.f32 %v3550_v57, %v3537_v53  ;;  %5992 = vpow2.f32 %v5524_v24  ;;  %v3820_v3 = vmul.f32 %v5991_v39, %v3819_v50 }
 0x412   :  { %v3565_v1 = vadd.f32 %v3564_v61, %v3551_v27  ;;  %v3821_v9 = vadd.f32 %v5991_v39, %v3820_v3 }
 0x414   :  { %v3579_v5 = vadd.f32 %v3578_v59, %v3565_v1  ;;  %v3825_v14 = vsel %vm3824_vm0, %v5991_v39, %v3821_v9 }
 0x415   :  { %v3830_v15 = vsel %vm3827_vm2, %v3829_v11, %v3825_v14 }
 0x416   :  { %v5531_v12 = vmul.f32 -1.442695, %v3579_v5  ;;  %v5993_v13 = vpop.eup %5992  ;;  %v3853_v17 = vpack.c.bf16 %v3830_v15, %v3815_v6 }
 0x417   :  { %v3629_v16 = vadd.f32 1.0, %v5993_v13 }
 0x418   :  { %5994 = vpow2.f32 %v5531_v12  ;;  %3862 = vst [vmem:[#allocation2 + $0x2c] sm:$0xff] %v3853_v17 }
 0x419   :  { %5996 = vrcp.f32 %v3629_v16  ;;  %v3738_v23 = vand.u32 2147483648, %v3629_v16  ;;  %v3736_v26 = vand.u32 2147483647, %v3629_v16  ;;  %vm3732_vm4 = vweird.f32 %v3629_v16 }
 0x41b   :  { %v3739_v55 = vor.u32 1.1754944e-38, %v3738_v23  ;;  %vm3737_vm6 = vcmp.eq.f32.partialorder %v3736_v26, 8.507059e+37 }
 0x41e   :  { %v5995_v18 = vpop.eup %5994 }
 0x41f   :  { %v3636_v19 = vadd.f32 1.0, %v5995_v18  ;;  %v5997_v20 = vpop.eup %5996 }
 0x420   :  { %v3728_v21 = vmul.f32 %v5997_v20, %v3629_v16  ;;  %vm3733_vm3 = vweird.f32 %v5997_v20 }
 0x421   :  { %5998 = vrcp.f32 %v3636_v19  ;;  %vm3734_vm5 = vmor %vm3732_vm4, %vm3733_vm3  ;;  %v3843_v41 = vand.u32 2147483648, %v3636_v19  ;;  %v3841_v33 = vand.u32 2147483647, %v3636_v19  ;;  %vm3837_vm9 = vweird.f32 %v3636_v19 }
 0x422   :  { %v3729_v22 = vsub.f32 1.0, %v3728_v21 }
 0x423   :  { %v3844_v60 = vor.u32 1.1754944e-38, %v3843_v41  ;;  %vm3842_vm11 = vcmp.eq.f32.partialorder %v3841_v33, 8.507059e+37 }
 0x424   :  { %v3730_v25 = vmul.f32 %v5997_v20, %v3729_v22 }
 0x426   :  { %v3731_v28 = vadd.f32 %v5997_v20, %v3730_v25 }
 0x427   :  { %v5999_v8 = vpop.eup %5998 }
 0x428   :  { %v3833_v29 = vmul.f32 %v5999_v8, %v3636_v19  ;;  %v3735_v30 = vsel %vm3734_vm5, %v5997_v20, %v3731_v28  ;;  %vm3838_vm8 = vweird.f32 %v5999_v8 }
 0x429   :  { %v3740_v54 = vsel %vm3737_vm6, %v3739_v55, %v3735_v30  ;;  %vm3839_vm10 = vmor %vm3837_vm9, %vm3838_vm8 }
 0x42a   :  { %v3834_v31 = vsub.f32 1.0, %v3833_v29  ;;  %v3850_v32 = vpack.c.bf16 %v3740_v54, %v3740_v54 }
 0x42c   :  { %v3835_v52 = vmul.f32 %v5999_v8, %v3834_v31  ;;  %3859 = vst.msk [vmem:[#allocation2 + $0x18] sm:$0xf] %vm3858_vm7, %v3850_v32 }
 0x42e   :  { %v3836_v34 = vadd.f32 %v5999_v8, %v3835_v52 }
 0x430   :  { %v3840_v37 = vsel %vm3839_vm10, %v5999_v8, %v3836_v34 }
 0x431   :  { %v3845_v35 = vsel %vm3842_vm11, %v3844_v60, %v3840_v37 }
 0x432   :  { %v3854_v36 = vpack.c.bf16 %v3845_v35, %v3845_v35 }
 0x434   :  { %3863 = vst.msk [vmem:[#allocation2 + $0x34] sm:$0xf] %vm3858_vm7, %v3854_v36 }
 0x435   :  { %3878 = dma.vmem_to_hbm [thread:$0]  %s3871_s24, 896, %s3873_s27, [#allocation3], %s6057_s2, %s6057_s2, %s6058_s28  }
 0x436   :  { %6048 = dma.done.wait [#allocation3], 896  }
 0x437   :  { %6049 = vsyncadd [#allocation3], 4294966400 }
 0x438   :  { %6050 = dma.done.wait [#allocation5], 256  }
 0x439   :  { %6051 = vsyncadd [#allocation5], 4294967040 }
 0x43a   :  { %3900 = vsyncpa [#allocation3], 1 }
 0x43b   :  { %3901 = vsyncpa [#allocation5], 1 }

</bundles_post_ra>
